<compile_context>
chip_gen: v7x
topology: tpu7x:2x2x1
jax: 0.10.0
libtpu: 0.0.40
codegen_flags: <defaults>
</compile_context>

<pallas_src>
import functools

import jax
import jax.numpy as jnp
from jax.experimental import pallas as pl
from jax.experimental.pallas import tpu as pltpu


def _round_up(x, m):
    return ((x + m - 1) // m) * m


# ----------------------------------------------------------------------------
# Fused kernel: layer-0 projection -> L-layer recurrence -> FC head
# ----------------------------------------------------------------------------
def _lstm_fused_kernel(num_layers,
                       x_ref, w_ih0_ref, b0_ref, w_hh_ref,
                       w_ih_rest_ref, b_rest_ref, w_fc_ref, b_fc_ref,
                       out_hs_ref, out_fc_ref,
                       h_scr, c_scr, gx_scr, *maybe_hs):
    """All-in-one LSTM stack.

    x_ref        : (T*Bp, Dp)      padded time-major inputs (flat)
    w_ih0_ref    : (Dp, 4Hp)       layer-0 input weights (transposed, gate-padded)
    b0_ref       : (1, 4Hp)        layer-0 folded bias (b_ih + b_hh)
    w_hh_ref     : (L, Hp, 4Hp)    recurrent weights
    w_ih_rest_ref: (max(L-1,1), Hp, 4Hp)  input weights for layers 1..L-1
    b_rest_ref   : (max(L-1,1), 1, 4Hp)   folded biases for layers 1..L-1
    w_fc_ref     : (Hp, Cp)        FC head weights (transposed, padded)
    b_fc_ref     : (1, Cp)         FC head bias
    out_hs_ref   : (T*Bp, Hp)      last-layer hidden states (flat time-major)
    out_fc_ref   : (T*Bp, Cp)      FC head output
    """
    L = num_layers
    Hp = w_hh_ref.shape[1]
    TB = gx_scr.shape[0]
    Bp = h_scr.shape[0]
    T = TB // Bp
    hs_scr = maybe_hs[0] if maybe_hs else None

    # Prologue: hoisted layer-0 input projection — one big lane-dense MXU matmul
    # over the whole sequence instead of T small ones inside the recurrence.
    gx_scr[...] = (
        jnp.dot(x_ref[...], w_ih0_ref[...], preferred_element_type=jnp.float32)
        + b0_ref[...]
    )

    for layer in range(L):
        h_scr[...] = jnp.zeros_like(h_scr)
        c_scr[...] = jnp.zeros_like(c_scr)
        # Last layer writes directly to the output ref (no extra VMEM copy).
        dst = out_hs_ref if layer == L - 1 else hs_scr

        def cell(off, layer=layer, dst=dst):
            # Per-timestep work: only the recurrent matmul + gate nonlinearities.
            gates = gx_scr[pl.ds(off, Bp), :] + jnp.dot(
                h_scr[...], w_hh_ref[layer],
                preferred_element_type=jnp.float32)            # (Bp, 4Hp)
            i_g = jax.nn.sigmoid(gates[:, 0 * Hp:1 * Hp])
            f_g = jax.nn.sigmoid(gates[:, 1 * Hp:2 * Hp])
            g_g = jnp.tanh(gates[:, 2 * Hp:3 * Hp])
            o_g = jax.nn.sigmoid(gates[:, 3 * Hp:4 * Hp])
            c_new = f_g * c_scr[...] + i_g * g_g
            h_new = o_g * jnp.tanh(c_new)
            c_scr[...] = c_new
            h_scr[...] = h_new
            dst[pl.ds(off, Bp), :] = h_new

        if T <= 8:
            # Short fixed sequence: fully unroll (bounded register pressure).
            for t in range(T):
                cell(t * Bp)
        else:
            # Visible-to-scheduler loop with modest unroll: MXU/EUP overlap
            # across adjacent steps without blowing the 64-vreg file.
            def step(t, carry):
                cell(pl.multiple_of(t * Bp, Bp))
                return carry
            jax.lax.fori_loop(0, T, step, 0, unroll=4)

        if layer != L - 1:
            # Hoisted input projection for the next layer: ONE whole-sequence
            # matmul on the VMEM-resident previous-layer hiddens.
            gx_scr[...] = (
                jnp.dot(hs_scr[...], w_ih_rest_ref[layer],
                        preferred_element_type=jnp.float32)
                + b_rest_ref[layer]
            )

    # Epilogue: FC head straight off the VMEM-resident last-layer hiddens.
    out_fc_ref[...] = (
        jnp.dot(out_hs_ref[...], w_fc_ref[...],
                preferred_element_type=jnp.float32)
        + b_fc_ref[...]
    )


# ----------------------------------------------------------------------------
# Wrapper
# ----------------------------------------------------------------------------
def lstm_fused_pallas(x2d, w_ih0, b0, w_hh_all, w_ih_rest, b_rest, w_fc, b_fc,
                      *, batch, num_layers):
    TB, Dp = x2d.shape
    G4 = w_ih0.shape[1]
    Hp = w_hh_all.shape[1]
    Cp = w_fc.shape[1]
    L = num_layers
    Lr = w_ih_rest.shape[0]

    scratch = [
        pltpu.VMEM((batch, Hp), jnp.float32),   # h state
        pltpu.VMEM((batch, Hp), jnp.float32),   # c state
        pltpu.VMEM((TB, G4), jnp.float32),      # current-layer input gates
    ]
    if L > 1:
        scratch.append(pltpu.VMEM((TB, Hp), jnp.float32))   # prev-layer hiddens

    # Explicit, footprint-derived VMEM limit (safe on v5e/v6e/v7x); at large
    # T*Hp this should be replaced by the time-chunked grid (see TODO above).
    vmem_need = 4 * (
        TB * Dp + Dp * G4 + G4            # x, w_ih0, b0
        + L * Hp * G4                     # w_hh
        + Lr * (Hp * G4 + G4)             # w_ih_rest, b_rest
        + Hp * Cp + Cp                    # fc
        + TB * Hp + TB * Cp               # outputs
        + 2 * batch * Hp + TB * G4        # h, c, gx scratch
        + (TB * Hp if L > 1 else 0))      # hs scratch
    vmem_limit = int(min(max(2 * vmem_need, 16 << 20), 48 << 20))

    return pl.pallas_call(
        functools.partial(_lstm_fused_kernel, L),
        out_shape=(jax.ShapeDtypeStruct((TB, Hp), jnp.float32),
                   jax.ShapeDtypeStruct((TB, Cp), jnp.float32)),
        in_specs=[
            pl.BlockSpec((TB, Dp), lambda: (0, 0)),
            pl.BlockSpec((Dp, G4), lambda: (0, 0)),
            pl.BlockSpec((1, G4), lambda: (0, 0)),
            pl.BlockSpec((L, Hp, G4), lambda: (0, 0, 0)),
            pl.BlockSpec((Lr, Hp, G4), lambda: (0, 0, 0)),
            pl.BlockSpec((Lr, 1, G4), lambda: (0, 0, 0)),
            pl.BlockSpec((Hp, Cp), lambda: (0, 0)),
            pl.BlockSpec((1, Cp), lambda: (0, 0)),
        ],
        out_specs=(pl.BlockSpec((TB, Hp), lambda: (0, 0)),
                   pl.BlockSpec((TB, Cp), lambda: (0, 0))),
        scratch_shapes=scratch,
        compiler_params=pltpu.CompilerParams(vmem_limit_bytes=vmem_limit),
    )(x2d, w_ih0, b0, w_hh_all, w_ih_rest, b_rest, w_fc, b_fc)


@functools.partial(jax.jit,
                   static_argnames=("hidden_size", "num_layers", "num_classes"))
def lstm_forward(x, params, *, hidden_size, num_layers, num_classes):
    """Reproduces LSTM.forward: returns (fc_0(out), out) with out: (B, T, H)."""
    x = x.astype(jnp.float32)
    B, T, D = x.shape
    H, C = hidden_size, num_classes
    Hp = _round_up(H, 128)
    Bp = _round_up(B, 8)
    Dp = _round_up(D, 128)

    # Time-major, padded to (sublane, lane) tiles, flattened to 2-D.
    x_tm = jnp.swapaxes(x, 0, 1)                                  # (T, B, D)
    x_tm = jnp.pad(x_tm, ((0, 0), (0, Bp - B), (0, Dp - D)))      # (T, Bp, Dp)
    x2d = x_tm.reshape(T * Bp, Dp)

    w_ih0, b0 = params["ih0"]
    w_fc, b_fc = params["fc"]
    hs2d, fc2d = lstm_fused_pallas(
        x2d, w_ih0, b0, params["w_hh"], params["w_ih_rest"], params["b_rest"],
        w_fc, b_fc, batch=Bp, num_layers=num_layers)

    hs = hs2d.reshape(T, Bp, Hp)[:, :B, :H]
    out = jnp.swapaxes(hs, 0, 1)                                  # (B, T, H)
    Cp = fc2d.shape[1]
    out_0 = jnp.swapaxes(fc2d.reshape(T, Bp, Cp)[:, :B, :C], 0, 1)  # (B, T, C)
    return out_0, out


# ----------------------------------------------------------------------------
# Parameter init (PyTorch-style uniform(-1/sqrt(H), 1/sqrt(H))) + padded layout
# ----------------------------------------------------------------------------
def _pad_gate_weight_t(w, H, Hp, Kp):
    """Torch (4H, K) gate-major weight -> transposed, per-gate lane-padded (Kp, 4Hp)."""
    K = w.shape[1]
    out = jnp.zeros((Kp, 4 * Hp), jnp.float32)
    for g in range(4):
        out = out.at[:K, g * Hp:g * Hp + H].set(w[g * H:(g + 1) * H, :].T)
    return out


def _pad_gate_bias(b, H, Hp):
    out = jnp.zeros((1, 4 * Hp), jnp.float32)
    for g in range(4):
        out = out.at[0, g * Hp:g * Hp + H].set(b[g * H:(g + 1) * H])
    return out


def init_params(key, input_size, hidden_size, num_layers, num_classes):
    H, D, L, C = hidden_size, input_size, num_layers, num_classes
    Hp = _round_up(H, 128)
    Dp = _round_up(D, 128)
    Cp = _round_up(C, 128)
    bound = 1.0 / float(H) ** 0.5

    def u(k, shape):
        return jax.random.uniform(k, shape, jnp.float32, -bound, bound)

    raw = {"lstm": [], "fc": None}      # torch-layout copies for the reference

    w_hh_all = []
    w_ih_rest = []       # only layers 1..L-1 (no dummy slot-0 plane)
    b_rest = []
    w_ih0 = b0 = None

    for layer in range(L):
        d_in = D if layer == 0 else H
        key, k1, k2, k3, k4 = jax.random.split(key, 5)
        w_ih = u(k1, (4 * H, d_in))   # torch: weight_ih_l{k}
        w_hh = u(k2, (4 * H, H))      # torch: weight_hh_l{k}
        b_ih = u(k3, (4 * H,))
        b_hh = u(k4, (4 * H,))
        raw["lstm"].append((w_ih, w_hh, b_ih, b_hh))

        kp_in = Dp if layer == 0 else Hp
        w_ih_p = _pad_gate_weight_t(w_ih, H, Hp, kp_in)
        b_p = _pad_gate_bias(b_ih + b_hh, H, Hp)
        w_hh_all.append(_pad_gate_weight_t(w_hh, H, Hp, Hp))
        if layer == 0:
            w_ih0, b0 = w_ih_p, b_p
        else:
            w_ih_rest.append(w_ih_p)
            b_rest.append(b_p)

    if not w_ih_rest:   # L == 1: keep a tiny zero plane so arrays are non-empty
        w_ih_rest = [jnp.zeros((Hp, 4 * Hp), jnp.float32)]
        b_rest = [jnp.zeros((1, 4 * Hp), jnp.float32)]

    key, k1, k2 = jax.random.split(key, 3)
    w_fc = jax.random.uniform(k1, (C, H), jnp.float32, -bound, bound)
    b_fc = jax.random.uniform(k2, (C,), jnp.float32, -bound, bound)
    raw["fc"] = (w_fc, b_fc)

    params = {
        "ih0": (w_ih0, b0),                        # (Dp, 4Hp), (1, 4Hp)
        "w_hh": jnp.stack(w_hh_all),               # (L, Hp, 4Hp)
        "w_ih_rest": jnp.stack(w_ih_rest),         # (max(L-1,1), Hp, 4Hp)
        "b_rest": jnp.stack(b_rest),               # (max(L-1,1), 1, 4Hp)
        "fc": (jnp.zeros((Hp, Cp), jnp.float32).at[:H, :C].set(w_fc.T),
               jnp.zeros((1, Cp), jnp.float32).at[0, :C].set(b_fc)),
    }
    return params, raw


# ----------------------------------------------------------------------------
# Pure-JAX reference (semantics of torch.nn.LSTM + Linear) for validation
# ----------------------------------------------------------------------------
def reference_forward(x, raw, hidden_size, num_layers):
    x = x.astype(jnp.float32)
    B, T, _ = x.shape
    H = hidden_size
    cur = x
    for layer in range(num_layers):
        w_ih, w_hh, b_ih, b_hh = raw["lstm"][layer]

        def step(carry, x_t):
            h, c = carry
            gates = x_t @ w_ih.T + h @ w_hh.T + b_ih + b_hh
            i, f, g, o = jnp.split(gates, 4, axis=-1)
            i = jax.nn.sigmoid(i)
            f = jax.nn.sigmoid(f)
            g = jnp.tanh(g)
            o = jax.nn.sigmoid(o)
            c = f * c + i * g
            h = o * jnp.tanh(c)
            return (h, c), h

        init = (jnp.zeros((B, H), jnp.float32), jnp.zeros((B, H), jnp.float32))
        _, hs = jax.lax.scan(step, init, jnp.swapaxes(cur, 0, 1))
        cur = jnp.swapaxes(hs, 0, 1)

    w_fc, b_fc = raw["fc"]
    out_0 = cur @ w_fc.T + b_fc
    return out_0, cur


# ----------------------------------------------------------------------------
if __name__ == "__main__":
    INPUT_SIZE = 16
    HIDDEN_SIZE = 32
    NUM_LAYERS = 2
    NUM_CLASSES = 5
    BATCH = 2
    SEQ = 8

    key = jax.random.PRNGKey(0)
    key, pkey, xkey = jax.random.split(key, 3)

    params, raw = init_params(pkey, INPUT_SIZE, HIDDEN_SIZE, NUM_LAYERS, NUM_CLASSES)
    x = jax.random.normal(xkey, (BATCH, SEQ, INPUT_SIZE), jnp.float32)

    out_0, out = lstm_forward(
        x, params,
        hidden_size=HIDDEN_SIZE, num_layers=NUM_LAYERS, num_classes=NUM_CLASSES,
    )
    jax.block_until_ready((out_0, out))

    ref_out_0, ref_out = reference_forward(x, raw, HIDDEN_SIZE, NUM_LAYERS)

    assert out.shape == (BATCH, SEQ, HIDDEN_SIZE)
    assert out_0.shape == (BATCH, SEQ, NUM_CLASSES)
    assert jnp.allclose(out, ref_out, atol=1e-5, rtol=1e-5)
    assert jnp.allclose(out_0, ref_out_0, atol=1e-5, rtol=1e-5)

    print("KERNEL_OK")
</pallas_src>

<mosaic_0001>
module attributes {stable_mosaic.version = 11 : i64} {
  func.func @_lstm_fused_kernel(%arg0: memref<64x128xf32, #tpu.memory_space<vmem>>, %arg1: memref<128x512xf32, #tpu.memory_space<vmem>>, %arg2: memref<1x512xf32, #tpu.memory_space<vmem>>, %arg3: memref<2x128x512xf32, #tpu.memory_space<vmem>>, %arg4: memref<1x128x512xf32, #tpu.memory_space<vmem>>, %arg5: memref<1x1x512xf32, #tpu.memory_space<vmem>>, %arg6: memref<128x128xf32, #tpu.memory_space<vmem>>, %arg7: memref<1x128xf32, #tpu.memory_space<vmem>>, %arg8: memref<64x128xf32, #tpu.memory_space<vmem>>, %arg9: memref<64x128xf32, #tpu.memory_space<vmem>>, %arg10: memref<8x128xf32, #tpu.memory_space<vmem>>, %arg11: memref<8x128xf32, #tpu.memory_space<vmem>>, %arg12: memref<64x512xf32, #tpu.memory_space<vmem>>, %arg13: memref<64x128xf32, #tpu.memory_space<vmem>>) attributes {dimension_semantics = [], scalar_prefetch = 0 : i64, scratch_operands = 4 : i64, tpu.core_type = #tpu.core_type<tc>} {
    %c0 = arith.constant 0 : index
    %c0_0 = arith.constant 0 : index
    %0 = vector.load %arg0[%c0, %c0_0] : memref<64x128xf32, #tpu.memory_space<vmem>>, vector<64x128xf32>
    %c0_1 = arith.constant 0 : index
    %c0_2 = arith.constant 0 : index
    %1 = vector.load %arg1[%c0_1, %c0_2] : memref<128x512xf32, #tpu.memory_space<vmem>>, vector<128x512xf32>
    %cst = arith.constant dense<0.000000e+00> : vector<64x512xf32>
    %2 = tpu.matmul %0, %1, %cst {dimension_numbers = #tpu.dot_dimension_numbers<[1], [0], [0], [1], [0, 0, 1, 1], [], []>} : vector<64x128xf32>, vector<128x512xf32>, vector<64x512xf32> -> vector<64x512xf32>
    %c0_3 = arith.constant 0 : index
    %c0_4 = arith.constant 0 : index
    %3 = vector.load %arg2[%c0_3, %c0_4] : memref<1x512xf32, #tpu.memory_space<vmem>>, vector<1x512xf32>
    %4 = vector.broadcast %3 : vector<1x512xf32> to vector<64x512xf32>
    %5 = arith.addf %2, %4 : vector<64x512xf32>
    %c0_5 = arith.constant 0 : index
    %c0_6 = arith.constant 0 : index
    %6 = vector.load %arg12[%c0_5, %c0_6] : memref<64x512xf32, #tpu.memory_space<vmem>>, vector<64x512xf32>
    tpu.vector_store %arg12[%c0_5, %c0_6], %5 {strides = array<i32>} : memref<64x512xf32, #tpu.memory_space<vmem>>, vector<64x512xf32>,
    %cst_7 = arith.constant 0.000000e+00 : f32
    %7 = vector.broadcast %cst_7 : f32 to vector<8x128xf32>
    %c0_8 = arith.constant 0 : index
    %c0_9 = arith.constant 0 : index
    %8 = vector.load %arg10[%c0_8, %c0_9] : memref<8x128xf32, #tpu.memory_space<vmem>>, vector<8x128xf32>
    tpu.vector_store %arg10[%c0_8, %c0_9], %7 {strides = array<i32>} : memref<8x128xf32, #tpu.memory_space<vmem>>, vector<8x128xf32>,
    %cst_10 = arith.constant 0.000000e+00 : f32
    %9 = vector.broadcast %cst_10 : f32 to vector<8x128xf32>
    %c0_11 = arith.constant 0 : index
    %c0_12 = arith.constant 0 : index
    %10 = vector.load %arg11[%c0_11, %c0_12] : memref<8x128xf32, #tpu.memory_space<vmem>>, vector<8x128xf32>
    tpu.vector_store %arg11[%c0_11, %c0_12], %9 {strides = array<i32>} : memref<8x128xf32, #tpu.memory_space<vmem>>, vector<8x128xf32>,
    %c0_13 = arith.constant 0 : index
    %c0_14 = arith.constant 0 : index
    %11 = vector.load %arg12[%c0_13, %c0_14] : memref<64x512xf32, #tpu.memory_space<vmem>>, vector<8x512xf32>
    %c0_15 = arith.constant 0 : index
    %c0_16 = arith.constant 0 : index
    %12 = vector.load %arg10[%c0_15, %c0_16] : memref<8x128xf32, #tpu.memory_space<vmem>>, vector<8x128xf32>
    %c0_17 = arith.constant 0 : index
    %c0_18 = arith.constant 0 : index
    %c0_19 = arith.constant 0 : index
    %13 = vector.load %arg3[%c0_17, %c0_18, %c0_19] : memref<2x128x512xf32, #tpu.memory_space<vmem>>, vector<1x128x512xf32>
    %14 = vector.shape_cast %13 : vector<1x128x512xf32> to vector<128x512xf32>
    %cst_20 = arith.constant dense<0.000000e+00> : vector<8x512xf32>
    %15 = tpu.matmul %12, %14, %cst_20 {dimension_numbers = #tpu.dot_dimension_numbers<[1], [0], [0], [1], [0, 0, 1, 1], [], []>} : vector<8x128xf32>, vector<128x512xf32>, vector<8x512xf32> -> vector<8x512xf32>
    %16 = arith.addf %11, %15 : vector<8x512xf32>
    %17 = vector.extract_strided_slice %16 {offsets = [0, 0], sizes = [8, 128], strides = [1, 1]} : vector<8x512xf32> to vector<8x128xf32>
    %18 = arith.negf %17 : vector<8x128xf32>
    %19 = math.exp %18 : vector<8x128xf32>
    %cst_21 = arith.constant 1.000000e+00 : f32
    %20 = vector.broadcast %cst_21 : f32 to vector<8x128xf32>
    %21 = arith.addf %20, %19 : vector<8x128xf32>
    %22 = arith.divf %20, %21 : vector<8x128xf32>
    %23 = vector.extract_strided_slice %16 {offsets = [0, 128], sizes = [8, 128], strides = [1, 1]} : vector<8x512xf32> to vector<8x128xf32>
    %24 = arith.negf %23 : vector<8x128xf32>
    %25 = math.exp %24 : vector<8x128xf32>
    %cst_22 = arith.constant 1.000000e+00 : f32
    %26 = vector.broadcast %cst_22 : f32 to vector<8x128xf32>
    %27 = arith.addf %26, %25 : vector<8x128xf32>
    %28 = arith.divf %26, %27 : vector<8x128xf32>
    %29 = vector.extract_strided_slice %16 {offsets = [0, 256], sizes = [8, 128], strides = [1, 1]} : vector<8x512xf32> to vector<8x128xf32>
    %30 = math.tanh %29 : vector<8x128xf32>
    %31 = vector.extract_strided_slice %16 {offsets = [0, 384], sizes = [8, 128], strides = [1, 1]} : vector<8x512xf32> to vector<8x128xf32>
    %32 = arith.negf %31 : vector<8x128xf32>
    %33 = math.exp %32 : vector<8x128xf32>
    %cst_23 = arith.constant 1.000000e+00 : f32
    %34 = vector.broadcast %cst_23 : f32 to vector<8x128xf32>
    %35 = arith.addf %34, %33 : vector<8x128xf32>
    %36 = arith.divf %34, %35 : vector<8x128xf32>
    %c0_24 = arith.constant 0 : index
    %c0_25 = arith.constant 0 : index
    %37 = vector.load %arg11[%c0_24, %c0_25] : memref<8x128xf32, #tpu.memory_space<vmem>>, vector<8x128xf32>
    %38 = arith.mulf %28, %37 : vector<8x128xf32>
    %39 = arith.mulf %22, %30 : vector<8x128xf32>
    %40 = arith.addf %38, %39 : vector<8x128xf32>
    %41 = math.tanh %40 : vector<8x128xf32>
    %42 = arith.mulf %36, %41 : vector<8x128xf32>
    %c0_26 = arith.constant 0 : index
    %c0_27 = arith.constant 0 : index
    %43 = vector.load %arg11[%c0_26, %c0_27] : memref<8x128xf32, #tpu.memory_space<vmem>>, vector<8x128xf32>
    tpu.vector_store %arg11[%c0_26, %c0_27], %40 {strides = array<i32>} : memref<8x128xf32, #tpu.memory_space<vmem>>, vector<8x128xf32>,
    %c0_28 = arith.constant 0 : index
    %c0_29 = arith.constant 0 : index
    %44 = vector.load %arg10[%c0_28, %c0_29] : memref<8x128xf32, #tpu.memory_space<vmem>>, vector<8x128xf32>
    tpu.vector_store %arg10[%c0_28, %c0_29], %42 {strides = array<i32>} : memref<8x128xf32, #tpu.memory_space<vmem>>, vector<8x128xf32>,
    %c0_30 = arith.constant 0 : index
    %c0_31 = arith.constant 0 : index
    %45 = vector.load %arg13[%c0_30, %c0_31] : memref<64x128xf32, #tpu.memory_space<vmem>>, vector<8x128xf32>
    tpu.vector_store %arg13[%c0_30, %c0_31], %42 {strides = array<i32>} : memref<64x128xf32, #tpu.memory_space<vmem>>, vector<8x128xf32>,
    %c8 = arith.constant 8 : index
    %c0_32 = arith.constant 0 : index
    %46 = vector.load %arg12[%c8, %c0_32] : memref<64x512xf32, #tpu.memory_space<vmem>>, vector<8x512xf32>
    %c0_33 = arith.constant 0 : index
    %c0_34 = arith.constant 0 : index
    %47 = vector.load %arg10[%c0_33, %c0_34] : memref<8x128xf32, #tpu.memory_space<vmem>>, vector<8x128xf32>
    %c0_35 = arith.constant 0 : index
    %c0_36 = arith.constant 0 : index
    %c0_37 = arith.constant 0 : index
    %48 = vector.load %arg3[%c0_35, %c0_36, %c0_37] : memref<2x128x512xf32, #tpu.memory_space<vmem>>, vector<1x128x512xf32>
    %49 = vector.shape_cast %48 : vector<1x128x512xf32> to vector<128x512xf32>
    %cst_38 = arith.constant dense<0.000000e+00> : vector<8x512xf32>
    %50 = tpu.matmul %47, %49, %cst_38 {dimension_numbers = #tpu.dot_dimension_numbers<[1], [0], [0], [1], [0, 0, 1, 1], [], []>} : vector<8x128xf32>, vector<128x512xf32>, vector<8x512xf32> -> vector<8x512xf32>
    %51 = arith.addf %46, %50 : vector<8x512xf32>
    %52 = vector.extract_strided_slice %51 {offsets = [0, 0], sizes = [8, 128], strides = [1, 1]} : vector<8x512xf32> to vector<8x128xf32>
    %53 = arith.negf %52 : vector<8x128xf32>
    %54 = math.exp %53 : vector<8x128xf32>
    %cst_39 = arith.constant 1.000000e+00 : f32
    %55 = vector.broadcast %cst_39 : f32 to vector<8x128xf32>
    %56 = arith.addf %55, %54 : vector<8x128xf32>
    %57 = arith.divf %55, %56 : vector<8x128xf32>
    %58 = vector.extract_strided_slice %51 {offsets = [0, 128], sizes = [8, 128], strides = [1, 1]} : vector<8x512xf32> to vector<8x128xf32>
    %59 = arith.negf %58 : vector<8x128xf32>
    %60 = math.exp %59 : vector<8x128xf32>
    %cst_40 = arith.constant 1.000000e+00 : f32
    %61 = vector.broadcast %cst_40 : f32 to vector<8x128xf32>
    %62 = arith.addf %61, %60 : vector<8x128xf32>
    %63 = arith.divf %61, %62 : vector<8x128xf32>
    %64 = vector.extract_strided_slice %51 {offsets = [0, 256], sizes = [8, 128], strides = [1, 1]} : vector<8x512xf32> to vector<8x128xf32>
    %65 = math.tanh %64 : vector<8x128xf32>
    %66 = vector.extract_strided_slice %51 {offsets = [0, 384], sizes = [8, 128], strides = [1, 1]} : vector<8x512xf32> to vector<8x128xf32>
    %67 = arith.negf %66 : vector<8x128xf32>
    %68 = math.exp %67 : vector<8x128xf32>
    %cst_41 = arith.constant 1.000000e+00 : f32
    %69 = vector.broadcast %cst_41 : f32 to vector<8x128xf32>
    %70 = arith.addf %69, %68 : vector<8x128xf32>
    %71 = arith.divf %69, %70 : vector<8x128xf32>
    %c0_42 = arith.constant 0 : index
    %c0_43 = arith.constant 0 : index
    %72 = vector.load %arg11[%c0_42, %c0_43] : memref<8x128xf32, #tpu.memory_space<vmem>>, vector<8x128xf32>
    %73 = arith.mulf %63, %72 : vector<8x128xf32>
    %74 = arith.mulf %57, %65 : vector<8x128xf32>
    %75 = arith.addf %73, %74 : vector<8x128xf32>
    %76 = math.tanh %75 : vector<8x128xf32>
    %77 = arith.mulf %71, %76 : vector<8x128xf32>
    %c0_44 = arith.constant 0 : index
    %c0_45 = arith.constant 0 : index
    %78 = vector.load %arg11[%c0_44, %c0_45] : memref<8x128xf32, #tpu.memory_space<vmem>>, vector<8x128xf32>
    tpu.vector_store %arg11[%c0_44, %c0_45], %75 {strides = array<i32>} : memref<8x128xf32, #tpu.memory_space<vmem>>, vector<8x128xf32>,
    %c0_46 = arith.constant 0 : index
    %c0_47 = arith.constant 0 : index
    %79 = vector.load %arg10[%c0_46, %c0_47] : memref<8x128xf32, #tpu.memory_space<vmem>>, vector<8x128xf32>
    tpu.vector_store %arg10[%c0_46, %c0_47], %77 {strides = array<i32>} : memref<8x128xf32, #tpu.memory_space<vmem>>, vector<8x128xf32>,
    %c8_48 = arith.constant 8 : index
    %c0_49 = arith.constant 0 : index
    %80 = vector.load %arg13[%c8_48, %c0_49] : memref<64x128xf32, #tpu.memory_space<vmem>>, vector<8x128xf32>
    tpu.vector_store %arg13[%c8_48, %c0_49], %77 {strides = array<i32>} : memref<64x128xf32, #tpu.memory_space<vmem>>, vector<8x128xf32>,
    %c16 = arith.constant 16 : index
    %c0_50 = arith.constant 0 : index
    %81 = vector.load %arg12[%c16, %c0_50] : memref<64x512xf32, #tpu.memory_space<vmem>>, vector<8x512xf32>
    %c0_51 = arith.constant 0 : index
    %c0_52 = arith.constant 0 : index
    %82 = vector.load %arg10[%c0_51, %c0_52] : memref<8x128xf32, #tpu.memory_space<vmem>>, vector<8x128xf32>
    %c0_53 = arith.constant 0 : index
    %c0_54 = arith.constant 0 : index
    %c0_55 = arith.constant 0 : index
    %83 = vector.load %arg3[%c0_53, %c0_54, %c0_55] : memref<2x128x512xf32, #tpu.memory_space<vmem>>, vector<1x128x512xf32>
    %84 = vector.shape_cast %83 : vector<1x128x512xf32> to vector<128x512xf32>
    %cst_56 = arith.constant dense<0.000000e+00> : vector<8x512xf32>
    %85 = tpu.matmul %82, %84, %cst_56 {dimension_numbers = #tpu.dot_dimension_numbers<[1], [0], [0], [1], [0, 0, 1, 1], [], []>} : vector<8x128xf32>, vector<128x512xf32>, vector<8x512xf32> -> vector<8x512xf32>
    %86 = arith.addf %81, %85 : vector<8x512xf32>
    %87 = vector.extract_strided_slice %86 {offsets = [0, 0], sizes = [8, 128], strides = [1, 1]} : vector<8x512xf32> to vector<8x128xf32>
    %88 = arith.negf %87 : vector<8x128xf32>
    %89 = math.exp %88 : vector<8x128xf32>
    %cst_57 = arith.constant 1.000000e+00 : f32
    %90 = vector.broadcast %cst_57 : f32 to vector<8x128xf32>
    %91 = arith.addf %90, %89 : vector<8x128xf32>
    %92 = arith.divf %90, %91 : vector<8x128xf32>
    %93 = vector.extract_strided_slice %86 {offsets = [0, 128], sizes = [8, 128], strides = [1, 1]} : vector<8x512xf32> to vector<8x128xf32>
    %94 = arith.negf %93 : vector<8x128xf32>
    %95 = math.exp %94 : vector<8x128xf32>
    %cst_58 = arith.constant 1.000000e+00 : f32
    %96 = vector.broadcast %cst_58 : f32 to vector<8x128xf32>
    %97 = arith.addf %96, %95 : vector<8x128xf32>
    %98 = arith.divf %96, %97 : vector<8x128xf32>
    %99 = vector.extract_strided_slice %86 {offsets = [0, 256], sizes = [8, 128], strides = [1, 1]} : vector<8x512xf32> to vector<8x128xf32>
    %100 = math.tanh %99 : vector<8x128xf32>
    %101 = vector.extract_strided_slice %86 {offsets = [0, 384], sizes = [8, 128], strides = [1, 1]} : vector<8x512xf32> to vector<8x128xf32>
    %102 = arith.negf %101 : vector<8x128xf32>
    %103 = math.exp %102 : vector<8x128xf32>
    %cst_59 = arith.constant 1.000000e+00 : f32
    %104 = vector.broadcast %cst_59 : f32 to vector<8x128xf32>
    %105 = arith.addf %104, %103 : vector<8x128xf32>
    %106 = arith.divf %104, %105 : vector<8x128xf32>
    %c0_60 = arith.constant 0 : index
    %c0_61 = arith.constant 0 : index
    %107 = vector.load %arg11[%c0_60, %c0_61] : memref<8x128xf32, #tpu.memory_space<vmem>>, vector<8x128xf32>
    %108 = arith.mulf %98, %107 : vector<8x128xf32>
    %109 = arith.mulf %92, %100 : vector<8x128xf32>
    %110 = arith.addf %108, %109 : vector<8x128xf32>
    %111 = math.tanh %110 : vector<8x128xf32>
    %112 = arith.mulf %106, %111 : vector<8x128xf32>
    %c0_62 = arith.constant 0 : index
    %c0_63 = arith.constant 0 : index
    %113 = vector.load %arg11[%c0_62, %c0_63] : memref<8x128xf32, #tpu.memory_space<vmem>>, vector<8x128xf32>
    tpu.vector_store %arg11[%c0_62, %c0_63], %110 {strides = array<i32>} : memref<8x128xf32, #tpu.memory_space<vmem>>, vector<8x128xf32>,
    %c0_64 = arith.constant 0 : index
    %c0_65 = arith.constant 0 : index
    %114 = vector.load %arg10[%c0_64, %c0_65] : memref<8x128xf32, #tpu.memory_space<vmem>>, vector<8x128xf32>
    tpu.vector_store %arg10[%c0_64, %c0_65], %112 {strides = array<i32>} : memref<8x128xf32, #tpu.memory_space<vmem>>, vector<8x128xf32>,
    %c16_66 = arith.constant 16 : index
    %c0_67 = arith.constant 0 : index
    %115 = vector.load %arg13[%c16_66, %c0_67] : memref<64x128xf32, #tpu.memory_space<vmem>>, vector<8x128xf32>
    tpu.vector_store %arg13[%c16_66, %c0_67], %112 {strides = array<i32>} : memref<64x128xf32, #tpu.memory_space<vmem>>, vector<8x128xf32>,
    %c24 = arith.constant 24 : index
    %c0_68 = arith.constant 0 : index
    %116 = vector.load %arg12[%c24, %c0_68] : memref<64x512xf32, #tpu.memory_space<vmem>>, vector<8x512xf32>
    %c0_69 = arith.constant 0 : index
    %c0_70 = arith.constant 0 : index
    %117 = vector.load %arg10[%c0_69, %c0_70] : memref<8x128xf32, #tpu.memory_space<vmem>>, vector<8x128xf32>
    %c0_71 = arith.constant 0 : index
    %c0_72 = arith.constant 0 : index
    %c0_73 = arith.constant 0 : index
    %118 = vector.load %arg3[%c0_71, %c0_72, %c0_73] : memref<2x128x512xf32, #tpu.memory_space<vmem>>, vector<1x128x512xf32>
    %119 = vector.shape_cast %118 : vector<1x128x512xf32> to vector<128x512xf32>
    %cst_74 = arith.constant dense<0.000000e+00> : vector<8x512xf32>
    %120 = tpu.matmul %117, %119, %cst_74 {dimension_numbers = #tpu.dot_dimension_numbers<[1], [0], [0], [1], [0, 0, 1, 1], [], []>} : vector<8x128xf32>, vector<128x512xf32>, vector<8x512xf32> -> vector<8x512xf32>
    %121 = arith.addf %116, %120 : vector<8x512xf32>
    %122 = vector.extract_strided_slice %121 {offsets = [0, 0], sizes = [8, 128], strides = [1, 1]} : vector<8x512xf32> to vector<8x128xf32>
    %123 = arith.negf %122 : vector<8x128xf32>
    %124 = math.exp %123 : vector<8x128xf32>
    %cst_75 = arith.constant 1.000000e+00 : f32
    %125 = vector.broadcast %cst_75 : f32 to vector<8x128xf32>
    %126 = arith.addf %125, %124 : vector<8x128xf32>
    %127 = arith.divf %125, %126 : vector<8x128xf32>
    %128 = vector.extract_strided_slice %121 {offsets = [0, 128], sizes = [8, 128], strides = [1, 1]} : vector<8x512xf32> to vector<8x128xf32>
    %129 = arith.negf %128 : vector<8x128xf32>
    %130 = math.exp %129 : vector<8x128xf32>
    %cst_76 = arith.constant 1.000000e+00 : f32
    %131 = vector.broadcast %cst_76 : f32 to vector<8x128xf32>
    %132 = arith.addf %131, %130 : vector<8x128xf32>
    %133 = arith.divf %131, %132 : vector<8x128xf32>
    %134 = vector.extract_strided_slice %121 {offsets = [0, 256], sizes = [8, 128], strides = [1, 1]} : vector<8x512xf32> to vector<8x128xf32>
    %135 = math.tanh %134 : vector<8x128xf32>
    %136 = vector.extract_strided_slice %121 {offsets = [0, 384], sizes = [8, 128], strides = [1, 1]} : vector<8x512xf32> to vector<8x128xf32>
    %137 = arith.negf %136 : vector<8x128xf32>
    %138 = math.exp %137 : vector<8x128xf32>
    %cst_77 = arith.constant 1.000000e+00 : f32
    %139 = vector.broadcast %cst_77 : f32 to vector<8x128xf32>
    %140 = arith.addf %139, %138 : vector<8x128xf32>
    %141 = arith.divf %139, %140 : vector<8x128xf32>
    %c0_78 = arith.constant 0 : index
    %c0_79 = arith.constant 0 : index
    %142 = vector.load %arg11[%c0_78, %c0_79] : memref<8x128xf32, #tpu.memory_space<vmem>>, vector<8x128xf32>
    %143 = arith.mulf %133, %142 : vector<8x128xf32>
    %144 = arith.mulf %127, %135 : vector<8x128xf32>
    %145 = arith.addf %143, %144 : vector<8x128xf32>
    %146 = math.tanh %145 : vector<8x128xf32>
    %147 = arith.mulf %141, %146 : vector<8x128xf32>
    %c0_80 = arith.constant 0 : index
    %c0_81 = arith.constant 0 : index
    %148 = vector.load %arg11[%c0_80, %c0_81] : memref<8x128xf32, #tpu.memory_space<vmem>>, vector<8x128xf32>
    tpu.vector_store %arg11[%c0_80, %c0_81], %145 {strides = array<i32>} : memref<8x128xf32, #tpu.memory_space<vmem>>, vector<8x128xf32>,
    %c0_82 = arith.constant 0 : index
    %c0_83 = arith.constant 0 : index
    %149 = vector.load %arg10[%c0_82, %c0_83] : memref<8x128xf32, #tpu.memory_space<vmem>>, vector<8x128xf32>
    tpu.vector_store %arg10[%c0_82, %c0_83], %147 {strides = array<i32>} : memref<8x128xf32, #tpu.memory_space<vmem>>, vector<8x128xf32>,
    %c24_84 = arith.constant 24 : index
    %c0_85 = arith.constant 0 : index
    %150 = vector.load %arg13[%c24_84, %c0_85] : memref<64x128xf32, #tpu.memory_space<vmem>>, vector<8x128xf32>
    tpu.vector_store %arg13[%c24_84, %c0_85], %147 {strides = array<i32>} : memref<64x128xf32, #tpu.memory_space<vmem>>, vector<8x128xf32>,
    %c32 = arith.constant 32 : index
    %c0_86 = arith.constant 0 : index
    %151 = vector.load %arg12[%c32, %c0_86] : memref<64x512xf32, #tpu.memory_space<vmem>>, vector<8x512xf32>
    %c0_87 = arith.constant 0 : index
    %c0_88 = arith.constant 0 : index
    %152 = vector.load %arg10[%c0_87, %c0_88] : memref<8x128xf32, #tpu.memory_space<vmem>>, vector<8x128xf32>
    %c0_89 = arith.constant 0 : index
    %c0_90 = arith.constant 0 : index
    %c0_91 = arith.constant 0 : index
    %153 = vector.load %arg3[%c0_89, %c0_90, %c0_91] : memref<2x128x512xf32, #tpu.memory_space<vmem>>, vector<1x128x512xf32>
    %154 = vector.shape_cast %153 : vector<1x128x512xf32> to vector<128x512xf32>
    %cst_92 = arith.constant dense<0.000000e+00> : vector<8x512xf32>
    %155 = tpu.matmul %152, %154, %cst_92 {dimension_numbers = #tpu.dot_dimension_numbers<[1], [0], [0], [1], [0, 0, 1, 1], [], []>} : vector<8x128xf32>, vector<128x512xf32>, vector<8x512xf32> -> vector<8x512xf32>
    %156 = arith.addf %151, %155 : vector<8x512xf32>
    %157 = vector.extract_strided_slice %156 {offsets = [0, 0], sizes = [8, 128], strides = [1, 1]} : vector<8x512xf32> to vector<8x128xf32>
    %158 = arith.negf %157 : vector<8x128xf32>
    %159 = math.exp %158 : vector<8x128xf32>
    %cst_93 = arith.constant 1.000000e+00 : f32
    %160 = vector.broadcast %cst_93 : f32 to vector<8x128xf32>
    %161 = arith.addf %160, %159 : vector<8x128xf32>
    %162 = arith.divf %160, %161 : vector<8x128xf32>
    %163 = vector.extract_strided_slice %156 {offsets = [0, 128], sizes = [8, 128], strides = [1, 1]} : vector<8x512xf32> to vector<8x128xf32>
    %164 = arith.negf %163 : vector<8x128xf32>
    %165 = math.exp %164 : vector<8x128xf32>
    %cst_94 = arith.constant 1.000000e+00 : f32
    %166 = vector.broadcast %cst_94 : f32 to vector<8x128xf32>
    %167 = arith.addf %166, %165 : vector<8x128xf32>
    %168 = arith.divf %166, %167 : vector<8x128xf32>
    %169 = vector.extract_strided_slice %156 {offsets = [0, 256], sizes = [8, 128], strides = [1, 1]} : vector<8x512xf32> to vector<8x128xf32>
    %170 = math.tanh %169 : vector<8x128xf32>
    %171 = vector.extract_strided_slice %156 {offsets = [0, 384], sizes = [8, 128], strides = [1, 1]} : vector<8x512xf32> to vector<8x128xf32>
    %172 = arith.negf %171 : vector<8x128xf32>
    %173 = math.exp %172 : vector<8x128xf32>
    %cst_95 = arith.constant 1.000000e+00 : f32
    %174 = vector.broadcast %cst_95 : f32 to vector<8x128xf32>
    %175 = arith.addf %174, %173 : vector<8x128xf32>
    %176 = arith.divf %174, %175 : vector<8x128xf32>
    %c0_96 = arith.constant 0 : index
    %c0_97 = arith.constant 0 : index
    %177 = vector.load %arg11[%c0_96, %c0_97] : memref<8x128xf32, #tpu.memory_space<vmem>>, vector<8x128xf32>
    %178 = arith.mulf %168, %177 : vector<8x128xf32>
    %179 = arith.mulf %162, %170 : vector<8x128xf32>
    %180 = arith.addf %178, %179 : vector<8x128xf32>
    %181 = math.tanh %180 : vector<8x128xf32>
    %182 = arith.mulf %176, %181 : vector<8x128xf32>
    %c0_98 = arith.constant 0 : index
    %c0_99 = arith.constant 0 : index
    %183 = vector.load %arg11[%c0_98, %c0_99] : memref<8x128xf32, #tpu.memory_space<vmem>>, vector<8x128xf32>
    tpu.vector_store %arg11[%c0_98, %c0_99], %180 {strides = array<i32>} : memref<8x128xf32, #tpu.memory_space<vmem>>, vector<8x128xf32>,
    %c0_100 = arith.constant 0 : index
    %c0_101 = arith.constant 0 : index
    %184 = vector.load %arg10[%c0_100, %c0_101] : memref<8x128xf32, #tpu.memory_space<vmem>>, vector<8x128xf32>
    tpu.vector_store %arg10[%c0_100, %c0_101], %182 {strides = array<i32>} : memref<8x128xf32, #tpu.memory_space<vmem>>, vector<8x128xf32>,
    %c32_102 = arith.constant 32 : index
    %c0_103 = arith.constant 0 : index
    %185 = vector.load %arg13[%c32_102, %c0_103] : memref<64x128xf32, #tpu.memory_space<vmem>>, vector<8x128xf32>
    tpu.vector_store %arg13[%c32_102, %c0_103], %182 {strides = array<i32>} : memref<64x128xf32, #tpu.memory_space<vmem>>, vector<8x128xf32>,
    %c40 = arith.constant 40 : index
    %c0_104 = arith.constant 0 : index
    %186 = vector.load %arg12[%c40, %c0_104] : memref<64x512xf32, #tpu.memory_space<vmem>>, vector<8x512xf32>
    %c0_105 = arith.constant 0 : index
    %c0_106 = arith.constant 0 : index
    %187 = vector.load %arg10[%c0_105, %c0_106] : memref<8x128xf32, #tpu.memory_space<vmem>>, vector<8x128xf32>
    %c0_107 = arith.constant 0 : index
    %c0_108 = arith.constant 0 : index
    %c0_109 = arith.constant 0 : index
    %188 = vector.load %arg3[%c0_107, %c0_108, %c0_109] : memref<2x128x512xf32, #tpu.memory_space<vmem>>, vector<1x128x512xf32>
    %189 = vector.shape_cast %188 : vector<1x128x512xf32> to vector<128x512xf32>
    %cst_110 = arith.constant dense<0.000000e+00> : vector<8x512xf32>
    %190 = tpu.matmul %187, %189, %cst_110 {dimension_numbers = #tpu.dot_dimension_numbers<[1], [0], [0], [1], [0, 0, 1, 1], [], []>} : vector<8x128xf32>, vector<128x512xf32>, vector<8x512xf32> -> vector<8x512xf32>
    %191 = arith.addf %186, %190 : vector<8x512xf32>
    %192 = vector.extract_strided_slice %191 {offsets = [0, 0], sizes = [8, 128], strides = [1, 1]} : vector<8x512xf32> to vector<8x128xf32>
    %193 = arith.negf %192 : vector<8x128xf32>
    %194 = math.exp %193 : vector<8x128xf32>
    %cst_111 = arith.constant 1.000000e+00 : f32
    %195 = vector.broadcast %cst_111 : f32 to vector<8x128xf32>
    %196 = arith.addf %195, %194 : vector<8x128xf32>
    %197 = arith.divf %195, %196 : vector<8x128xf32>
    %198 = vector.extract_strided_slice %191 {offsets = [0, 128], sizes = [8, 128], strides = [1, 1]} : vector<8x512xf32> to vector<8x128xf32>
    %199 = arith.negf %198 : vector<8x128xf32>
    %200 = math.exp %199 : vector<8x128xf32>
    %cst_112 = arith.constant 1.000000e+00 : f32
    %201 = vector.broadcast %cst_112 : f32 to vector<8x128xf32>
    %202 = arith.addf %201, %200 : vector<8x128xf32>
    %203 = arith.divf %201, %202 : vector<8x128xf32>
    %204 = vector.extract_strided_slice %191 {offsets = [0, 256], sizes = [8, 128], strides = [1, 1]} : vector<8x512xf32> to vector<8x128xf32>
    %205 = math.tanh %204 : vector<8x128xf32>
    %206 = vector.extract_strided_slice %191 {offsets = [0, 384], sizes = [8, 128], strides = [1, 1]} : vector<8x512xf32> to vector<8x128xf32>
    %207 = arith.negf %206 : vector<8x128xf32>
    %208 = math.exp %207 : vector<8x128xf32>
    %cst_113 = arith.constant 1.000000e+00 : f32
    %209 = vector.broadcast %cst_113 : f32 to vector<8x128xf32>
    %210 = arith.addf %209, %208 : vector<8x128xf32>
    %211 = arith.divf %209, %210 : vector<8x128xf32>
    %c0_114 = arith.constant 0 : index
    %c0_115 = arith.constant 0 : index
    %212 = vector.load %arg11[%c0_114, %c0_115] : memref<8x128xf32, #tpu.memory_space<vmem>>, vector<8x128xf32>
    %213 = arith.mulf %203, %212 : vector<8x128xf32>
    %214 = arith.mulf %197, %205 : vector<8x128xf32>
    %215 = arith.addf %213, %214 : vector<8x128xf32>
    %216 = math.tanh %215 : vector<8x128xf32>
    %217 = arith.mulf %211, %216 : vector<8x128xf32>
    %c0_116 = arith.constant 0 : index
    %c0_117 = arith.constant 0 : index
    %218 = vector.load %arg11[%c0_116, %c0_117] : memref<8x128xf32, #tpu.memory_space<vmem>>, vector<8x128xf32>
    tpu.vector_store %arg11[%c0_116, %c0_117], %215 {strides = array<i32>} : memref<8x128xf32, #tpu.memory_space<vmem>>, vector<8x128xf32>,
    %c0_118 = arith.constant 0 : index
    %c0_119 = arith.constant 0 : index
    %219 = vector.load %arg10[%c0_118, %c0_119] : memref<8x128xf32, #tpu.memory_space<vmem>>, vector<8x128xf32>
    tpu.vector_store %arg10[%c0_118, %c0_119], %217 {strides = array<i32>} : memref<8x128xf32, #tpu.memory_space<vmem>>, vector<8x128xf32>,
    %c40_120 = arith.constant 40 : index
    %c0_121 = arith.constant 0 : index
    %220 = vector.load %arg13[%c40_120, %c0_121] : memref<64x128xf32, #tpu.memory_space<vmem>>, vector<8x128xf32>
    tpu.vector_store %arg13[%c40_120, %c0_121], %217 {strides = array<i32>} : memref<64x128xf32, #tpu.memory_space<vmem>>, vector<8x128xf32>,
    %c48 = arith.constant 48 : index
    %c0_122 = arith.constant 0 : index
    %221 = vector.load %arg12[%c48, %c0_122] : memref<64x512xf32, #tpu.memory_space<vmem>>, vector<8x512xf32>
    %c0_123 = arith.constant 0 : index
    %c0_124 = arith.constant 0 : index
    %222 = vector.load %arg10[%c0_123, %c0_124] : memref<8x128xf32, #tpu.memory_space<vmem>>, vector<8x128xf32>
    %c0_125 = arith.constant 0 : index
    %c0_126 = arith.constant 0 : index
    %c0_127 = arith.constant 0 : index
    %223 = vector.load %arg3[%c0_125, %c0_126, %c0_127] : memref<2x128x512xf32, #tpu.memory_space<vmem>>, vector<1x128x512xf32>
    %224 = vector.shape_cast %223 : vector<1x128x512xf32> to vector<128x512xf32>
    %cst_128 = arith.constant dense<0.000000e+00> : vector<8x512xf32>
    %225 = tpu.matmul %222, %224, %cst_128 {dimension_numbers = #tpu.dot_dimension_numbers<[1], [0], [0], [1], [0, 0, 1, 1], [], []>} : vector<8x128xf32>, vector<128x512xf32>, vector<8x512xf32> -> vector<8x512xf32>
    %226 = arith.addf %221, %225 : vector<8x512xf32>
    %227 = vector.extract_strided_slice %226 {offsets = [0, 0], sizes = [8, 128], strides = [1, 1]} : vector<8x512xf32> to vector<8x128xf32>
    %228 = arith.negf %227 : vector<8x128xf32>
    %229 = math.exp %228 : vector<8x128xf32>
    %cst_129 = arith.constant 1.000000e+00 : f32
    %230 = vector.broadcast %cst_129 : f32 to vector<8x128xf32>
    %231 = arith.addf %230, %229 : vector<8x128xf32>
    %232 = arith.divf %230, %231 : vector<8x128xf32>
    %233 = vector.extract_strided_slice %226 {offsets = [0, 128], sizes = [8, 128], strides = [1, 1]} : vector<8x512xf32> to vector<8x128xf32>
    %234 = arith.negf %233 : vector<8x128xf32>
    %235 = math.exp %234 : vector<8x128xf32>
    %cst_130 = arith.constant 1.000000e+00 : f32
    %236 = vector.broadcast %cst_130 : f32 to vector<8x128xf32>
    %237 = arith.addf %236, %235 : vector<8x128xf32>
    %238 = arith.divf %236, %237 : vector<8x128xf32>
    %239 = vector.extract_strided_slice %226 {offsets = [0, 256], sizes = [8, 128], strides = [1, 1]} : vector<8x512xf32> to vector<8x128xf32>
    %240 = math.tanh %239 : vector<8x128xf32>
    %241 = vector.extract_strided_slice %226 {offsets = [0, 384], sizes = [8, 128], strides = [1, 1]} : vector<8x512xf32> to vector<8x128xf32>
    %242 = arith.negf %241 : vector<8x128xf32>
    %243 = math.exp %242 : vector<8x128xf32>
    %cst_131 = arith.constant 1.000000e+00 : f32
    %244 = vector.broadcast %cst_131 : f32 to vector<8x128xf32>
    %245 = arith.addf %244, %243 : vector<8x128xf32>
    %246 = arith.divf %244, %245 : vector<8x128xf32>
    %c0_132 = arith.constant 0 : index
    %c0_133 = arith.constant 0 : index
    %247 = vector.load %arg11[%c0_132, %c0_133] : memref<8x128xf32, #tpu.memory_space<vmem>>, vector<8x128xf32>
    %248 = arith.mulf %238, %247 : vector<8x128xf32>
    %249 = arith.mulf %232, %240 : vector<8x128xf32>
    %250 = arith.addf %248, %249 : vector<8x128xf32>
    %251 = math.tanh %250 : vector<8x128xf32>
    %252 = arith.mulf %246, %251 : vector<8x128xf32>
    %c0_134 = arith.constant 0 : index
    %c0_135 = arith.constant 0 : index
    %253 = vector.load %arg11[%c0_134, %c0_135] : memref<8x128xf32, #tpu.memory_space<vmem>>, vector<8x128xf32>
    tpu.vector_store %arg11[%c0_134, %c0_135], %250 {strides = array<i32>} : memref<8x128xf32, #tpu.memory_space<vmem>>, vector<8x128xf32>,
    %c0_136 = arith.constant 0 : index
    %c0_137 = arith.constant 0 : index
    %254 = vector.load %arg10[%c0_136, %c0_137] : memref<8x128xf32, #tpu.memory_space<vmem>>, vector<8x128xf32>
    tpu.vector_store %arg10[%c0_136, %c0_137], %252 {strides = array<i32>} : memref<8x128xf32, #tpu.memory_space<vmem>>, vector<8x128xf32>,
    %c48_138 = arith.constant 48 : index
    %c0_139 = arith.constant 0 : index
    %255 = vector.load %arg13[%c48_138, %c0_139] : memref<64x128xf32, #tpu.memory_space<vmem>>, vector<8x128xf32>
    tpu.vector_store %arg13[%c48_138, %c0_139], %252 {strides = array<i32>} : memref<64x128xf32, #tpu.memory_space<vmem>>, vector<8x128xf32>,
    %c56 = arith.constant 56 : index
    %c0_140 = arith.constant 0 : index
    %256 = vector.load %arg12[%c56, %c0_140] : memref<64x512xf32, #tpu.memory_space<vmem>>, vector<8x512xf32>
    %c0_141 = arith.constant 0 : index
    %c0_142 = arith.constant 0 : index
    %257 = vector.load %arg10[%c0_141, %c0_142] : memref<8x128xf32, #tpu.memory_space<vmem>>, vector<8x128xf32>
    %c0_143 = arith.constant 0 : index
    %c0_144 = arith.constant 0 : index
    %c0_145 = arith.constant 0 : index
    %258 = vector.load %arg3[%c0_143, %c0_144, %c0_145] : memref<2x128x512xf32, #tpu.memory_space<vmem>>, vector<1x128x512xf32>
    %259 = vector.shape_cast %258 : vector<1x128x512xf32> to vector<128x512xf32>
    %cst_146 = arith.constant dense<0.000000e+00> : vector<8x512xf32>
    %260 = tpu.matmul %257, %259, %cst_146 {dimension_numbers = #tpu.dot_dimension_numbers<[1], [0], [0], [1], [0, 0, 1, 1], [], []>} : vector<8x128xf32>, vector<128x512xf32>, vector<8x512xf32> -> vector<8x512xf32>
    %261 = arith.addf %256, %260 : vector<8x512xf32>
    %262 = vector.extract_strided_slice %261 {offsets = [0, 0], sizes = [8, 128], strides = [1, 1]} : vector<8x512xf32> to vector<8x128xf32>
    %263 = arith.negf %262 : vector<8x128xf32>
    %264 = math.exp %263 : vector<8x128xf32>
    %cst_147 = arith.constant 1.000000e+00 : f32
    %265 = vector.broadcast %cst_147 : f32 to vector<8x128xf32>
    %266 = arith.addf %265, %264 : vector<8x128xf32>
    %267 = arith.divf %265, %266 : vector<8x128xf32>
    %268 = vector.extract_strided_slice %261 {offsets = [0, 128], sizes = [8, 128], strides = [1, 1]} : vector<8x512xf32> to vector<8x128xf32>
    %269 = arith.negf %268 : vector<8x128xf32>
    %270 = math.exp %269 : vector<8x128xf32>
    %cst_148 = arith.constant 1.000000e+00 : f32
    %271 = vector.broadcast %cst_148 : f32 to vector<8x128xf32>
    %272 = arith.addf %271, %270 : vector<8x128xf32>
    %273 = arith.divf %271, %272 : vector<8x128xf32>
    %274 = vector.extract_strided_slice %261 {offsets = [0, 256], sizes = [8, 128], strides = [1, 1]} : vector<8x512xf32> to vector<8x128xf32>
    %275 = math.tanh %274 : vector<8x128xf32>
    %276 = vector.extract_strided_slice %261 {offsets = [0, 384], sizes = [8, 128], strides = [1, 1]} : vector<8x512xf32> to vector<8x128xf32>
    %277 = arith.negf %276 : vector<8x128xf32>
    %278 = math.exp %277 : vector<8x128xf32>
    %cst_149 = arith.constant 1.000000e+00 : f32
    %279 = vector.broadcast %cst_149 : f32 to vector<8x128xf32>
    %280 = arith.addf %279, %278 : vector<8x128xf32>
    %281 = arith.divf %279, %280 : vector<8x128xf32>
    %c0_150 = arith.constant 0 : index
    %c0_151 = arith.constant 0 : index
    %282 = vector.load %arg11[%c0_150, %c0_151] : memref<8x128xf32, #tpu.memory_space<vmem>>, vector<8x128xf32>
    %283 = arith.mulf %273, %282 : vector<8x128xf32>
    %284 = arith.mulf %267, %275 : vector<8x128xf32>
    %285 = arith.addf %283, %284 : vector<8x128xf32>
    %286 = math.tanh %285 : vector<8x128xf32>
    %287 = arith.mulf %281, %286 : vector<8x128xf32>
    %c0_152 = arith.constant 0 : index
    %c0_153 = arith.constant 0 : index
    %288 = vector.load %arg11[%c0_152, %c0_153] : memref<8x128xf32, #tpu.memory_space<vmem>>, vector<8x128xf32>
    tpu.vector_store %arg11[%c0_152, %c0_153], %285 {strides = array<i32>} : memref<8x128xf32, #tpu.memory_space<vmem>>, vector<8x128xf32>,
    %c0_154 = arith.constant 0 : index
    %c0_155 = arith.constant 0 : index
    %289 = vector.load %arg10[%c0_154, %c0_155] : memref<8x128xf32, #tpu.memory_space<vmem>>, vector<8x128xf32>
    tpu.vector_store %arg10[%c0_154, %c0_155], %287 {strides = array<i32>} : memref<8x128xf32, #tpu.memory_space<vmem>>, vector<8x128xf32>,
    %c56_156 = arith.constant 56 : index
    %c0_157 = arith.constant 0 : index
    %290 = vector.load %arg13[%c56_156, %c0_157] : memref<64x128xf32, #tpu.memory_space<vmem>>, vector<8x128xf32>
    tpu.vector_store %arg13[%c56_156, %c0_157], %287 {strides = array<i32>} : memref<64x128xf32, #tpu.memory_space<vmem>>, vector<8x128xf32>,
    %c0_158 = arith.constant 0 : index
    %c0_159 = arith.constant 0 : index
    %291 = vector.load %arg13[%c0_158, %c0_159] : memref<64x128xf32, #tpu.memory_space<vmem>>, vector<64x128xf32>
    %c0_160 = arith.constant 0 : index
    %c0_161 = arith.constant 0 : index
    %c0_162 = arith.constant 0 : index
    %292 = vector.load %arg4[%c0_160, %c0_161, %c0_162] : memref<1x128x512xf32, #tpu.memory_space<vmem>>, vector<1x128x512xf32>
    %293 = vector.shape_cast %292 : vector<1x128x512xf32> to vector<128x512xf32>
    %cst_163 = arith.constant dense<0.000000e+00> : vector<64x512xf32>
    %294 = tpu.matmul %291, %293, %cst_163 {dimension_numbers = #tpu.dot_dimension_numbers<[1], [0], [0], [1], [0, 0, 1, 1], [], []>} : vector<64x128xf32>, vector<128x512xf32>, vector<64x512xf32> -> vector<64x512xf32>
    %c0_164 = arith.constant 0 : index
    %c0_165 = arith.constant 0 : index
    %c0_166 = arith.constant 0 : index
    %295 = vector.load %arg5[%c0_164, %c0_165, %c0_166] : memref<1x1x512xf32, #tpu.memory_space<vmem>>, vector<1x1x512xf32>
    %296 = vector.shape_cast %295 : vector<1x1x512xf32> to vector<1x512xf32>
    %297 = vector.broadcast %296 : vector<1x512xf32> to vector<64x512xf32>
    %298 = arith.addf %294, %297 : vector<64x512xf32>
    %c0_167 = arith.constant 0 : index
    %c0_168 = arith.constant 0 : index
    %299 = vector.load %arg12[%c0_167, %c0_168] : memref<64x512xf32, #tpu.memory_space<vmem>>, vector<64x512xf32>
    tpu.vector_store %arg12[%c0_167, %c0_168], %298 {strides = array<i32>} : memref<64x512xf32, #tpu.memory_space<vmem>>, vector<64x512xf32>,
    %cst_169 = arith.constant 0.000000e+00 : f32
    %300 = vector.broadcast %cst_169 : f32 to vector<8x128xf32>
    %c0_170 = arith.constant 0 : index
    %c0_171 = arith.constant 0 : index
    %301 = vector.load %arg10[%c0_170, %c0_171] : memref<8x128xf32, #tpu.memory_space<vmem>>, vector<8x128xf32>
    tpu.vector_store %arg10[%c0_170, %c0_171], %300 {strides = array<i32>} : memref<8x128xf32, #tpu.memory_space<vmem>>, vector<8x128xf32>,
    %cst_172 = arith.constant 0.000000e+00 : f32
    %302 = vector.broadcast %cst_172 : f32 to vector<8x128xf32>
    %c0_173 = arith.constant 0 : index
    %c0_174 = arith.constant 0 : index
    %303 = vector.load %arg11[%c0_173, %c0_174] : memref<8x128xf32, #tpu.memory_space<vmem>>, vector<8x128xf32>
    tpu.vector_store %arg11[%c0_173, %c0_174], %302 {strides = array<i32>} : memref<8x128xf32, #tpu.memory_space<vmem>>, vector<8x128xf32>,
    %c0_175 = arith.constant 0 : index
    %c0_176 = arith.constant 0 : index
    %304 = vector.load %arg12[%c0_175, %c0_176] : memref<64x512xf32, #tpu.memory_space<vmem>>, vector<8x512xf32>
    %c0_177 = arith.constant 0 : index
    %c0_178 = arith.constant 0 : index
    %305 = vector.load %arg10[%c0_177, %c0_178] : memref<8x128xf32, #tpu.memory_space<vmem>>, vector<8x128xf32>
    %c1 = arith.constant 1 : index
    %c0_179 = arith.constant 0 : index
    %c0_180 = arith.constant 0 : index
    %306 = vector.load %arg3[%c1, %c0_179, %c0_180] : memref<2x128x512xf32, #tpu.memory_space<vmem>>, vector<1x128x512xf32>
    %307 = vector.shape_cast %306 : vector<1x128x512xf32> to vector<128x512xf32>
    %cst_181 = arith.constant dense<0.000000e+00> : vector<8x512xf32>
    %308 = tpu.matmul %305, %307, %cst_181 {dimension_numbers = #tpu.dot_dimension_numbers<[1], [0], [0], [1], [0, 0, 1, 1], [], []>} : vector<8x128xf32>, vector<128x512xf32>, vector<8x512xf32> -> vector<8x512xf32>
    %309 = arith.addf %304, %308 : vector<8x512xf32>
    %310 = vector.extract_strided_slice %309 {offsets = [0, 0], sizes = [8, 128], strides = [1, 1]} : vector<8x512xf32> to vector<8x128xf32>
    %311 = arith.negf %310 : vector<8x128xf32>
    %312 = math.exp %311 : vector<8x128xf32>
    %cst_182 = arith.constant 1.000000e+00 : f32
    %313 = vector.broadcast %cst_182 : f32 to vector<8x128xf32>
    %314 = arith.addf %313, %312 : vector<8x128xf32>
    %315 = arith.divf %313, %314 : vector<8x128xf32>
    %316 = vector.extract_strided_slice %309 {offsets = [0, 128], sizes = [8, 128], strides = [1, 1]} : vector<8x512xf32> to vector<8x128xf32>
    %317 = arith.negf %316 : vector<8x128xf32>
    %318 = math.exp %317 : vector<8x128xf32>
    %cst_183 = arith.constant 1.000000e+00 : f32
    %319 = vector.broadcast %cst_183 : f32 to vector<8x128xf32>
    %320 = arith.addf %319, %318 : vector<8x128xf32>
    %321 = arith.divf %319, %320 : vector<8x128xf32>
    %322 = vector.extract_strided_slice %309 {offsets = [0, 256], sizes = [8, 128], strides = [1, 1]} : vector<8x512xf32> to vector<8x128xf32>
    %323 = math.tanh %322 : vector<8x128xf32>
    %324 = vector.extract_strided_slice %309 {offsets = [0, 384], sizes = [8, 128], strides = [1, 1]} : vector<8x512xf32> to vector<8x128xf32>
    %325 = arith.negf %324 : vector<8x128xf32>
    %326 = math.exp %325 : vector<8x128xf32>
    %cst_184 = arith.constant 1.000000e+00 : f32
    %327 = vector.broadcast %cst_184 : f32 to vector<8x128xf32>
    %328 = arith.addf %327, %326 : vector<8x128xf32>
    %329 = arith.divf %327, %328 : vector<8x128xf32>
    %c0_185 = arith.constant 0 : index
    %c0_186 = arith.constant 0 : index
    %330 = vector.load %arg11[%c0_185, %c0_186] : memref<8x128xf32, #tpu.memory_space<vmem>>, vector<8x128xf32>
    %331 = arith.mulf %321, %330 : vector<8x128xf32>
    %332 = arith.mulf %315, %323 : vector<8x128xf32>
    %333 = arith.addf %331, %332 : vector<8x128xf32>
    %334 = math.tanh %333 : vector<8x128xf32>
    %335 = arith.mulf %329, %334 : vector<8x128xf32>
    %c0_187 = arith.constant 0 : index
    %c0_188 = arith.constant 0 : index
    %336 = vector.load %arg11[%c0_187, %c0_188] : memref<8x128xf32, #tpu.memory_space<vmem>>, vector<8x128xf32>
    tpu.vector_store %arg11[%c0_187, %c0_188], %333 {strides = array<i32>} : memref<8x128xf32, #tpu.memory_space<vmem>>, vector<8x128xf32>,
    %c0_189 = arith.constant 0 : index
    %c0_190 = arith.constant 0 : index
    %337 = vector.load %arg10[%c0_189, %c0_190] : memref<8x128xf32, #tpu.memory_space<vmem>>, vector<8x128xf32>
    tpu.vector_store %arg10[%c0_189, %c0_190], %335 {strides = array<i32>} : memref<8x128xf32, #tpu.memory_space<vmem>>, vector<8x128xf32>,
    %c0_191 = arith.constant 0 : index
    %c0_192 = arith.constant 0 : index
    %338 = vector.load %arg8[%c0_191, %c0_192] : memref<64x128xf32, #tpu.memory_space<vmem>>, vector<8x128xf32>
    tpu.vector_store %arg8[%c0_191, %c0_192], %335 {strides = array<i32>} : memref<64x128xf32, #tpu.memory_space<vmem>>, vector<8x128xf32>,
    %c8_193 = arith.constant 8 : index
    %c0_194 = arith.constant 0 : index
    %339 = vector.load %arg12[%c8_193, %c0_194] : memref<64x512xf32, #tpu.memory_space<vmem>>, vector<8x512xf32>
    %c0_195 = arith.constant 0 : index
    %c0_196 = arith.constant 0 : index
    %340 = vector.load %arg10[%c0_195, %c0_196] : memref<8x128xf32, #tpu.memory_space<vmem>>, vector<8x128xf32>
    %c1_197 = arith.constant 1 : index
    %c0_198 = arith.constant 0 : index
    %c0_199 = arith.constant 0 : index
    %341 = vector.load %arg3[%c1_197, %c0_198, %c0_199] : memref<2x128x512xf32, #tpu.memory_space<vmem>>, vector<1x128x512xf32>
    %342 = vector.shape_cast %341 : vector<1x128x512xf32> to vector<128x512xf32>
    %cst_200 = arith.constant dense<0.000000e+00> : vector<8x512xf32>
    %343 = tpu.matmul %340, %342, %cst_200 {dimension_numbers = #tpu.dot_dimension_numbers<[1], [0], [0], [1], [0, 0, 1, 1], [], []>} : vector<8x128xf32>, vector<128x512xf32>, vector<8x512xf32> -> vector<8x512xf32>
    %344 = arith.addf %339, %343 : vector<8x512xf32>
    %345 = vector.extract_strided_slice %344 {offsets = [0, 0], sizes = [8, 128], strides = [1, 1]} : vector<8x512xf32> to vector<8x128xf32>
    %346 = arith.negf %345 : vector<8x128xf32>
    %347 = math.exp %346 : vector<8x128xf32>
    %cst_201 = arith.constant 1.000000e+00 : f32
    %348 = vector.broadcast %cst_201 : f32 to vector<8x128xf32>
    %349 = arith.addf %348, %347 : vector<8x128xf32>
    %350 = arith.divf %348, %349 : vector<8x128xf32>
    %351 = vector.extract_strided_slice %344 {offsets = [0, 128], sizes = [8, 128], strides = [1, 1]} : vector<8x512xf32> to vector<8x128xf32>
    %352 = arith.negf %351 : vector<8x128xf32>
    %353 = math.exp %352 : vector<8x128xf32>
    %cst_202 = arith.constant 1.000000e+00 : f32
    %354 = vector.broadcast %cst_202 : f32 to vector<8x128xf32>
    %355 = arith.addf %354, %353 : vector<8x128xf32>
    %356 = arith.divf %354, %355 : vector<8x128xf32>
    %357 = vector.extract_strided_slice %344 {offsets = [0, 256], sizes = [8, 128], strides = [1, 1]} : vector<8x512xf32> to vector<8x128xf32>
    %358 = math.tanh %357 : vector<8x128xf32>
    %359 = vector.extract_strided_slice %344 {offsets = [0, 384], sizes = [8, 128], strides = [1, 1]} : vector<8x512xf32> to vector<8x128xf32>
    %360 = arith.negf %359 : vector<8x128xf32>
    %361 = math.exp %360 : vector<8x128xf32>
    %cst_203 = arith.constant 1.000000e+00 : f32
    %362 = vector.broadcast %cst_203 : f32 to vector<8x128xf32>
    %363 = arith.addf %362, %361 : vector<8x128xf32>
    %364 = arith.divf %362, %363 : vector<8x128xf32>
    %c0_204 = arith.constant 0 : index
    %c0_205 = arith.constant 0 : index
    %365 = vector.load %arg11[%c0_204, %c0_205] : memref<8x128xf32, #tpu.memory_space<vmem>>, vector<8x128xf32>
    %366 = arith.mulf %356, %365 : vector<8x128xf32>
    %367 = arith.mulf %350, %358 : vector<8x128xf32>
    %368 = arith.addf %366, %367 : vector<8x128xf32>
    %369 = math.tanh %368 : vector<8x128xf32>
    %370 = arith.mulf %364, %369 : vector<8x128xf32>
    %c0_206 = arith.constant 0 : index
    %c0_207 = arith.constant 0 : index
    %371 = vector.load %arg11[%c0_206, %c0_207] : memref<8x128xf32, #tpu.memory_space<vmem>>, vector<8x128xf32>
    tpu.vector_store %arg11[%c0_206, %c0_207], %368 {strides = array<i32>} : memref<8x128xf32, #tpu.memory_space<vmem>>, vector<8x128xf32>,
    %c0_208 = arith.constant 0 : index
    %c0_209 = arith.constant 0 : index
    %372 = vector.load %arg10[%c0_208, %c0_209] : memref<8x128xf32, #tpu.memory_space<vmem>>, vector<8x128xf32>
    tpu.vector_store %arg10[%c0_208, %c0_209], %370 {strides = array<i32>} : memref<8x128xf32, #tpu.memory_space<vmem>>, vector<8x128xf32>,
    %c8_210 = arith.constant 8 : index
    %c0_211 = arith.constant 0 : index
    %373 = vector.load %arg8[%c8_210, %c0_211] : memref<64x128xf32, #tpu.memory_space<vmem>>, vector<8x128xf32>
    tpu.vector_store %arg8[%c8_210, %c0_211], %370 {strides = array<i32>} : memref<64x128xf32, #tpu.memory_space<vmem>>, vector<8x128xf32>,
    %c16_212 = arith.constant 16 : index
    %c0_213 = arith.constant 0 : index
    %374 = vector.load %arg12[%c16_212, %c0_213] : memref<64x512xf32, #tpu.memory_space<vmem>>, vector<8x512xf32>
    %c0_214 = arith.constant 0 : index
    %c0_215 = arith.constant 0 : index
    %375 = vector.load %arg10[%c0_214, %c0_215] : memref<8x128xf32, #tpu.memory_space<vmem>>, vector<8x128xf32>
    %c1_216 = arith.constant 1 : index
    %c0_217 = arith.constant 0 : index
    %c0_218 = arith.constant 0 : index
    %376 = vector.load %arg3[%c1_216, %c0_217, %c0_218] : memref<2x128x512xf32, #tpu.memory_space<vmem>>, vector<1x128x512xf32>
    %377 = vector.shape_cast %376 : vector<1x128x512xf32> to vector<128x512xf32>
    %cst_219 = arith.constant dense<0.000000e+00> : vector<8x512xf32>
    %378 = tpu.matmul %375, %377, %cst_219 {dimension_numbers = #tpu.dot_dimension_numbers<[1], [0], [0], [1], [0, 0, 1, 1], [], []>} : vector<8x128xf32>, vector<128x512xf32>, vector<8x512xf32> -> vector<8x512xf32>
    %379 = arith.addf %374, %378 : vector<8x512xf32>
    %380 = vector.extract_strided_slice %379 {offsets = [0, 0], sizes = [8, 128], strides = [1, 1]} : vector<8x512xf32> to vector<8x128xf32>
    %381 = arith.negf %380 : vector<8x128xf32>
    %382 = math.exp %381 : vector<8x128xf32>
    %cst_220 = arith.constant 1.000000e+00 : f32
    %383 = vector.broadcast %cst_220 : f32 to vector<8x128xf32>
    %384 = arith.addf %383, %382 : vector<8x128xf32>
    %385 = arith.divf %383, %384 : vector<8x128xf32>
    %386 = vector.extract_strided_slice %379 {offsets = [0, 128], sizes = [8, 128], strides = [1, 1]} : vector<8x512xf32> to vector<8x128xf32>
    %387 = arith.negf %386 : vector<8x128xf32>
    %388 = math.exp %387 : vector<8x128xf32>
    %cst_221 = arith.constant 1.000000e+00 : f32
    %389 = vector.broadcast %cst_221 : f32 to vector<8x128xf32>
    %390 = arith.addf %389, %388 : vector<8x128xf32>
    %391 = arith.divf %389, %390 : vector<8x128xf32>
    %392 = vector.extract_strided_slice %379 {offsets = [0, 256], sizes = [8, 128], strides = [1, 1]} : vector<8x512xf32> to vector<8x128xf32>
    %393 = math.tanh %392 : vector<8x128xf32>
    %394 = vector.extract_strided_slice %379 {offsets = [0, 384], sizes = [8, 128], strides = [1, 1]} : vector<8x512xf32> to vector<8x128xf32>
    %395 = arith.negf %394 : vector<8x128xf32>
    %396 = math.exp %395 : vector<8x128xf32>
    %cst_222 = arith.constant 1.000000e+00 : f32
    %397 = vector.broadcast %cst_222 : f32 to vector<8x128xf32>
    %398 = arith.addf %397, %396 : vector<8x128xf32>
    %399 = arith.divf %397, %398 : vector<8x128xf32>
    %c0_223 = arith.constant 0 : index
    %c0_224 = arith.constant 0 : index
    %400 = vector.load %arg11[%c0_223, %c0_224] : memref<8x128xf32, #tpu.memory_space<vmem>>, vector<8x128xf32>
    %401 = arith.mulf %391, %400 : vector<8x128xf32>
    %402 = arith.mulf %385, %393 : vector<8x128xf32>
    %403 = arith.addf %401, %402 : vector<8x128xf32>
    %404 = math.tanh %403 : vector<8x128xf32>
    %405 = arith.mulf %399, %404 : vector<8x128xf32>
    %c0_225 = arith.constant 0 : index
    %c0_226 = arith.constant 0 : index
    %406 = vector.load %arg11[%c0_225, %c0_226] : memref<8x128xf32, #tpu.memory_space<vmem>>, vector<8x128xf32>
    tpu.vector_store %arg11[%c0_225, %c0_226], %403 {strides = array<i32>} : memref<8x128xf32, #tpu.memory_space<vmem>>, vector<8x128xf32>,
    %c0_227 = arith.constant 0 : index
    %c0_228 = arith.constant 0 : index
    %407 = vector.load %arg10[%c0_227, %c0_228] : memref<8x128xf32, #tpu.memory_space<vmem>>, vector<8x128xf32>
    tpu.vector_store %arg10[%c0_227, %c0_228], %405 {strides = array<i32>} : memref<8x128xf32, #tpu.memory_space<vmem>>, vector<8x128xf32>,
    %c16_229 = arith.constant 16 : index
    %c0_230 = arith.constant 0 : index
    %408 = vector.load %arg8[%c16_229, %c0_230] : memref<64x128xf32, #tpu.memory_space<vmem>>, vector<8x128xf32>
    tpu.vector_store %arg8[%c16_229, %c0_230], %405 {strides = array<i32>} : memref<64x128xf32, #tpu.memory_space<vmem>>, vector<8x128xf32>,
    %c24_231 = arith.constant 24 : index
    %c0_232 = arith.constant 0 : index
    %409 = vector.load %arg12[%c24_231, %c0_232] : memref<64x512xf32, #tpu.memory_space<vmem>>, vector<8x512xf32>
    %c0_233 = arith.constant 0 : index
    %c0_234 = arith.constant 0 : index
    %410 = vector.load %arg10[%c0_233, %c0_234] : memref<8x128xf32, #tpu.memory_space<vmem>>, vector<8x128xf32>
    %c1_235 = arith.constant 1 : index
    %c0_236 = arith.constant 0 : index
    %c0_237 = arith.constant 0 : index
    %411 = vector.load %arg3[%c1_235, %c0_236, %c0_237] : memref<2x128x512xf32, #tpu.memory_space<vmem>>, vector<1x128x512xf32>
    %412 = vector.shape_cast %411 : vector<1x128x512xf32> to vector<128x512xf32>
    %cst_238 = arith.constant dense<0.000000e+00> : vector<8x512xf32>
    %413 = tpu.matmul %410, %412, %cst_238 {dimension_numbers = #tpu.dot_dimension_numbers<[1], [0], [0], [1], [0, 0, 1, 1], [], []>} : vector<8x128xf32>, vector<128x512xf32>, vector<8x512xf32> -> vector<8x512xf32>
    %414 = arith.addf %409, %413 : vector<8x512xf32>
    %415 = vector.extract_strided_slice %414 {offsets = [0, 0], sizes = [8, 128], strides = [1, 1]} : vector<8x512xf32> to vector<8x128xf32>
    %416 = arith.negf %415 : vector<8x128xf32>
    %417 = math.exp %416 : vector<8x128xf32>
    %cst_239 = arith.constant 1.000000e+00 : f32
    %418 = vector.broadcast %cst_239 : f32 to vector<8x128xf32>
    %419 = arith.addf %418, %417 : vector<8x128xf32>
    %420 = arith.divf %418, %419 : vector<8x128xf32>
    %421 = vector.extract_strided_slice %414 {offsets = [0, 128], sizes = [8, 128], strides = [1, 1]} : vector<8x512xf32> to vector<8x128xf32>
    %422 = arith.negf %421 : vector<8x128xf32>
    %423 = math.exp %422 : vector<8x128xf32>
    %cst_240 = arith.constant 1.000000e+00 : f32
    %424 = vector.broadcast %cst_240 : f32 to vector<8x128xf32>
    %425 = arith.addf %424, %423 : vector<8x128xf32>
    %426 = arith.divf %424, %425 : vector<8x128xf32>
    %427 = vector.extract_strided_slice %414 {offsets = [0, 256], sizes = [8, 128], strides = [1, 1]} : vector<8x512xf32> to vector<8x128xf32>
    %428 = math.tanh %427 : vector<8x128xf32>
    %429 = vector.extract_strided_slice %414 {offsets = [0, 384], sizes = [8, 128], strides = [1, 1]} : vector<8x512xf32> to vector<8x128xf32>
    %430 = arith.negf %429 : vector<8x128xf32>
    %431 = math.exp %430 : vector<8x128xf32>
    %cst_241 = arith.constant 1.000000e+00 : f32
    %432 = vector.broadcast %cst_241 : f32 to vector<8x128xf32>
    %433 = arith.addf %432, %431 : vector<8x128xf32>
    %434 = arith.divf %432, %433 : vector<8x128xf32>
    %c0_242 = arith.constant 0 : index
    %c0_243 = arith.constant 0 : index
    %435 = vector.load %arg11[%c0_242, %c0_243] : memref<8x128xf32, #tpu.memory_space<vmem>>, vector<8x128xf32>
    %436 = arith.mulf %426, %435 : vector<8x128xf32>
    %437 = arith.mulf %420, %428 : vector<8x128xf32>
    %438 = arith.addf %436, %437 : vector<8x128xf32>
    %439 = math.tanh %438 : vector<8x128xf32>
    %440 = arith.mulf %434, %439 : vector<8x128xf32>
    %c0_244 = arith.constant 0 : index
    %c0_245 = arith.constant 0 : index
    %441 = vector.load %arg11[%c0_244, %c0_245] : memref<8x128xf32, #tpu.memory_space<vmem>>, vector<8x128xf32>
    tpu.vector_store %arg11[%c0_244, %c0_245], %438 {strides = array<i32>} : memref<8x128xf32, #tpu.memory_space<vmem>>, vector<8x128xf32>,
    %c0_246 = arith.constant 0 : index
    %c0_247 = arith.constant 0 : index
    %442 = vector.load %arg10[%c0_246, %c0_247] : memref<8x128xf32, #tpu.memory_space<vmem>>, vector<8x128xf32>
    tpu.vector_store %arg10[%c0_246, %c0_247], %440 {strides = array<i32>} : memref<8x128xf32, #tpu.memory_space<vmem>>, vector<8x128xf32>,
    %c24_248 = arith.constant 24 : index
    %c0_249 = arith.constant 0 : index
    %443 = vector.load %arg8[%c24_248, %c0_249] : memref<64x128xf32, #tpu.memory_space<vmem>>, vector<8x128xf32>
    tpu.vector_store %arg8[%c24_248, %c0_249], %440 {strides = array<i32>} : memref<64x128xf32, #tpu.memory_space<vmem>>, vector<8x128xf32>,
    %c32_250 = arith.constant 32 : index
    %c0_251 = arith.constant 0 : index
    %444 = vector.load %arg12[%c32_250, %c0_251] : memref<64x512xf32, #tpu.memory_space<vmem>>, vector<8x512xf32>
    %c0_252 = arith.constant 0 : index
    %c0_253 = arith.constant 0 : index
    %445 = vector.load %arg10[%c0_252, %c0_253] : memref<8x128xf32, #tpu.memory_space<vmem>>, vector<8x128xf32>
    %c1_254 = arith.constant 1 : index
    %c0_255 = arith.constant 0 : index
    %c0_256 = arith.constant 0 : index
    %446 = vector.load %arg3[%c1_254, %c0_255, %c0_256] : memref<2x128x512xf32, #tpu.memory_space<vmem>>, vector<1x128x512xf32>
    %447 = vector.shape_cast %446 : vector<1x128x512xf32> to vector<128x512xf32>
    %cst_257 = arith.constant dense<0.000000e+00> : vector<8x512xf32>
    %448 = tpu.matmul %445, %447, %cst_257 {dimension_numbers = #tpu.dot_dimension_numbers<[1], [0], [0], [1], [0, 0, 1, 1], [], []>} : vector<8x128xf32>, vector<128x512xf32>, vector<8x512xf32> -> vector<8x512xf32>
    %449 = arith.addf %444, %448 : vector<8x512xf32>
    %450 = vector.extract_strided_slice %449 {offsets = [0, 0], sizes = [8, 128], strides = [1, 1]} : vector<8x512xf32> to vector<8x128xf32>
    %451 = arith.negf %450 : vector<8x128xf32>
    %452 = math.exp %451 : vector<8x128xf32>
    %cst_258 = arith.constant 1.000000e+00 : f32
    %453 = vector.broadcast %cst_258 : f32 to vector<8x128xf32>
    %454 = arith.addf %453, %452 : vector<8x128xf32>
    %455 = arith.divf %453, %454 : vector<8x128xf32>
    %456 = vector.extract_strided_slice %449 {offsets = [0, 128], sizes = [8, 128], strides = [1, 1]} : vector<8x512xf32> to vector<8x128xf32>
    %457 = arith.negf %456 : vector<8x128xf32>
    %458 = math.exp %457 : vector<8x128xf32>
    %cst_259 = arith.constant 1.000000e+00 : f32
    %459 = vector.broadcast %cst_259 : f32 to vector<8x128xf32>
    %460 = arith.addf %459, %458 : vector<8x128xf32>
    %461 = arith.divf %459, %460 : vector<8x128xf32>
    %462 = vector.extract_strided_slice %449 {offsets = [0, 256], sizes = [8, 128], strides = [1, 1]} : vector<8x512xf32> to vector<8x128xf32>
    %463 = math.tanh %462 : vector<8x128xf32>
    %464 = vector.extract_strided_slice %449 {offsets = [0, 384], sizes = [8, 128], strides = [1, 1]} : vector<8x512xf32> to vector<8x128xf32>
    %465 = arith.negf %464 : vector<8x128xf32>
    %466 = math.exp %465 : vector<8x128xf32>
    %cst_260 = arith.constant 1.000000e+00 : f32
    %467 = vector.broadcast %cst_260 : f32 to vector<8x128xf32>
    %468 = arith.addf %467, %466 : vector<8x128xf32>
    %469 = arith.divf %467, %468 : vector<8x128xf32>
    %c0_261 = arith.constant 0 : index
    %c0_262 = arith.constant 0 : index
    %470 = vector.load %arg11[%c0_261, %c0_262] : memref<8x128xf32, #tpu.memory_space<vmem>>, vector<8x128xf32>
    %471 = arith.mulf %461, %470 : vector<8x128xf32>
    %472 = arith.mulf %455, %463 : vector<8x128xf32>
    %473 = arith.addf %471, %472 : vector<8x128xf32>
    %474 = math.tanh %473 : vector<8x128xf32>
    %475 = arith.mulf %469, %474 : vector<8x128xf32>
    %c0_263 = arith.constant 0 : index
    %c0_264 = arith.constant 0 : index
    %476 = vector.load %arg11[%c0_263, %c0_264] : memref<8x128xf32, #tpu.memory_space<vmem>>, vector<8x128xf32>
    tpu.vector_store %arg11[%c0_263, %c0_264], %473 {strides = array<i32>} : memref<8x128xf32, #tpu.memory_space<vmem>>, vector<8x128xf32>,
    %c0_265 = arith.constant 0 : index
    %c0_266 = arith.constant 0 : index
    %477 = vector.load %arg10[%c0_265, %c0_266] : memref<8x128xf32, #tpu.memory_space<vmem>>, vector<8x128xf32>
    tpu.vector_store %arg10[%c0_265, %c0_266], %475 {strides = array<i32>} : memref<8x128xf32, #tpu.memory_space<vmem>>, vector<8x128xf32>,
    %c32_267 = arith.constant 32 : index
    %c0_268 = arith.constant 0 : index
    %478 = vector.load %arg8[%c32_267, %c0_268] : memref<64x128xf32, #tpu.memory_space<vmem>>, vector<8x128xf32>
    tpu.vector_store %arg8[%c32_267, %c0_268], %475 {strides = array<i32>} : memref<64x128xf32, #tpu.memory_space<vmem>>, vector<8x128xf32>,
    %c40_269 = arith.constant 40 : index
    %c0_270 = arith.constant 0 : index
    %479 = vector.load %arg12[%c40_269, %c0_270] : memref<64x512xf32, #tpu.memory_space<vmem>>, vector<8x512xf32>
    %c0_271 = arith.constant 0 : index
    %c0_272 = arith.constant 0 : index
    %480 = vector.load %arg10[%c0_271, %c0_272] : memref<8x128xf32, #tpu.memory_space<vmem>>, vector<8x128xf32>
    %c1_273 = arith.constant 1 : index
    %c0_274 = arith.constant 0 : index
    %c0_275 = arith.constant 0 : index
    %481 = vector.load %arg3[%c1_273, %c0_274, %c0_275] : memref<2x128x512xf32, #tpu.memory_space<vmem>>, vector<1x128x512xf32>
    %482 = vector.shape_cast %481 : vector<1x128x512xf32> to vector<128x512xf32>
    %cst_276 = arith.constant dense<0.000000e+00> : vector<8x512xf32>
    %483 = tpu.matmul %480, %482, %cst_276 {dimension_numbers = #tpu.dot_dimension_numbers<[1], [0], [0], [1], [0, 0, 1, 1], [], []>} : vector<8x128xf32>, vector<128x512xf32>, vector<8x512xf32> -> vector<8x512xf32>
    %484 = arith.addf %479, %483 : vector<8x512xf32>
    %485 = vector.extract_strided_slice %484 {offsets = [0, 0], sizes = [8, 128], strides = [1, 1]} : vector<8x512xf32> to vector<8x128xf32>
    %486 = arith.negf %485 : vector<8x128xf32>
    %487 = math.exp %486 : vector<8x128xf32>
    %cst_277 = arith.constant 1.000000e+00 : f32
    %488 = vector.broadcast %cst_277 : f32 to vector<8x128xf32>
    %489 = arith.addf %488, %487 : vector<8x128xf32>
    %490 = arith.divf %488, %489 : vector<8x128xf32>
    %491 = vector.extract_strided_slice %484 {offsets = [0, 128], sizes = [8, 128], strides = [1, 1]} : vector<8x512xf32> to vector<8x128xf32>
    %492 = arith.negf %491 : vector<8x128xf32>
    %493 = math.exp %492 : vector<8x128xf32>
    %cst_278 = arith.constant 1.000000e+00 : f32
    %494 = vector.broadcast %cst_278 : f32 to vector<8x128xf32>
    %495 = arith.addf %494, %493 : vector<8x128xf32>
    %496 = arith.divf %494, %495 : vector<8x128xf32>
    %497 = vector.extract_strided_slice %484 {offsets = [0, 256], sizes = [8, 128], strides = [1, 1]} : vector<8x512xf32> to vector<8x128xf32>
    %498 = math.tanh %497 : vector<8x128xf32>
    %499 = vector.extract_strided_slice %484 {offsets = [0, 384], sizes = [8, 128], strides = [1, 1]} : vector<8x512xf32> to vector<8x128xf32>
    %500 = arith.negf %499 : vector<8x128xf32>
    %501 = math.exp %500 : vector<8x128xf32>
    %cst_279 = arith.constant 1.000000e+00 : f32
    %502 = vector.broadcast %cst_279 : f32 to vector<8x128xf32>
    %503 = arith.addf %502, %501 : vector<8x128xf32>
    %504 = arith.divf %502, %503 : vector<8x128xf32>
    %c0_280 = arith.constant 0 : index
    %c0_281 = arith.constant 0 : index
    %505 = vector.load %arg11[%c0_280, %c0_281] : memref<8x128xf32, #tpu.memory_space<vmem>>, vector<8x128xf32>
    %506 = arith.mulf %496, %505 : vector<8x128xf32>
    %507 = arith.mulf %490, %498 : vector<8x128xf32>
    %508 = arith.addf %506, %507 : vector<8x128xf32>
    %509 = math.tanh %508 : vector<8x128xf32>
    %510 = arith.mulf %504, %509 : vector<8x128xf32>
    %c0_282 = arith.constant 0 : index
    %c0_283 = arith.constant 0 : index
    %511 = vector.load %arg11[%c0_282, %c0_283] : memref<8x128xf32, #tpu.memory_space<vmem>>, vector<8x128xf32>
    tpu.vector_store %arg11[%c0_282, %c0_283], %508 {strides = array<i32>} : memref<8x128xf32, #tpu.memory_space<vmem>>, vector<8x128xf32>,
    %c0_284 = arith.constant 0 : index
    %c0_285 = arith.constant 0 : index
    %512 = vector.load %arg10[%c0_284, %c0_285] : memref<8x128xf32, #tpu.memory_space<vmem>>, vector<8x128xf32>
    tpu.vector_store %arg10[%c0_284, %c0_285], %510 {strides = array<i32>} : memref<8x128xf32, #tpu.memory_space<vmem>>, vector<8x128xf32>,
    %c40_286 = arith.constant 40 : index
    %c0_287 = arith.constant 0 : index
    %513 = vector.load %arg8[%c40_286, %c0_287] : memref<64x128xf32, #tpu.memory_space<vmem>>, vector<8x128xf32>
    tpu.vector_store %arg8[%c40_286, %c0_287], %510 {strides = array<i32>} : memref<64x128xf32, #tpu.memory_space<vmem>>, vector<8x128xf32>,
    %c48_288 = arith.constant 48 : index
    %c0_289 = arith.constant 0 : index
    %514 = vector.load %arg12[%c48_288, %c0_289] : memref<64x512xf32, #tpu.memory_space<vmem>>, vector<8x512xf32>
    %c0_290 = arith.constant 0 : index
    %c0_291 = arith.constant 0 : index
    %515 = vector.load %arg10[%c0_290, %c0_291] : memref<8x128xf32, #tpu.memory_space<vmem>>, vector<8x128xf32>
    %c1_292 = arith.constant 1 : index
    %c0_293 = arith.constant 0 : index
    %c0_294 = arith.constant 0 : index
    %516 = vector.load %arg3[%c1_292, %c0_293, %c0_294] : memref<2x128x512xf32, #tpu.memory_space<vmem>>, vector<1x128x512xf32>
    %517 = vector.shape_cast %516 : vector<1x128x512xf32> to vector<128x512xf32>
    %cst_295 = arith.constant dense<0.000000e+00> : vector<8x512xf32>
    %518 = tpu.matmul %515, %517, %cst_295 {dimension_numbers = #tpu.dot_dimension_numbers<[1], [0], [0], [1], [0, 0, 1, 1], [], []>} : vector<8x128xf32>, vector<128x512xf32>, vector<8x512xf32> -> vector<8x512xf32>
    %519 = arith.addf %514, %518 : vector<8x512xf32>
    %520 = vector.extract_strided_slice %519 {offsets = [0, 0], sizes = [8, 128], strides = [1, 1]} : vector<8x512xf32> to vector<8x128xf32>
    %521 = arith.negf %520 : vector<8x128xf32>
    %522 = math.exp %521 : vector<8x128xf32>
    %cst_296 = arith.constant 1.000000e+00 : f32
    %523 = vector.broadcast %cst_296 : f32 to vector<8x128xf32>
    %524 = arith.addf %523, %522 : vector<8x128xf32>
    %525 = arith.divf %523, %524 : vector<8x128xf32>
    %526 = vector.extract_strided_slice %519 {offsets = [0, 128], sizes = [8, 128], strides = [1, 1]} : vector<8x512xf32> to vector<8x128xf32>
    %527 = arith.negf %526 : vector<8x128xf32>
    %528 = math.exp %527 : vector<8x128xf32>
    %cst_297 = arith.constant 1.000000e+00 : f32
    %529 = vector.broadcast %cst_297 : f32 to vector<8x128xf32>
    %530 = arith.addf %529, %528 : vector<8x128xf32>
    %531 = arith.divf %529, %530 : vector<8x128xf32>
    %532 = vector.extract_strided_slice %519 {offsets = [0, 256], sizes = [8, 128], strides = [1, 1]} : vector<8x512xf32> to vector<8x128xf32>
    %533 = math.tanh %532 : vector<8x128xf32>
    %534 = vector.extract_strided_slice %519 {offsets = [0, 384], sizes = [8, 128], strides = [1, 1]} : vector<8x512xf32> to vector<8x128xf32>
    %535 = arith.negf %534 : vector<8x128xf32>
    %536 = math.exp %535 : vector<8x128xf32>
    %cst_298 = arith.constant 1.000000e+00 : f32
    %537 = vector.broadcast %cst_298 : f32 to vector<8x128xf32>
    %538 = arith.addf %537, %536 : vector<8x128xf32>
    %539 = arith.divf %537, %538 : vector<8x128xf32>
    %c0_299 = arith.constant 0 : index
    %c0_300 = arith.constant 0 : index
    %540 = vector.load %arg11[%c0_299, %c0_300] : memref<8x128xf32, #tpu.memory_space<vmem>>, vector<8x128xf32>
    %541 = arith.mulf %531, %540 : vector<8x128xf32>
    %542 = arith.mulf %525, %533 : vector<8x128xf32>
    %543 = arith.addf %541, %542 : vector<8x128xf32>
    %544 = math.tanh %543 : vector<8x128xf32>
    %545 = arith.mulf %539, %544 : vector<8x128xf32>
    %c0_301 = arith.constant 0 : index
    %c0_302 = arith.constant 0 : index
    %546 = vector.load %arg11[%c0_301, %c0_302] : memref<8x128xf32, #tpu.memory_space<vmem>>, vector<8x128xf32>
    tpu.vector_store %arg11[%c0_301, %c0_302], %543 {strides = array<i32>} : memref<8x128xf32, #tpu.memory_space<vmem>>, vector<8x128xf32>,
    %c0_303 = arith.constant 0 : index
    %c0_304 = arith.constant 0 : index
    %547 = vector.load %arg10[%c0_303, %c0_304] : memref<8x128xf32, #tpu.memory_space<vmem>>, vector<8x128xf32>
    tpu.vector_store %arg10[%c0_303, %c0_304], %545 {strides = array<i32>} : memref<8x128xf32, #tpu.memory_space<vmem>>, vector<8x128xf32>,
    %c48_305 = arith.constant 48 : index
    %c0_306 = arith.constant 0 : index
    %548 = vector.load %arg8[%c48_305, %c0_306] : memref<64x128xf32, #tpu.memory_space<vmem>>, vector<8x128xf32>
    tpu.vector_store %arg8[%c48_305, %c0_306], %545 {strides = array<i32>} : memref<64x128xf32, #tpu.memory_space<vmem>>, vector<8x128xf32>,
    %c56_307 = arith.constant 56 : index
    %c0_308 = arith.constant 0 : index
    %549 = vector.load %arg12[%c56_307, %c0_308] : memref<64x512xf32, #tpu.memory_space<vmem>>, vector<8x512xf32>
    %c0_309 = arith.constant 0 : index
    %c0_310 = arith.constant 0 : index
    %550 = vector.load %arg10[%c0_309, %c0_310] : memref<8x128xf32, #tpu.memory_space<vmem>>, vector<8x128xf32>
    %c1_311 = arith.constant 1 : index
    %c0_312 = arith.constant 0 : index
    %c0_313 = arith.constant 0 : index
    %551 = vector.load %arg3[%c1_311, %c0_312, %c0_313] : memref<2x128x512xf32, #tpu.memory_space<vmem>>, vector<1x128x512xf32>
    %552 = vector.shape_cast %551 : vector<1x128x512xf32> to vector<128x512xf32>
    %cst_314 = arith.constant dense<0.000000e+00> : vector<8x512xf32>
    %553 = tpu.matmul %550, %552, %cst_314 {dimension_numbers = #tpu.dot_dimension_numbers<[1], [0], [0], [1], [0, 0, 1, 1], [], []>} : vector<8x128xf32>, vector<128x512xf32>, vector<8x512xf32> -> vector<8x512xf32>
    %554 = arith.addf %549, %553 : vector<8x512xf32>
    %555 = vector.extract_strided_slice %554 {offsets = [0, 0], sizes = [8, 128], strides = [1, 1]} : vector<8x512xf32> to vector<8x128xf32>
    %556 = arith.negf %555 : vector<8x128xf32>
    %557 = math.exp %556 : vector<8x128xf32>
    %cst_315 = arith.constant 1.000000e+00 : f32
    %558 = vector.broadcast %cst_315 : f32 to vector<8x128xf32>
    %559 = arith.addf %558, %557 : vector<8x128xf32>
    %560 = arith.divf %558, %559 : vector<8x128xf32>
    %561 = vector.extract_strided_slice %554 {offsets = [0, 128], sizes = [8, 128], strides = [1, 1]} : vector<8x512xf32> to vector<8x128xf32>
    %562 = arith.negf %561 : vector<8x128xf32>
    %563 = math.exp %562 : vector<8x128xf32>
    %cst_316 = arith.constant 1.000000e+00 : f32
    %564 = vector.broadcast %cst_316 : f32 to vector<8x128xf32>
    %565 = arith.addf %564, %563 : vector<8x128xf32>
    %566 = arith.divf %564, %565 : vector<8x128xf32>
    %567 = vector.extract_strided_slice %554 {offsets = [0, 256], sizes = [8, 128], strides = [1, 1]} : vector<8x512xf32> to vector<8x128xf32>
    %568 = math.tanh %567 : vector<8x128xf32>
    %569 = vector.extract_strided_slice %554 {offsets = [0, 384], sizes = [8, 128], strides = [1, 1]} : vector<8x512xf32> to vector<8x128xf32>
    %570 = arith.negf %569 : vector<8x128xf32>
    %571 = math.exp %570 : vector<8x128xf32>
    %cst_317 = arith.constant 1.000000e+00 : f32
    %572 = vector.broadcast %cst_317 : f32 to vector<8x128xf32>
    %573 = arith.addf %572, %571 : vector<8x128xf32>
    %574 = arith.divf %572, %573 : vector<8x128xf32>
    %c0_318 = arith.constant 0 : index
    %c0_319 = arith.constant 0 : index
    %575 = vector.load %arg11[%c0_318, %c0_319] : memref<8x128xf32, #tpu.memory_space<vmem>>, vector<8x128xf32>
    %576 = arith.mulf %566, %575 : vector<8x128xf32>
    %577 = arith.mulf %560, %568 : vector<8x128xf32>
    %578 = arith.addf %576, %577 : vector<8x128xf32>
    %579 = math.tanh %578 : vector<8x128xf32>
    %580 = arith.mulf %574, %579 : vector<8x128xf32>
    %c0_320 = arith.constant 0 : index
    %c0_321 = arith.constant 0 : index
    %581 = vector.load %arg11[%c0_320, %c0_321] : memref<8x128xf32, #tpu.memory_space<vmem>>, vector<8x128xf32>
    tpu.vector_store %arg11[%c0_320, %c0_321], %578 {strides = array<i32>} : memref<8x128xf32, #tpu.memory_space<vmem>>, vector<8x128xf32>,
    %c0_322 = arith.constant 0 : index
    %c0_323 = arith.constant 0 : index
    %582 = vector.load %arg10[%c0_322, %c0_323] : memref<8x128xf32, #tpu.memory_space<vmem>>, vector<8x128xf32>
    tpu.vector_store %arg10[%c0_322, %c0_323], %580 {strides = array<i32>} : memref<8x128xf32, #tpu.memory_space<vmem>>, vector<8x128xf32>,
    %c56_324 = arith.constant 56 : index
    %c0_325 = arith.constant 0 : index
    %583 = vector.load %arg8[%c56_324, %c0_325] : memref<64x128xf32, #tpu.memory_space<vmem>>, vector<8x128xf32>
    tpu.vector_store %arg8[%c56_324, %c0_325], %580 {strides = array<i32>} : memref<64x128xf32, #tpu.memory_space<vmem>>, vector<8x128xf32>,
    %c0_326 = arith.constant 0 : index
    %c0_327 = arith.constant 0 : index
    %584 = vector.load %arg8[%c0_326, %c0_327] : memref<64x128xf32, #tpu.memory_space<vmem>>, vector<64x128xf32>
    %c0_328 = arith.constant 0 : index
    %c0_329 = arith.constant 0 : index
    %585 = vector.load %arg6[%c0_328, %c0_329] : memref<128x128xf32, #tpu.memory_space<vmem>>, vector<128x128xf32>
    %cst_330 = arith.constant dense<0.000000e+00> : vector<64x128xf32>
    %586 = tpu.matmul %584, %585, %cst_330 {dimension_numbers = #tpu.dot_dimension_numbers<[1], [0], [0], [1], [0, 0, 1, 1], [], []>} : vector<64x128xf32>, vector<128x128xf32>, vector<64x128xf32> -> vector<64x128xf32>
    %c0_331 = arith.constant 0 : index
    %c0_332 = arith.constant 0 : index
    %587 = vector.load %arg7[%c0_331, %c0_332] : memref<1x128xf32, #tpu.memory_space<vmem>>, vector<1x128xf32>
    %588 = vector.broadcast %587 : vector<1x128xf32> to vector<64x128xf32>
    %589 = arith.addf %586, %588 : vector<64x128xf32>
    %c0_333 = arith.constant 0 : index
    %c0_334 = arith.constant 0 : index
    %590 = vector.load %arg9[%c0_333, %c0_334] : memref<64x128xf32, #tpu.memory_space<vmem>>, vector<64x128xf32>
    tpu.vector_store %arg9[%c0_333, %c0_334], %589 {strides = array<i32>} : memref<64x128xf32, #tpu.memory_space<vmem>>, vector<64x128xf32>,
    return
  }
}

</mosaic_0001>

<bundles_post_ra>
// kernel: lstm_forward.1
= control target key start
LH: loop header
LB: loop body
LE: loop exit
PB: predicated region body
PF: predicated region fallthrough
CT: control target
= control target key end

     0   :  { %15 = vsyncpa [#allocation7], 0  ;;  %s7978_s0 = inlined_call_operand.vmem [shape: f32[64,128], index: 0, kind: input, shape index: {}]   ;;  %s7979_s1 = inlined_call_operand.hbm [shape: f32[128,512], index: 1, kind: input, shape index: {}]   ;;  %s7980_s2 = inlined_call_operand.vmem [shape: f32[1,512], index: 2, kind: input, shape index: {}]   ;;  %s7981_s3 = inlined_call_operand.hbm [shape: f32[2,128,512], index: 3, kind: input, shape index: {}]   ;;  %s7982_s4 = inlined_call_operand.hbm [shape: f32[1,128,512], index: 4, kind: input, shape index: {}]   ;;  %s7983_s5 = inlined_call_operand.vmem [shape: f32[1,1,512], index: 5, kind: input, shape index: {}]   ;;  %s7984_s6 = inlined_call_operand.hbm [shape: f32[128,128], index: 6, kind: input, shape index: {}]   ;;  %s7985_s7 = inlined_call_operand.vmem [shape: f32[1,128], index: 7, kind: input, shape index: {}]   ;;  %s7986_s8 = inlined_call_operand.vmem [shape: f32[64,128], index: 8, kind: output, shape index: {0}]   ;;  %s7987_s9 = inlined_call_operand.vmem [shape: f32[64,128], index: 9, kind: output, shape index: {1}]  }
   0x1   :  { %16 = vsyncpa [#allocation9], 0 }
   0x2   :  { %17 = vsyncpa [#allocation12], 0  ;;  %s6626_s30 = smov [#allocation8]   ;;  %s6627_s11 = smov [#allocation6]  }
   0x3   :  { %s39_s10 = sshll.u32 %s6626_s30, 4  ;;  %s25_s12 = sshll.u32 %s6627_s11, 4  ;;  %s40_s10 = int_to_ptr.vmem [resolvable:$true] %s39_s10  ;;  %s6685_s12 = int_to_ptr.vmem [resolvable:$true] %s25_s12 }
   0x4   :  { %s6532_s15 = scalar_lea.hbm %s7981_s3, 16384 }
   0x5   :  { %p6533_p0 = scmp.ne.s32.totalorder %s7981_s3, %s6532_s15  ;;  %p6536_p1 = scmp.lt.u32.totalorder %s6532_s15, %s7981_s3 }
   0x7   :  { %p6538_p2 = pnand %p6536_p1, %p6533_p0 }
   0x9   :  { %6541 = shalt.err (!%p6538_p2)
}
   0xa   :  { %s6542_s20 = scalar_lea.vmem %s40_s10, 16384  ;;  %p6547_p4 = scmp.lt.s32.totalorder %s40_s10, %s40_s10 }
   0xb   :  { %p6543_p3 = scmp.ne.s32.totalorder %s40_s10, %s6542_s20  ;;  %p6548_p5 = scmp.lt.s32.totalorder %s6542_s20, %s6542_s20 }
   0xd   :  { %p6549_p6 = por %p6548_p5, %p6547_p4 }
   0xf   :  { %p6550_p7 = pnand %p6549_p6, %p6543_p3 }
  0x11   :  { %6553 = shalt.err (!%p6550_p7)
}
  0x12   :  { %s6628_s21 = smov 512   ;;  %s6629_s22 = smov 32  }
  0x13   :  { %45 = dma.hbm_to_vmem [thread:$0]  %s7981_s3, 16384, %s40_s10, [#allocation9], %s6628_s21, %s6628_s21, %s6629_s22  }
  0x14   :  { %s6554_s27 = scalar_lea.hbm %s7979_s1, 8192 }
  0x15   :  { %p6555_p8 = scmp.ne.s32.totalorder %s7979_s1, %s6554_s27  ;;  %p6558_p9 = scmp.lt.u32.totalorder %s6554_s27, %s7979_s1 }
  0x17   :  { %p6560_p10 = pnand %p6558_p9, %p6555_p8 }
  0x19   :  { %6563 = shalt.err (!%p6560_p10)
}
  0x1a   :  { %s6564_s13 = scalar_lea.vmem %s6685_s12, 8192  ;;  %p6569_p12 = scmp.lt.s32.totalorder %s6685_s12, %s6685_s12 }
  0x1b   :  { %p6565_p11 = scmp.ne.s32.totalorder %s6685_s12, %s6564_s13  ;;  %p6570_p13 = scmp.lt.s32.totalorder %s6564_s13, %s6564_s13 }
  0x1d   :  { %p6571_p0 = por %p6570_p13, %p6569_p12 }
  0x1f   :  { %p6572_p1 = pnand %p6571_p0, %p6565_p11 }
  0x21   :  { %6575 = shalt.err (!%p6572_p1)
}
  0x22   :  { %31 = dma.hbm_to_vmem [thread:$0]  %s7979_s1, 8192, %s6685_s12, [#allocation7], %s6628_s21, %s6628_s21, %s6629_s22  }
  0x23   :  { %s6630_s14 = smov [#allocation10]   ;;  %s6631_s16 = smov [#allocation11]  }
  0x24   :  { %s51_s15 = sshll.u32 %s6630_s14, 4  ;;  %s65_s17 = sshll.u32 %s6631_s16, 4  ;;  %s52_s15 = int_to_ptr.vmem [resolvable:$true] %s51_s15  ;;  %s6722_s17 = int_to_ptr.vmem [resolvable:$true] %s65_s17 }
  0x25   :  { %s6576_s20 = scalar_lea.hbm %s7982_s4, 8192 }
  0x26   :  { %p6577_p2 = scmp.ne.s32.totalorder %s7982_s4, %s6576_s20  ;;  %p6580_p3 = scmp.lt.u32.totalorder %s6576_s20, %s7982_s4 }
  0x28   :  { %p6582_p4 = pnand %p6580_p3, %p6577_p2 }
  0x2a   :  { %6585 = shalt.err (!%p6582_p4)
}
  0x2b   :  { %s6586_s1 = scalar_lea.vmem %s52_s15, 8192  ;;  %p6591_p6 = scmp.lt.s32.totalorder %s52_s15, %s52_s15 }
  0x2c   :  { %p6587_p5 = scmp.ne.s32.totalorder %s52_s15, %s6586_s1  ;;  %p6592_p7 = scmp.lt.s32.totalorder %s6586_s1, %s6586_s1 }
  0x2e   :  { %p6593_p8 = por %p6592_p7, %p6591_p6 }
  0x30   :  { %p6594_p9 = pnand %p6593_p8, %p6587_p5 }
  0x32   :  { %6597 = shalt.err (!%p6594_p9)
}
  0x33   :  { %57 = dma.hbm_to_vmem [thread:$0]  %s7982_s4, 8192, %s52_s15, [#allocation9], %s6628_s21, %s6628_s21, %s6629_s22  }
  0x34   :  { %s6598_s30 = scalar_lea.hbm %s7984_s6, 2048 }
  0x35   :  { %p6599_p10 = scmp.ne.s32.totalorder %s7984_s6, %s6598_s30  ;;  %p6602_p11 = scmp.lt.u32.totalorder %s6598_s30, %s7984_s6 }
  0x37   :  { %p6604_p12 = pnand %p6602_p11, %p6599_p10 }
  0x39   :  { %6607 = shalt.err (!%p6604_p12)
}
  0x3a   :  { %s6608_s14 = scalar_lea.vmem %s6722_s17, 2048  ;;  %p6613_p0 = scmp.lt.s32.totalorder %s6722_s17, %s6722_s17 }
  0x3b   :  { %p6609_p13 = scmp.ne.s32.totalorder %s6722_s17, %s6608_s14  ;;  %p6614_p1 = scmp.lt.s32.totalorder %s6608_s14, %s6608_s14 }
  0x3d   :  { %p6615_p2 = por %p6614_p1, %p6613_p0 }
  0x3f   :  { %p6616_p3 = pnand %p6615_p2, %p6609_p13 }
  0x41   :  { %6619 = shalt.err (!%p6616_p3)
}
  0x42   :  { %s6632_s4 = smov 128   ;;  %s6633_s21 = smov 8  }
  0x43   :  { %71 = dma.hbm_to_vmem [thread:$0]  %s7984_s6, 2048, %s6722_s17, [#allocation12], %s6632_s4, %s6632_s4, %s6633_s21  }
  0x44   :  { %6620 = dma.done.wait [#allocation7], 8192  }
  0x45   :  { %6621 = vsyncadd [#allocation7], 4294959104 }
  0x46   :  { %6622 = dma.done.wait [#allocation9], 24576  }
  0x47   :  { %6623 = vsyncadd [#allocation9], 4294942720 }
  0x48   :  { %6624 = dma.done.wait [#allocation12], 2048  }
  0x49   :  { %6625 = vsyncadd [#allocation12], 4294965248  ;;  %v7992_v0 = vmov 0.0   ;;  %v95_v1 = vld [vmem:[#allocation6 + $0x8] sm:$0xff]  ;;  %v94_v3 = vld [vmem:[#allocation6] sm:$0xff] }
  0x4a   :  { %244 = vmatprep.mubr.f32.mxu1 %v7992_v0  ;;  %573 = vmatprep.mubr.f32.mxu0 %v7992_v0  ;;  %v99_v2 = vld [vmem:[#allocation6 + $0x28] sm:$0xff]  ;;  %v98_v5 = vld [vmem:[#allocation6 + $0x20] sm:$0xff] }
  0x4b   :  { %v4955_v4 = vpack.c.bf16 %v99_v2, %v95_v1  ;;  %v446_v6 = vld [vmem:[#allocation8 + $0x8] sm:$0xff]  ;;  %v4957_v8 = vpack.c.bf16 %v98_v5, %v94_v3  ;;  %v445_v10 = vld [vmem:[#allocation8] sm:$0xff] }
  0x4c   :  { %v450_v7 = vld [vmem:[#allocation8 + $0x28] sm:$0xff]  ;;  %v449_v11 = vld [vmem:[#allocation8 + $0x20] sm:$0xff] }
  0x4d   :  { %v6758_v9 = vpack.c.bf16 %v450_v7, %v446_v6  ;;  %v103_v12 = vld [vmem:[#allocation6 + $0x48] sm:$0xff]  ;;  %4956 = vmatprep.subr.bf16.mxu1 %v4955_v4  ;;  %v6760_v13 = vpack.c.bf16 %v449_v11, %v445_v10  ;;  %v102_v15 = vld [vmem:[#allocation6 + $0x40] sm:$0xff] }
  0x4e   :  { %v107_v14 = vld [vmem:[#allocation6 + $0x68] sm:$0xff]  ;;  %v106_v16 = vld [vmem:[#allocation6 + $0x60] sm:$0xff]  ;;  %4958 = vmatpush1.bf16.msra.mxu1 %v4957_v8 }
  0x4f   :  { %5020 = vmatprep.subr.bf16.mxu0 %v6758_v9  ;;  %v4959_v17 = vpack.c.bf16 %v107_v14, %v103_v12  ;;  %v4961_v18 = vpack.c.bf16 %v106_v16, %v102_v15  ;;  %v454_v19 = vld [vmem:[#allocation8 + $0x48] sm:$0xff]  ;;  %v453_v21 = vld [vmem:[#allocation8 + $0x40] sm:$0xff] }
  0x50   :  { %v458_v20 = vld [vmem:[#allocation8 + $0x68] sm:$0xff]  ;;  %5022 = vmatpush1.bf16.msra.mxu0 %v6760_v13  ;;  %v457_v23 = vld [vmem:[#allocation8 + $0x60] sm:$0xff] }
  0x51   :  { %v6764_v22 = vpack.c.bf16 %v458_v20, %v454_v19  ;;  %v111_v24 = vld [vmem:[#allocation6 + $0x88] sm:$0xff]  ;;  %4960 = vmatprep.subr.bf16.mxu1 %v4959_v17  ;;  %v6766_v26 = vpack.c.bf16 %v457_v23, %v453_v21  ;;  %v110_v28 = vld [vmem:[#allocation6 + $0x80] sm:$0xff] }
  0x52   :  { %v115_v25 = vld [vmem:[#allocation6 + $0xa8] sm:$0xff]  ;;  %v114_v29 = vld [vmem:[#allocation6 + $0xa0] sm:$0xff]  ;;  %4962 = vmatpush1.bf16.msra.mxu1 %v4961_v18 }
  0x53   :  { %v4963_v27 = vpack.c.bf16 %v115_v25, %v111_v24  ;;  %v462_v30 = vld [vmem:[#allocation8 + $0x88] sm:$0xff]  ;;  %5024 = vmatprep.subr.bf16.mxu0 %v6764_v22  ;;  %v461_v32 = vld [vmem:[#allocation8 + $0x80] sm:$0xff]  ;;  %v4965_v34 = vpack.c.bf16 %v114_v29, %v110_v28 }
  0x54   :  { %v466_v31 = vld [vmem:[#allocation8 + $0xa8] sm:$0xff]  ;;  %v465_v33 = vld [vmem:[#allocation8 + $0xa0] sm:$0xff]  ;;  %5026 = vmatpush1.bf16.msra.mxu0 %v6766_v26 }
  0x55   :  { %v6769_v35 = vpack.c.bf16 %v466_v31, %v462_v30  ;;  %v119_v36 = vld [vmem:[#allocation6 + $0xc8] sm:$0xff]  ;;  %v118_v38 = vld [vmem:[#allocation6 + $0xc0] sm:$0xff]  ;;  %4964 = vmatprep.subr.bf16.mxu1 %v4963_v27  ;;  %v6772_v39 = vpack.c.bf16 %v465_v33, %v461_v32 }
  0x56   :  { %v123_v37 = vld [vmem:[#allocation6 + $0xe8] sm:$0xff]  ;;  %v122_v41 = vld [vmem:[#allocation6 + $0xe0] sm:$0xff]  ;;  %4966 = vmatpush1.bf16.msra.mxu1 %v4965_v34 }
  0x57   :  { %v4967_v40 = vpack.c.bf16 %v123_v37, %v119_v36  ;;  %v470_v42 = vld [vmem:[#allocation8 + $0xc8] sm:$0xff]  ;;  %5028 = vmatprep.subr.bf16.mxu0 %v6769_v35  ;;  %v469_v45 = vld [vmem:[#allocation8 + $0xc0] sm:$0xff]  ;;  %v4969_v49 = vpack.c.bf16 %v122_v41, %v118_v38  ;;  %v97_v37 = vld [vmem:[#allocation6 + $0x18] sm:$0xff] }
  0x58   :  { %v474_v43 = vld [vmem:[#allocation8 + $0xe8] sm:$0xff]  ;;  %v473_v46 = vld [vmem:[#allocation8 + $0xe0] sm:$0xff]  ;;  %5030 = vmatpush1.bf16.msra.mxu0 %v6772_v39  ;;  %v101_v38 = vld [vmem:[#allocation6 + $0x38] sm:$0xff] }
  0x59   :  { %v6775_v44 = vpack.c.bf16 %v474_v43, %v470_v42  ;;  %v127_v47 = vld [vmem:[#allocation6 + $0x108] sm:$0xff]  ;;  %4968 = vmatprep.subr.bf16.mxu1 %v4967_v40  ;;  %v6778_v52 = vpack.c.bf16 %v473_v46, %v469_v45  ;;  %v126_v54 = vld [vmem:[#allocation6 + $0x100] sm:$0xff]  ;;  %v4987_v42 = vpack.c.bf16 %v101_v38, %v97_v37  ;;  %v96_v43 = vld [vmem:[#allocation6 + $0x10] sm:$0xff] }
  0x5a   :  { %v131_v48 = vld [vmem:[#allocation6 + $0x128] sm:$0xff]  ;;  %v130_v55 = vld [vmem:[#allocation6 + $0x120] sm:$0xff]  ;;  %4970 = vmatpush1.bf16.msra.mxu1 %v4969_v49  ;;  %v100_v45 = vld [vmem:[#allocation6 + $0x30] sm:$0xff] }
  0x5b   :  { %v478_v50 = vld [vmem:[#allocation8 + $0x108] sm:$0xff]  ;;  %v4971_v53 = vpack.c.bf16 %v131_v48, %v127_v47  ;;  %v477_v56 = vld [vmem:[#allocation8 + $0x100] sm:$0xff]  ;;  %5032 = vmatprep.subr.bf16.mxu0 %v6775_v44  ;;  %v4973_v63 = vpack.c.bf16 %v130_v55, %v126_v54  ;;  %v105_v46 = vld [vmem:[#allocation6 + $0x58] sm:$0xff]  ;;  %v4989_v49 = vpack.c.bf16 %v100_v45, %v96_v43 }
  0x5c   :  { %v482_v51 = vld [vmem:[#allocation8 + $0x128] sm:$0xff]  ;;  %v481_v58 = vld [vmem:[#allocation8 + $0x120] sm:$0xff]  ;;  %5034 = vmatpush1.bf16.msra.mxu0 %v6778_v52  ;;  %v109_v47 = vld [vmem:[#allocation6 + $0x78] sm:$0xff] }
  0x5d   :  { %v6781_v57 = vpack.c.bf16 %v482_v51, %v478_v50  ;;  %v135_v59 = vld [vmem:[#allocation6 + $0x148] sm:$0xff]  ;;  %4972 = vmatprep.subr.bf16.mxu1 %v4971_v53  ;;  %v6784_v1 = vpack.c.bf16 %v481_v58, %v477_v56  ;;  %v134_v3 = vld [vmem:[#allocation6 + $0x140] sm:$0xff]  ;;  %v4991_v50 = vpack.c.bf16 %v109_v47, %v105_v46  ;;  %v104_v51 = vld [vmem:[#allocation6 + $0x50] sm:$0xff] }
  0x5e   :  { %v139_v60 = vld [vmem:[#allocation6 + $0x168] sm:$0xff]  ;;  %v138_v4 = vld [vmem:[#allocation6 + $0x160] sm:$0xff]  ;;  %4974 = vmatpush1.bf16.msra.mxu1 %v4973_v63  ;;  %v108_v53 = vld [vmem:[#allocation6 + $0x70] sm:$0xff] }
  0x5f   :  { %v486_v61 = vld [vmem:[#allocation8 + $0x148] sm:$0xff]  ;;  %v4975_v2 = vpack.c.bf16 %v139_v60, %v135_v59  ;;  %v485_v5 = vld [vmem:[#allocation8 + $0x140] sm:$0xff]  ;;  %5036 = vmatprep.subr.bf16.mxu0 %v6781_v57  ;;  %v4977_v14 = vpack.c.bf16 %v138_v4, %v134_v3  ;;  %v113_v54 = vld [vmem:[#allocation6 + $0x98] sm:$0xff]  ;;  %v4993_v58 = vpack.c.bf16 %v108_v53, %v104_v51 }
  0x60   :  { %v490_v62 = vld [vmem:[#allocation8 + $0x168] sm:$0xff]  ;;  %v489_v7 = vld [vmem:[#allocation8 + $0x160] sm:$0xff]  ;;  %5038 = vmatpush1.bf16.msra.mxu0 %v6784_v1  ;;  %v117_v55 = vld [vmem:[#allocation6 + $0xb8] sm:$0xff] }
  0x61   :  { %v6787_v6 = vpack.c.bf16 %v490_v62, %v486_v61  ;;  %v143_v8 = vld [vmem:[#allocation6 + $0x188] sm:$0xff]  ;;  %4976 = vmatprep.subr.bf16.mxu1 %v4975_v2  ;;  %v6790_v15 = vpack.c.bf16 %v489_v7, %v485_v5  ;;  %v142_v17 = vld [vmem:[#allocation6 + $0x180] sm:$0xff]  ;;  %v4995_v59 = vpack.c.bf16 %v117_v55, %v113_v54  ;;  %v112_v60 = vld [vmem:[#allocation6 + $0x90] sm:$0xff] }
  0x62   :  { %v147_v10 = vld [vmem:[#allocation6 + $0x1a8] sm:$0xff]  ;;  %v146_v18 = vld [vmem:[#allocation6 + $0x1a0] sm:$0xff]  ;;  %4978 = vmatpush1.bf16.msra.mxu1 %v4977_v14  ;;  %v116_v61 = vld [vmem:[#allocation6 + $0xb0] sm:$0xff] }
  0x63   :  { %v494_v11 = vld [vmem:[#allocation8 + $0x188] sm:$0xff]  ;;  %v4979_v16 = vpack.c.bf16 %v147_v10, %v143_v8  ;;  %v493_v19 = vld [vmem:[#allocation8 + $0x180] sm:$0xff]  ;;  %5040 = vmatprep.subr.bf16.mxu0 %v6787_v6  ;;  %v4981_v28 = vpack.c.bf16 %v146_v18, %v142_v17  ;;  %v121_v62 = vld [vmem:[#allocation6 + $0xd8] sm:$0xff]  ;;  %v4997_v2 = vpack.c.bf16 %v116_v61, %v112_v60 }
  0x64   :  { %v498_v12 = vld [vmem:[#allocation8 + $0x1a8] sm:$0xff]  ;;  %v497_v21 = vld [vmem:[#allocation8 + $0x1a0] sm:$0xff]  ;;  %5042 = vmatpush1.bf16.msra.mxu0 %v6790_v15  ;;  %v125_v63 = vld [vmem:[#allocation6 + $0xf8] sm:$0xff] }
  0x65   :  { %v6793_v20 = vpack.c.bf16 %v498_v12, %v494_v11  ;;  %v151_v23 = vld [vmem:[#allocation6 + $0x1c8] sm:$0xff]  ;;  %4980 = vmatprep.subr.bf16.mxu1 %v4979_v16  ;;  %v6796_v29 = vpack.c.bf16 %v497_v21, %v493_v19  ;;  %v150_v31 = vld [vmem:[#allocation6 + $0x1c0] sm:$0xff]  ;;  %v4999_v3 = vpack.c.bf16 %v125_v63, %v121_v62  ;;  %v120_v4 = vld [vmem:[#allocation6 + $0xd0] sm:$0xff] }
  0x66   :  { %v155_v24 = vld [vmem:[#allocation6 + $0x1e8] sm:$0xff]  ;;  %v154_v32 = vld [vmem:[#allocation6 + $0x1e0] sm:$0xff]  ;;  %4982 = vmatpush1.bf16.msra.mxu1 %v4981_v28  ;;  %v124_v5 = vld [vmem:[#allocation6 + $0xf0] sm:$0xff] }
  0x67   :  { %v502_v25 = vld [vmem:[#allocation8 + $0x1c8] sm:$0xff]  ;;  %v4983_v30 = vpack.c.bf16 %v155_v24, %v151_v23  ;;  %v501_v33 = vld [vmem:[#allocation8 + $0x1c0] sm:$0xff]  ;;  %5044 = vmatprep.subr.bf16.mxu0 %v6793_v20  ;;  %v4985_v40 = vpack.c.bf16 %v154_v32, %v150_v31  ;;  %v133_v7 = vld [vmem:[#allocation6 + $0x138] sm:$0xff]  ;;  %v5001_v8 = vpack.c.bf16 %v124_v5, %v120_v4 }
  0x68   :  { %v506_v27 = vld [vmem:[#allocation8 + $0x1e8] sm:$0xff]  ;;  %v505_v36 = vld [vmem:[#allocation8 + $0x1e0] sm:$0xff]  ;;  %5046 = vmatpush1.bf16.msra.mxu0 %v6796_v29  ;;  %v128_v11 = vld [vmem:[#allocation6 + $0x110] sm:$0xff] }
  0x69   :  { %v6799_v34 = vpack.c.bf16 %v506_v27, %v502_v25  ;;  %4984 = vmatprep.subr.bf16.mxu1 %v4983_v30  ;;  %v6802_v41 = vpack.c.bf16 %v505_v36, %v501_v33  ;;  %v6808_v48 = vld [vmem:[%s7978_s0] sm:$0xff]  ;;  %v6817_v56 = vld [vmem:[%s7978_s0 + $0x8] sm:$0xff]  ;;  %v132_v12 = vld [vmem:[#allocation6 + $0x130] sm:$0xff] }
  0x6a   :  { %4986 = vmatpush1.bf16.msra.mxu1 %v4985_v40  ;;  %v137_v14 = vld [vmem:[#allocation6 + $0x158] sm:$0xff]  ;;  %v136_v18 = vld [vmem:[#allocation6 + $0x150] sm:$0xff] }
  0x6b   :  { %5048 = vmatprep.subr.bf16.mxu0 %v6799_v34  ;;  %4988 = vmatprep.subr.bf16.mxu1 %v4987_v42  ;;  %v141_v16 = vld [vmem:[#allocation6 + $0x178] sm:$0xff]  ;;  %v140_v19 = vld [vmem:[#allocation6 + $0x170] sm:$0xff] }
  0x6c   :  { %5050 = vmatpush1.bf16.msra.mxu0 %v6802_v41  ;;  %v5007_v17 = vpack.c.bf16 %v141_v16, %v137_v14  ;;  %v145_v21 = vld [vmem:[#allocation6 + $0x198] sm:$0xff]  ;;  %v144_v25 = vld [vmem:[#allocation6 + $0x190] sm:$0xff] }
  0x6d   :  { %5084 = vmatprep.subr.bf16.mxu0 %v6758_v9  ;;  %245 = vmatmul.mubr.f32.vlgmr.msra.gmra.mrb[0].mxu1 %v6808_v48  ;;  %v6828_v9 = vld [vmem:[%s7978_s0 + $0x10] sm:$0xff]  ;;  %v149_v23 = vld [vmem:[#allocation6 + $0x1b8] sm:$0xff] }
  0x6e   :  { %4990 = vmatpush1.bf16.msra.mxu1 %v4989_v49  ;;  %250 = vmatprep.mubr.f32.mxu1 %v7992_v0  ;;  %v5011_v24 = vpack.c.bf16 %v149_v23, %v145_v21  ;;  %v148_v27 = vld [vmem:[#allocation6 + $0x1b0] sm:$0xff]  ;;  %v153_v28 = vld [vmem:[#allocation6 + $0x1d8] sm:$0xff]  ;;  %v160_v23 = vlaneseq }
  0x6f   :  { %574 = vmatmul.mubr.f32.vlgmr.msra.gmra.mrb[0].mxu0 %v7992_v0  ;;  %4992 = vmatprep.subr.bf16.mxu1 %v4991_v50  ;;  %v157_v30 = vld [vmem:[#allocation6 + $0x1f8] sm:$0xff]  ;;  %v152_v32 = vld [vmem:[#allocation6 + $0x1d0] sm:$0xff] }
  0x70   :  { %5086 = vmatpush1.bf16.msra.mxu0 %v6760_v13  ;;  %816 = vmatprep.mubr.f32.mxu0 %v7992_v0  ;;  %v129_v13 = vld [vmem:[#allocation6 + $0x118] sm:$0xff]  ;;  %v5015_v31 = vpack.c.bf16 %v157_v30, %v153_v28  ;;  %v156_v33 = vld [vmem:[#allocation6 + $0x1f0] sm:$0xff] }
  0x71   :  { %251 = vmatmul.mubr.f32.gmra.mrb[2].mxu1 %v6817_v56  ;;  %5088 = vmatprep.subr.bf16.mxu0 %v6764_v22  ;;  %v6837_v22 = vld [vmem:[%s7978_s0 + $0x18] sm:$0xff]  ;;  %v5003_v10 = vpack.c.bf16 %v133_v7, %v129_v13  ;;  %v447_v40 = vld [vmem:[#allocation8 + $0x10] sm:$0xff] }
  0x72   :  { %4994 = vmatpush1.bf16.msra.mxu1 %v4993_v58  ;;  %256 = vmatprep.mubr.f32.mxu1 %v7992_v0  ;;  %v448_v36 = vld [vmem:[#allocation8 + $0x18] sm:$0xff]  ;;  %v451_v42 = vld [vmem:[#allocation8 + $0x30] sm:$0xff] }
  0x73   :  { %4996 = vmatprep.subr.bf16.mxu1 %v4995_v59  ;;  %v452_v37 = vld [vmem:[#allocation8 + $0x38] sm:$0xff]  ;;  %v455_v46 = vld [vmem:[#allocation8 + $0x50] sm:$0xff] }
  0x74   :  { %5090 = vmatpush1.bf16.msra.mxu0 %v6766_v26  ;;  %v6846_v26 = vld [vmem:[%s7978_s0 + $0x20] sm:$0xff]  ;;  %v6875_v38 = vpack.c.bf16 %v452_v37, %v448_v36  ;;  %v456_v43 = vld [vmem:[#allocation8 + $0x58] sm:$0xff]  ;;  %v459_v47 = vld [vmem:[#allocation8 + $0x70] sm:$0xff] }
  0x75   :  { %257 = vmatmul.mubr.f32.gmra.mrb[4].mxu1 %v6828_v9  ;;  %5092 = vmatprep.subr.bf16.mxu0 %v6769_v35  ;;  %v5005_v35 = vpack.c.bf16 %v132_v12, %v128_v11  ;;  %v464_v49 = vld [vmem:[#allocation8 + $0x98] sm:$0xff]  ;;  %v463_v51 = vld [vmem:[#allocation8 + $0x90] sm:$0xff] }
  0x76   :  { %4998 = vmatpush1.bf16.msra.mxu1 %v4997_v2  ;;  %262 = vmatprep.mubr.f32.mxu1 %v7992_v0  ;;  %v468_v50 = vld [vmem:[#allocation8 + $0xb8] sm:$0xff]  ;;  %v467_v53 = vld [vmem:[#allocation8 + $0xb0] sm:$0xff] }
  0x77   :  { %5000 = vmatprep.subr.bf16.mxu1 %v4999_v3  ;;  %v472_v54 = vld [vmem:[#allocation8 + $0xd8] sm:$0xff]  ;;  %v471_v58 = vld [vmem:[#allocation8 + $0xd0] sm:$0xff] }
  0x78   :  { %5094 = vmatpush1.bf16.msra.mxu0 %v6772_v39  ;;  %v6855_v39 = vld [vmem:[%s7978_s0 + $0x28] sm:$0xff]  ;;  %v476_v55 = vld [vmem:[#allocation8 + $0xf8] sm:$0xff]  ;;  %v475_v59 = vld [vmem:[#allocation8 + $0xf0] sm:$0xff] }
  0x79   :  { %263 = vmatmul.mubr.f32.gmra.mrb[6].mxu1 %v6837_v22  ;;  %5096 = vmatprep.subr.bf16.mxu0 %v6775_v44  ;;  %v5009_v44 = vpack.c.bf16 %v140_v19, %v136_v18  ;;  %v480_v60 = vld [vmem:[#allocation8 + $0x118] sm:$0xff]  ;;  %v479_v63 = vld [vmem:[#allocation8 + $0x110] sm:$0xff] }
  0x7a   :  { %5002 = vmatpush1.bf16.msra.mxu1 %v5001_v8  ;;  %268 = vmatprep.mubr.f32.mxu1 %v7992_v0  ;;  %v484_v61 = vld [vmem:[#allocation8 + $0x138] sm:$0xff]  ;;  %v483_v2 = vld [vmem:[#allocation8 + $0x130] sm:$0xff] }
  0x7b   :  { %5004 = vmatprep.subr.bf16.mxu1 %v5003_v10  ;;  %v6909_v62 = vpack.c.bf16 %v484_v61, %v480_v60  ;;  %v488_v3 = vld [vmem:[#allocation8 + $0x158] sm:$0xff]  ;;  %v487_v13 = vld [vmem:[#allocation8 + $0x150] sm:$0xff] }
  0x7c   :  { %5098 = vmatpush1.bf16.msra.mxu0 %v6778_v52  ;;  %v6864_v52 = vld [vmem:[%s7978_s0 + $0x30] sm:$0xff]  ;;  %v492_v4 = vld [vmem:[#allocation8 + $0x178] sm:$0xff] }
  0x7d   :  { %269 = vmatmul.mubr.f32.gmra.mrb[8].mxu1 %v6846_v26  ;;  %5100 = vmatprep.subr.bf16.mxu0 %v6781_v57  ;;  %v5013_v57 = vpack.c.bf16 %v148_v27, %v144_v25  ;;  %v6917_v5 = vpack.c.bf16 %v492_v4, %v488_v3  ;;  %v491_v7 = vld [vmem:[#allocation8 + $0x170] sm:$0xff]  ;;  %v496_v8 = vld [vmem:[#allocation8 + $0x198] sm:$0xff] }
  0x7e   :  { %5006 = vmatpush1.bf16.msra.mxu1 %v5005_v35  ;;  %274 = vmatprep.mubr.f32.mxu1 %v7992_v0  ;;  %v500_v10 = vld [vmem:[#allocation8 + $0x1b8] sm:$0xff]  ;;  %v495_v12 = vld [vmem:[#allocation8 + $0x190] sm:$0xff] }
  0x7f   :  { %5008 = vmatprep.subr.bf16.mxu1 %v5007_v17  ;;  %v6925_v11 = vpack.c.bf16 %v500_v10, %v496_v8  ;;  %v499_v14 = vld [vmem:[#allocation8 + $0x1b0] sm:$0xff]  ;;  %v504_v16 = vld [vmem:[#allocation8 + $0x1d8] sm:$0xff] }
  0x80   :  { %5102 = vmatpush1.bf16.msra.mxu0 %v6784_v1  ;;  %v6873_v1 = vld [vmem:[%s7978_s0 + $0x38] sm:$0xff]  ;;  %v503_v18 = vld [vmem:[#allocation8 + $0x1d0] sm:$0xff] }
  0x81   :  { %275 = vmatmul.mubr.f32.gmra.mrb[10].mxu1 %v6855_v39  ;;  %5104 = vmatprep.subr.bf16.mxu0 %v6787_v6  ;;  %v5017_v6 = vpack.c.bf16 %v156_v33, %v152_v32  ;;  %v508_v35 = vld [vmem:[#allocation8 + $0x1f8] sm:$0xff]  ;;  %v507_v19 = vld [vmem:[#allocation8 + $0x1f0] sm:$0xff] }
  0x82   :  { %5010 = vmatpush1.bf16.msra.mxu1 %v5009_v44  ;;  %280 = vmatprep.mubr.f32.mxu1 %v7992_v0  ;;  %v6933_v17 = vpack.c.bf16 %v508_v35, %v504_v16  ;;  %v6938_v21 = vpack.c.bf16 %v507_v19, %v503_v18 }
  0x83   :  { %5012 = vmatprep.subr.bf16.mxu1 %v5011_v24  ;;  %v158_v24 = vld [vmem:[%s7980_s2] sm:$0xf] }
  0x84   :  { %5106 = vmatpush1.bf16.msra.mxu0 %v6790_v15  ;;  %v460_v15 = vld [vmem:[#allocation8 + $0x78] sm:$0xff] }
  0x85   :  { %281 = vmatmul.mubr.f32.gmra.mrb[12].mxu1 %v6864_v52  ;;  %5108 = vmatprep.subr.bf16.mxu0 %v6793_v20  ;;  %v6881_v20 = vpack.c.bf16 %v451_v42, %v447_v40  ;;  %v6884_v45 = vpack.c.bf16 %v460_v15, %v456_v43 }
  0x86   :  { %5014 = vmatpush1.bf16.msra.mxu1 %v5013_v57  ;;  %286 = vmatprep.mubr.f32.mxu1 %v7992_v0 }
  0x87   :  { %5016 = vmatprep.subr.bf16.mxu1 %v5015_v31 }
  0x88   :  { %5110 = vmatpush1.bf16.msra.mxu0 %v6796_v29  ;;  %v6890_v29 = vpack.c.bf16 %v459_v47, %v455_v46 }
  0x89   :  { %287 = vmatmul.mubr.f32.gmra.mrb[14].mxu1 %v6873_v1  ;;  %5112 = vmatprep.subr.bf16.mxu0 %v6799_v34  ;;  %v6893_v34 = vpack.c.bf16 %v468_v50, %v464_v49 }
  0x8a   :  { %5018 = vmatpush1.bf16.msra.mxu1 %v5017_v6  ;;  %357 = vmatprep.mubr.f32.mxu1 %v7992_v0 }
  0x8b   :  { %5052 = vmatprep.subr.bf16.mxu1 %v6875_v38 }
  0x8c   :  { %5114 = vmatpush1.bf16.msra.mxu0 %v6802_v41  ;;  %v6898_v41 = vpack.c.bf16 %v467_v53, %v463_v51 }
  0x8d   :  { %358 = vmatmul.mubr.f32.vlgmr.msra.gmra.mrb[16].mxu1 %v6808_v48  ;;  %v6901_v48 = vpack.c.bf16 %v476_v55, %v472_v54 }
  0x8e   :  { %5054 = vmatpush1.bf16.msra.mxu1 %v6881_v20  ;;  %363 = vmatprep.mubr.f32.mxu1 %v7992_v0 }
  0x8f   :  { %5056 = vmatprep.subr.bf16.mxu1 %v6884_v45 }
  0x91   :  { %364 = vmatmul.mubr.f32.gmra.mrb[18].mxu1 %v6817_v56  ;;  %v6906_v56 = vpack.c.bf16 %v475_v59, %v471_v58 }
  0x92   :  { %5058 = vmatpush1.bf16.msra.mxu1 %v6890_v29  ;;  %369 = vmatprep.mubr.f32.mxu1 %v7992_v0 }
  0x93   :  { %5060 = vmatprep.subr.bf16.mxu1 %v6893_v34 }
  0x95   :  { %370 = vmatmul.mubr.f32.gmra.mrb[20].mxu1 %v6828_v9  ;;  %v6914_v9 = vpack.c.bf16 %v483_v2, %v479_v63 }
  0x96   :  { %5062 = vmatpush1.bf16.msra.mxu1 %v6898_v41  ;;  %375 = vmatprep.mubr.f32.mxu1 %v7992_v0 }
  0x97   :  { %5064 = vmatprep.subr.bf16.mxu1 %v6901_v48 }
  0x99   :  { %376 = vmatmul.mubr.f32.gmra.mrb[22].mxu1 %v6837_v22  ;;  %v6922_v22 = vpack.c.bf16 %v491_v7, %v487_v13 }
  0x9a   :  { %5066 = vmatpush1.bf16.msra.mxu1 %v6906_v56  ;;  %381 = vmatprep.mubr.f32.mxu1 %v7992_v0 }
  0x9b   :  { %5068 = vmatprep.subr.bf16.mxu1 %v6909_v62 }
  0x9d   :  { %382 = vmatmul.mubr.f32.gmra.mrb[24].mxu1 %v6846_v26  ;;  %v6930_v26 = vpack.c.bf16 %v499_v14, %v495_v12 }
  0x9e   :  { %5070 = vmatpush1.bf16.msra.mxu1 %v6914_v9  ;;  %387 = vmatprep.mubr.f32.mxu1 %v7992_v0 }
  0x9f   :  { %5072 = vmatprep.subr.bf16.mxu1 %v6917_v5 }
  0xa1   :  { %388 = vmatmul.mubr.f32.gmra.mrb[26].mxu1 %v6855_v39  ;;  %v6963_v39 = vshrl.u32 %v160_v23, 7 }
  0xa2   :  { %5074 = vmatpush1.bf16.msra.mxu1 %v6922_v22  ;;  %393 = vmatprep.mubr.f32.mxu1 %v7992_v0 }
  0xa3   :  { %5076 = vmatprep.subr.bf16.mxu1 %v6925_v11  ;;  %v7991_v44 = vsub.s32 0, %v6963_v39  ;;  %v7990_v25 = vsub.s32 1, %v6963_v39  ;;  %v7988_v18 = vsub.s32 2, %v6963_v39  ;;  %v7989_v23 = vsub.s32 3, %v6963_v39 }
  0xa5   :  { %394 = vmatmul.mubr.f32.gmra.mrb[28].mxu1 %v6864_v52  ;;  %v163_v27 = vrot.slane %v158_v24, %v7991_v44  ;;  %v167_v28 = vrot.slane %v158_v24, %v7990_v25 }
  0xa6   :  { %5078 = vmatpush1.bf16.msra.mxu1 %v6930_v26  ;;  %399 = vmatprep.mubr.f32.mxu1 %v7992_v0 }
  0xa7   :  { %5080 = vmatprep.subr.bf16.mxu1 %v6933_v17 }
  0xa9   :  { %400 = vmatmul.mubr.f32.gmra.mrb[30].mxu1 %v6873_v1 }
  0xaa   :  { %5082 = vmatpush1.bf16.msra.mxu1 %v6938_v21  ;;  %644 = vmatprep.mubr.f32.mxu1 %v7992_v0 }
  0xab   :  { %5116 = vmatprep.subr.bf16.mxu1 %v6875_v38 }
  0xad   :  { %645 = vmatmul.mubr.f32.vlgmr.msra.gmra.mrb[16].mxu1 %v7992_v0 }
  0xae   :  { %5118 = vmatpush1.bf16.msra.mxu1 %v6881_v20  ;;  %887 = vmatprep.mubr.f32.mxu1 %v7992_v0 }
  0xaf   :  { %5120 = vmatprep.subr.bf16.mxu1 %v6884_v45 }
  0xb2   :  { %5122 = vmatpush1.bf16.msra.mxu1 %v6890_v29 }
  0xb3   :  { %5124 = vmatprep.subr.bf16.mxu1 %v6893_v34 }
  0xb6   :  { %5126 = vmatpush1.bf16.msra.mxu1 %v6898_v41 }
  0xb7   :  { %5128 = vmatprep.subr.bf16.mxu1 %v6901_v48 }
  0xba   :  { %5130 = vmatpush1.bf16.msra.mxu1 %v6906_v56 }
  0xbb   :  { %5132 = vmatprep.subr.bf16.mxu1 %v6909_v62 }
  0xbe   :  { %5134 = vmatpush1.bf16.msra.mxu1 %v6914_v9 }
  0xbf   :  { %5136 = vmatprep.subr.bf16.mxu1 %v6917_v5 }
  0xc2   :  { %5138 = vmatpush1.bf16.msra.mxu1 %v6922_v22 }
  0xc3   :  { %5140 = vmatprep.subr.bf16.mxu1 %v6925_v11 }
  0xc6   :  { %5142 = vmatpush1.bf16.msra.mxu1 %v6930_v26 }
  0xc7   :  { %5144 = vmatprep.subr.bf16.mxu1 %v6933_v17 }
  0xca   :  { %5146 = vmatpush1.bf16.msra.mxu1 %v6938_v21 }
  0xcb   :  { %5180 = vmatprep.subr.bf16.mxu1 %v6875_v38 }
 0x140   :  { %v246_v30 = vpop.f32.mrb[0].mxu1 }
 0x141   :  { %v247_v52 = vadd.f32 %v246_v30, %v163_v27  ;;  %v248_v57 = vpop.f32.mrb[1].mxu1 }
 0x142   :  { %v575_v31 = vpop.f32.mrb[0].mxu0  ;;  %v249_v32 = vadd.f32 %v248_v57, %v167_v28  ;;  %v7006_v57 = vrot.slane %v158_v24, %v7988_v18 }
 0x143   :  { %v577_v33 = vpop.f32.mrb[1].mxu0  ;;  %v651_v36 = vadd.f32 %v575_v31, %v247_v52 }
 0x144   :  { %v652_v37 = vadd.f32 %v577_v33, %v249_v32  ;;  %v252_v1 = vpop.f32.mrb[2].mxu1 }
 0x145   :  { %v6974_v6 = vadd.f32 %v252_v1, %v163_v27  ;;  %v254_v40 = vpop.f32.mrb[3].mxu1  ;;  %v4838_v35 = vmul.f32 -1.442695, %v651_v36 }
 0x146   :  { %v6976_v42 = vadd.f32 %v254_v40, %v167_v28  ;;  %v4839_v16 = vmul.f32 -1.442695, %v652_v37 }
 0x148   :  { %v258_v43 = vpop.f32.mrb[4].mxu1  ;;  %6276 = vpow2.f32 %v4839_v16  ;;  %v935_v16 = vld [vmem:[#allocation8 + $0x20] sm:$0xff] }
 0x149   :  { %v6978_v15 = vadd.f32 %v258_v43, %v163_v27  ;;  %v260_v46 = vpop.f32.mrb[5].mxu1  ;;  %6278 = vpow2.f32 %v4838_v35 }
 0x14a   :  { %v6980_v47 = vadd.f32 %v260_v46, %v167_v28 }
 0x14c   :  { %v264_v49 = vpop.f32.mrb[6].mxu1 }
 0x14d   :  { %v6982_v50 = vadd.f32 %v264_v49, %v163_v27  ;;  %v266_v51 = vpop.f32.mrb[7].mxu1 }
 0x14e   :  { %v6984_v53 = vadd.f32 %v266_v51, %v167_v28 }
 0x150   :  { %v270_v54 = vpop.f32.mrb[8].mxu1 }
 0x151   :  { %v6986_v55 = vadd.f32 %v270_v54, %v163_v27  ;;  %v272_v58 = vpop.f32.mrb[9].mxu1 }
 0x152   :  { %v6988_v59 = vadd.f32 %v272_v58, %v167_v28  ;;  %v6277_v19 = vpop.eup %6276 }
 0x153   :  { %v6279_v30 = vpop.eup %6278  ;;  %v664_v52 = vadd.f32 1.0, %v6277_v19  ;;  %v940_v19 = vld [vmem:[#allocation8 + $0x48] sm:$0xff] }
 0x154   :  { %v276_v60 = vpop.f32.mrb[10].mxu1 }
 0x155   :  { %v6990_v61 = vadd.f32 %v276_v60, %v163_v27  ;;  %v278_v63 = vpop.f32.mrb[11].mxu1  ;;  %6280 = vrcp.f32 %v664_v52 }
 0x156   :  { %v6992_v2 = vadd.f32 %v278_v63, %v167_v28 }
 0x158   :  { %v282_v3 = vpop.f32.mrb[12].mxu1 }
 0x159   :  { %v6994_v4 = vadd.f32 %v282_v3, %v163_v27  ;;  %v284_v13 = vpop.f32.mrb[13].mxu1  ;;  %v932_v3 = vld [vmem:[#allocation8 + $0x8] sm:$0xff] }
 0x15a   :  { %v6996_v7 = vadd.f32 %v284_v13, %v167_v28  ;;  %v936_v13 = vld [vmem:[#allocation8 + $0x28] sm:$0xff] }
 0x15c   :  { %v288_v8 = vpop.f32.mrb[14].mxu1 }
 0x15d   :  { %v6998_v10 = vadd.f32 %v288_v8, %v163_v27  ;;  %v290_v12 = vpop.f32.mrb[15].mxu1  ;;  %v658_v27 = vadd.f32 1.0, %v6279_v30  ;;  %v7039_v8 = vpack.c.bf16 %v936_v13, %v932_v3  ;;  %v944_v30 = vld [vmem:[#allocation8 + $0x68] sm:$0xff]  ;;  %v963_v13 = vld [vmem:[#allocation8 + $0x100] sm:$0xff] }
 0x15e   :  { %v7000_v14 = vadd.f32 %v290_v12, %v167_v28  ;;  %v7010_v28 = vrot.slane %v158_v24, %v7989_v23  ;;  %v931_v12 = vld [vmem:[#allocation8] sm:$0xff]  ;;  %v7045_v52 = vpack.c.bf16 %v944_v30, %v940_v19  ;;  %v972_v19 = vld [vmem:[#allocation8 + $0x148] sm:$0xff] }
 0x15f   :  { %6282 = vrcp.f32 %v658_v27  ;;  %v6281_v1 = vpop.eup %6280  ;;  %v7041_v35 = vpack.c.bf16 %v935_v16, %v931_v12  ;;  %5148 = vmatprep.subr.bf16.mxu0 %v7039_v8  ;;  %v939_v27 = vld [vmem:[#allocation8 + $0x40] sm:$0xff]  ;;  %v976_v30 = vld [vmem:[#allocation8 + $0x168] sm:$0xff] }
 0x160   :  { %v675_v46 = vmul.f32 0.0, %v6281_v1  ;;  %v967_v12 = vld [vmem:[#allocation8 + $0x120] sm:$0xff] }
 0x161   :  { %v7065_v16 = vpack.c.bf16 %v967_v12, %v963_v13  ;;  %v987_v12 = vld [vmem:[#allocation8 + $0x1c0] sm:$0xff] }
 0x169   :  { %v6283_v40 = vpop.eup %6282 }
 0x180   :  { %v646_v31 = vpop.f32.mrb[16].mxu1 }
 0x181   :  { %v6171_v32 = vadd.f32 %v646_v31, %v7006_v57  ;;  %v648_v33 = vpop.f32.mrb[17].mxu1 }
 0x182   :  { %v6172_v36 = vadd.f32 %v648_v33, %v7010_v28 }
 0x183   :  { %6284 = vtanh.f32 %v6171_v32  ;;  %v952_v32 = vld [vmem:[#allocation8 + $0xa8] sm:$0xff] }
 0x184   :  { %v4840_v37 = vmul.f32 -1.442695, %v6172_v36  ;;  %v947_v36 = vld [vmem:[#allocation8 + $0x80] sm:$0xff] }
 0x186   :  { %6286 = vpow2.f32 %v4840_v37  ;;  %v951_v37 = vld [vmem:[#allocation8 + $0xa0] sm:$0xff] }
 0x187   :  { %v7053_v1 = vpack.c.bf16 %v951_v37, %v947_v36  ;;  %v984_v36 = vld [vmem:[#allocation8 + $0x1a8] sm:$0xff] }
 0x18d   :  { %v6285_v43 = vpop.eup %6284 }
 0x18e   :  { %v676_v49 = vmul.f32 %v6285_v43, %v6283_v40  ;;  %v956_v40 = vld [vmem:[#allocation8 + $0xc8] sm:$0xff] }
 0x18f   :  { %v960_v43 = vld [vmem:[#allocation8 + $0xe8] sm:$0xff] }
 0x190   :  { %v6287_v51 = vpop.eup %6286  ;;  %v7014_v54 = vadd.f32 %v676_v49, %v675_v46  ;;  %v7057_v46 = vpack.c.bf16 %v960_v43, %v956_v40  ;;  %v955_v49 = vld [vmem:[#allocation8 + $0xc0] sm:$0xff] }
 0x191   :  { %v671_v24 = vadd.f32 1.0, %v6287_v51  ;;  %v959_v51 = vld [vmem:[#allocation8 + $0xe0] sm:$0xff] }
 0x192   :  { %6288 = vtanh.f32 %v7014_v54  ;;  %v979_v43 = vld [vmem:[#allocation8 + $0x180] sm:$0xff] }
 0x193   :  { %6290 = vrcp.f32 %v671_v24  ;;  %v7059_v24 = vpack.c.bf16 %v959_v51, %v955_v49  ;;  %v983_v49 = vld [vmem:[#allocation8 + $0x1a0] sm:$0xff]  ;;  %v988_v51 = vld [vmem:[#allocation8 + $0x1c8] sm:$0xff] }
 0x19c   :  { %v6289_v58 = vpop.eup %6288 }
 0x19d   :  { %v6291_v60 = vpop.eup %6290 }
 0x19e   :  { %v7017_v63 = vmul.f32 %v6291_v60, %v6289_v58  ;;  %v964_v58 = vld [vmem:[#allocation8 + $0x108] sm:$0xff] }
 0x19f   :  { %v968_v60 = vld [vmem:[#allocation8 + $0x128] sm:$0xff] }
 0x1a0   :  { %817 = vmatmul.mubr.f32.vlgmr.msra.gmra.mrb[2].mxu0 %v7017_v63  ;;  %888 = vmatmul.mubr.f32.vlgmr.msra.gmra.mrb[18].mxu1 %v7017_v63  ;;  %v7063_v3 = vpack.c.bf16 %v968_v60, %v964_v58  ;;  %v992_v58 = vld [vmem:[#allocation8 + $0x1e8] sm:$0xff]  ;;  %v7077_v60 = vpack.c.bf16 %v983_v49, %v979_v43 }
 0x1a1   :  { %5182 = vmatpush1.bf16.msra.mxu1 %v6881_v20  ;;  %1059 = vmatprep.mubr.f32.mxu0 %v7992_v0  ;;  %v7080_v13 = vpack.c.bf16 %v992_v58, %v988_v51 }
 0x1a2   :  { %5184 = vmatprep.subr.bf16.mxu1 %v6884_v45  ;;  %1130 = vmatprep.mubr.f32.mxu1 %v7992_v0 }
 0x1a3   :  { %5150 = vmatpush1.bf16.msra.mxu0 %v7041_v35 }
 0x1a4   :  { %5152 = vmatprep.subr.bf16.mxu0 %v7045_v52 }
 0x1a5   :  { %5186 = vmatpush1.bf16.msra.mxu1 %v6890_v29 }
 0x1a6   :  { %5188 = vmatprep.subr.bf16.mxu1 %v6893_v34 }
 0x1a9   :  { %5190 = vmatpush1.bf16.msra.mxu1 %v6898_v41 }
 0x1aa   :  { %5192 = vmatprep.subr.bf16.mxu1 %v6901_v48 }
 0x1ad   :  { %5194 = vmatpush1.bf16.msra.mxu1 %v6906_v56 }
 0x1ae   :  { %5196 = vmatprep.subr.bf16.mxu1 %v6909_v62 }
 0x1b1   :  { %5198 = vmatpush1.bf16.msra.mxu1 %v6914_v9 }
 0x1b2   :  { %5200 = vmatprep.subr.bf16.mxu1 %v6917_v5 }
 0x1b5   :  { %5202 = vmatpush1.bf16.msra.mxu1 %v6922_v22 }
 0x1b6   :  { %5204 = vmatprep.subr.bf16.mxu1 %v6925_v11 }
 0x1b9   :  { %5206 = vmatpush1.bf16.msra.mxu1 %v6930_v26 }
 0x1ba   :  { %5208 = vmatprep.subr.bf16.mxu1 %v6933_v17 }
 0x1bd   :  { %5210 = vmatpush1.bf16.msra.mxu1 %v6938_v21  ;;  %v943_v21 = vld [vmem:[#allocation8 + $0x60] sm:$0xff] }
 0x1be   :  { %5244 = vmatprep.subr.bf16.mxu1 %v6875_v38  ;;  %v7047_v31 = vpack.c.bf16 %v943_v21, %v939_v27  ;;  %v948_v38 = vld [vmem:[#allocation8 + $0x88] sm:$0xff]  ;;  %v971_v27 = vld [vmem:[#allocation8 + $0x140] sm:$0xff]  ;;  %v7069_v21 = vpack.c.bf16 %v976_v30, %v972_v19 }
 0x1bf   :  { %v7051_v33 = vpack.c.bf16 %v952_v32, %v948_v38  ;;  %v975_v38 = vld [vmem:[#allocation8 + $0x160] sm:$0xff]  ;;  %v980_v32 = vld [vmem:[#allocation8 + $0x188] sm:$0xff] }
 0x1c0   :  { %5154 = vmatpush1.bf16.msra.mxu0 %v7047_v31  ;;  %v7071_v37 = vpack.c.bf16 %v975_v38, %v971_v27  ;;  %v7073_v40 = vpack.c.bf16 %v984_v36, %v980_v32  ;;  %v991_v19 = vld [vmem:[#allocation8 + $0x1e0] sm:$0xff] }
 0x1c1   :  { %5156 = vmatprep.subr.bf16.mxu0 %v7051_v33  ;;  %v7083_v30 = vpack.c.bf16 %v991_v19, %v987_v12 }
 0x1c4   :  { %5158 = vmatpush1.bf16.msra.mxu0 %v7053_v1 }
 0x1c5   :  { %5160 = vmatprep.subr.bf16.mxu0 %v7057_v46 }
 0x1c8   :  { %5162 = vmatpush1.bf16.msra.mxu0 %v7059_v24 }
 0x1c9   :  { %5164 = vmatprep.subr.bf16.mxu0 %v7063_v3 }
 0x1cc   :  { %5166 = vmatpush1.bf16.msra.mxu0 %v7065_v16 }
 0x1cd   :  { %5168 = vmatprep.subr.bf16.mxu0 %v7069_v21 }
 0x1d0   :  { %5170 = vmatpush1.bf16.msra.mxu0 %v7071_v37 }
 0x1d1   :  { %5172 = vmatprep.subr.bf16.mxu0 %v7073_v40 }
 0x1d4   :  { %5174 = vmatpush1.bf16.msra.mxu0 %v7077_v60 }
 0x1d5   :  { %5176 = vmatprep.subr.bf16.mxu0 %v7080_v13 }
 0x1d8   :  { %5178 = vmatpush1.bf16.msra.mxu0 %v7083_v30 }
 0x1d9   :  { %5212 = vmatprep.subr.bf16.mxu0 %v7039_v8 }
 0x273   :  { %v818_v27 = vpop.f32.mrb[2].mxu0  ;;  %v889_v38 = vpop.f32.mrb[18].mxu1 }
 0x274   :  { %v894_v32 = vadd.f32 %v818_v27, %v6974_v6  ;;  %v820_v36 = vpop.f32.mrb[3].mxu0  ;;  %v891_v43 = vpop.f32.mrb[19].mxu1  ;;  %v6173_v18 = vadd.f32 %v889_v38, %v7006_v57 }
 0x275   :  { %v895_v49 = vadd.f32 %v820_v36, %v6976_v42  ;;  %v6174_v12 = vadd.f32 %v891_v43, %v7010_v28 }
 0x276   :  { %v4841_v51 = vmul.f32 -1.442695, %v894_v32 }
 0x277   :  { %v4842_v58 = vmul.f32 -1.442695, %v895_v49  ;;  %v4843_v19 = vmul.f32 -1.442695, %v6174_v12 }
 0x278   :  { %6292 = vpow2.f32 %v4841_v51 }
 0x279   :  { %6294 = vpow2.f32 %v4842_v58 }
 0x27a   :  { %6296 = vpow2.f32 %v4843_v19 }
 0x27b   :  { %6298 = vtanh.f32 %v6173_v18 }
 0x282   :  { %v6293_v23 = vpop.eup %6292 }
 0x283   :  { %v6295_v25 = vpop.eup %6294  ;;  %v901_v44 = vadd.f32 1.0, %v6293_v23 }
 0x284   :  { %v907_v0 = vadd.f32 1.0, %v6295_v25  ;;  %v6297_v6 = vpop.eup %6296 }
 0x285   :  { %6300 = vrcp.f32 %v901_v44  ;;  %v6299_v27 = vpop.eup %6298  ;;  %v914_v49 = vadd.f32 1.0, %v6297_v6 }
 0x286   :  { %6302 = vrcp.f32 %v907_v0  ;;  %v7994_v0 = vmov 0.0  }
 0x287   :  { %6304 = vrcp.f32 %v914_v49 }
 0x28f   :  { %v6301_v42 = vpop.eup %6300 }
 0x290   :  { %v6303_v32 = vpop.eup %6302  ;;  %v919_v36 = vmul.f32 %v6301_v42, %v6299_v27 }
 0x291   :  { %v918_v51 = vmul.f32 %v6303_v32, %v7014_v54  ;;  %v6305_v38 = vpop.eup %6304 }
 0x293   :  { %v7093_v43 = vadd.f32 %v919_v36, %v918_v51 }
 0x295   :  { %6306 = vtanh.f32 %v7093_v43 }
 0x29f   :  { %v6307_v23 = vpop.eup %6306 }
 0x2a0   :  { %v7096_v58 = vmul.f32 %v6307_v23, %v6305_v38  ;;  %v1424_v38 = vld [vmem:[#allocation8 + $0x38] sm:$0xff] }
 0x2a2   :  { %1060 = vmatmul.mubr.f32.vlgmr.msra.gmra.mrb[4].mxu0 %v7096_v58  ;;  %1131 = vmatmul.mubr.f32.vlgmr.msra.gmra.mrb[20].mxu1 %v7096_v58 }
 0x2a3   :  { %5214 = vmatpush1.bf16.msra.mxu0 %v7041_v35  ;;  %5246 = vmatpush1.bf16.msra.mxu1 %v6881_v20  ;;  %v1232_v20 = vld [vmem:[#allocation8 + $0x1d0] sm:$0xff] }
 0x2a4   :  { %5216 = vmatprep.subr.bf16.mxu0 %v7045_v52  ;;  %5248 = vmatprep.subr.bf16.mxu1 %v6884_v45  ;;  %v1236_v45 = vld [vmem:[#allocation8 + $0x1f0] sm:$0xff] }
 0x2a5   :  { %1302 = vmatprep.mubr.f32.mxu0 %v7994_v0  ;;  %1373 = vmatprep.mubr.f32.mxu1 %v7994_v0 }
 0x2a7   :  { %5218 = vmatpush1.bf16.msra.mxu0 %v7047_v31  ;;  %5250 = vmatpush1.bf16.msra.mxu1 %v6890_v29  ;;  %v7132_v29 = vpack.c.bf16 %v1236_v45, %v1232_v20  ;;  %v1419_v20 = vld [vmem:[#allocation8 + $0x10] sm:$0xff] }
 0x2a8   :  { %5220 = vmatprep.subr.bf16.mxu0 %v7051_v33  ;;  %5252 = vmatprep.subr.bf16.mxu1 %v6893_v34  ;;  %v1423_v45 = vld [vmem:[#allocation8 + $0x30] sm:$0xff] }
 0x2ab   :  { %5222 = vmatpush1.bf16.msra.mxu0 %v7053_v1  ;;  %5254 = vmatpush1.bf16.msra.mxu1 %v6898_v41 }
 0x2ac   :  { %5224 = vmatprep.subr.bf16.mxu0 %v7057_v46  ;;  %5256 = vmatprep.subr.bf16.mxu1 %v6901_v48 }
 0x2af   :  { %5226 = vmatpush1.bf16.msra.mxu0 %v7059_v24  ;;  %5258 = vmatpush1.bf16.msra.mxu1 %v6906_v56 }
 0x2b0   :  { %5228 = vmatprep.subr.bf16.mxu0 %v7063_v3  ;;  %5260 = vmatprep.subr.bf16.mxu1 %v6909_v62 }
 0x2b3   :  { %5230 = vmatpush1.bf16.msra.mxu0 %v7065_v16  ;;  %5262 = vmatpush1.bf16.msra.mxu1 %v6914_v9 }
 0x2b4   :  { %5232 = vmatprep.subr.bf16.mxu0 %v7069_v21  ;;  %5264 = vmatprep.subr.bf16.mxu1 %v6917_v5 }
 0x2b7   :  { %5234 = vmatpush1.bf16.msra.mxu0 %v7071_v37  ;;  %5266 = vmatpush1.bf16.msra.mxu1 %v6922_v22 }
 0x2b8   :  { %5236 = vmatprep.subr.bf16.mxu0 %v7073_v40  ;;  %5268 = vmatprep.subr.bf16.mxu1 %v6925_v11 }
 0x2bb   :  { %5238 = vmatpush1.bf16.msra.mxu0 %v7077_v60  ;;  %5270 = vmatpush1.bf16.msra.mxu1 %v6930_v26 }
 0x2bc   :  { %5240 = vmatprep.subr.bf16.mxu0 %v7080_v13  ;;  %5272 = vmatprep.subr.bf16.mxu1 %v6933_v17 }
 0x2bf   :  { %5242 = vmatpush1.bf16.msra.mxu0 %v7083_v30  ;;  %5274 = vmatpush1.bf16.msra.mxu1 %v7132_v29 }
 0x2c0   :  { %5276 = vmatprep.subr.bf16.mxu0 %v7039_v8 }
 0x375   :  { %v1061_v34 = vpop.f32.mrb[4].mxu0  ;;  %v1132_v41 = vpop.f32.mrb[20].mxu1 }
 0x376   :  { %v1137_v48 = vadd.f32 %v1061_v34, %v6978_v15  ;;  %v1063_v56 = vpop.f32.mrb[5].mxu0  ;;  %v1134_v62 = vpop.f32.mrb[21].mxu1  ;;  %v6175_v17 = vadd.f32 %v1132_v41, %v7006_v57  ;;  %v7167_v34 = vpack.c.bf16 %v1423_v45, %v1419_v20  ;;  %v1428_v41 = vld [vmem:[#allocation8 + $0x58] sm:$0xff]  ;;  %v1459_v20 = vld [vmem:[#allocation8 + $0x150] sm:$0xff] }
 0x377   :  { %v1138_v9 = vadd.f32 %v1063_v56, %v6980_v47  ;;  %v6176_v11 = vadd.f32 %v1134_v62, %v7010_v28  ;;  %v1427_v62 = vld [vmem:[#allocation8 + $0x50] sm:$0xff] }
 0x378   :  { %v4844_v5 = vmul.f32 -1.442695, %v1137_v48  ;;  %v1432_v48 = vld [vmem:[#allocation8 + $0x78] sm:$0xff] }
 0x379   :  { %v4845_v22 = vmul.f32 -1.442695, %v1138_v9  ;;  %v4846_v26 = vmul.f32 -1.442695, %v6176_v11  ;;  %v7171_v56 = vpack.c.bf16 %v1432_v48, %v1428_v41  ;;  %v1431_v9 = vld [vmem:[#allocation8 + $0x70] sm:$0xff]  ;;  %v1468_v48 = vld [vmem:[#allocation8 + $0x198] sm:$0xff] }
 0x37a   :  { %6308 = vpow2.f32 %v4844_v5  ;;  %v7173_v5 = vpack.c.bf16 %v1431_v9, %v1427_v62  ;;  %v1463_v41 = vld [vmem:[#allocation8 + $0x170] sm:$0xff]  ;;  %v1472_v62 = vld [vmem:[#allocation8 + $0x1b8] sm:$0xff] }
 0x37b   :  { %6310 = vpow2.f32 %v4845_v22  ;;  %v1440_v22 = vld [vmem:[#allocation8 + $0xb8] sm:$0xff]  ;;  %v7197_v9 = vpack.c.bf16 %v1463_v41, %v1459_v20 }
 0x37c   :  { %6312 = vpow2.f32 %v4846_v26  ;;  %v1435_v26 = vld [vmem:[#allocation8 + $0x90] sm:$0xff] }
 0x37d   :  { %6314 = vtanh.f32 %v6175_v17  ;;  %v1439_v17 = vld [vmem:[#allocation8 + $0xb0] sm:$0xff] }
 0x384   :  { %v6309_v44 = vpop.eup %6308 }
 0x385   :  { %v6311_v25 = vpop.eup %6310  ;;  %v1144_v18 = vadd.f32 1.0, %v6309_v44  ;;  %v7179_v44 = vpack.c.bf16 %v1439_v17, %v1435_v26  ;;  %v1471_v26 = vld [vmem:[#allocation8 + $0x1b0] sm:$0xff]  ;;  %v1476_v17 = vld [vmem:[#allocation8 + $0x1d8] sm:$0xff] }
 0x386   :  { %v1150_v54 = vadd.f32 1.0, %v6311_v25  ;;  %v6313_v15 = vpop.eup %6312  ;;  %v1444_v25 = vld [vmem:[#allocation8 + $0xd8] sm:$0xff] }
 0x387   :  { %6316 = vrcp.f32 %v1144_v18  ;;  %v6315_v12 = vpop.eup %6314  ;;  %v1157_v27 = vadd.f32 1.0, %v6313_v15  ;;  %v1448_v18 = vld [vmem:[#allocation8 + $0xf8] sm:$0xff]  ;;  %v1443_v15 = vld [vmem:[#allocation8 + $0xd0] sm:$0xff] }
 0x388   :  { %6318 = vrcp.f32 %v1150_v54  ;;  %v7183_v54 = vpack.c.bf16 %v1448_v18, %v1444_v25  ;;  %v1480_v25 = vld [vmem:[#allocation8 + $0x1f8] sm:$0xff] }
 0x389   :  { %6320 = vrcp.f32 %v1157_v27 }
 0x391   :  { %v6317_v47 = vpop.eup %6316 }
 0x392   :  { %v6319_v19 = vpop.eup %6318  ;;  %v1162_v6 = vmul.f32 %v6317_v47, %v6315_v12  ;;  %v1447_v12 = vld [vmem:[#allocation8 + $0xf0] sm:$0xff] }
 0x393   :  { %v1161_v42 = vmul.f32 %v6319_v19, %v7093_v43  ;;  %v6321_v36 = vpop.eup %6320  ;;  %v1420_v43 = vld [vmem:[#allocation8 + $0x18] sm:$0xff]  ;;  %v7185_v47 = vpack.c.bf16 %v1447_v12, %v1443_v15  ;;  %v7206_v15 = vpack.c.bf16 %v1480_v25, %v1476_v17 }
 0x394   :  { %v7165_v23 = vpack.c.bf16 %v1424_v38, %v1420_v43  ;;  %v1452_v19 = vld [vmem:[#allocation8 + $0x118] sm:$0xff] }
 0x395   :  { %v7140_v32 = vadd.f32 %v1162_v6, %v1161_v42  ;;  %v1456_v6 = vld [vmem:[#allocation8 + $0x138] sm:$0xff]  ;;  %v1451_v42 = vld [vmem:[#allocation8 + $0x110] sm:$0xff] }
 0x396   :  { %5308 = vmatprep.subr.bf16.mxu1 %v7165_v23  ;;  %v7189_v27 = vpack.c.bf16 %v1456_v6, %v1452_v19  ;;  %v1460_v43 = vld [vmem:[#allocation8 + $0x158] sm:$0xff] }
 0x397   :  { %6322 = vtanh.f32 %v7140_v32  ;;  %v1464_v38 = vld [vmem:[#allocation8 + $0x178] sm:$0xff] }
 0x398   :  { %v7195_v45 = vpack.c.bf16 %v1464_v38, %v1460_v43 }
 0x3a1   :  { %v6323_v49 = vpop.eup %6322 }
 0x3a2   :  { %v7143_v51 = vmul.f32 %v6323_v49, %v6321_v36  ;;  %v1455_v36 = vld [vmem:[#allocation8 + $0x130] sm:$0xff] }
 0x3a3   :  { %v7191_v49 = vpack.c.bf16 %v1455_v36, %v1451_v42 }
 0x3a4   :  { %1303 = vmatmul.mubr.f32.vlgmr.msra.gmra.mrb[6].mxu0 %v7143_v51  ;;  %1374 = vmatmul.mubr.f32.vlgmr.msra.gmra.mrb[22].mxu1 %v7143_v51 }
 0x3a5   :  { %5278 = vmatpush1.bf16.msra.mxu0 %v7041_v35  ;;  %1545 = vmatprep.mubr.f32.mxu0 %v7994_v0 }
 0x3a6   :  { %5280 = vmatprep.subr.bf16.mxu0 %v7045_v52  ;;  %1616 = vmatprep.mubr.f32.mxu1 %v7994_v0 }
 0x3a7   :  { %5310 = vmatpush1.bf16.msra.mxu1 %v7167_v34 }
 0x3a8   :  { %5312 = vmatprep.subr.bf16.mxu1 %v7171_v56 }
 0x3a9   :  { %5282 = vmatpush1.bf16.msra.mxu0 %v7047_v31 }
 0x3aa   :  { %5284 = vmatprep.subr.bf16.mxu0 %v7051_v33 }
 0x3ab   :  { %5314 = vmatpush1.bf16.msra.mxu1 %v7173_v5 }
 0x3ad   :  { %5286 = vmatpush1.bf16.msra.mxu0 %v7053_v1 }
 0x3ae   :  { %5288 = vmatprep.subr.bf16.mxu0 %v7057_v46 }
 0x3b1   :  { %5290 = vmatpush1.bf16.msra.mxu0 %v7059_v24 }
 0x3b2   :  { %5292 = vmatprep.subr.bf16.mxu0 %v7063_v3 }
 0x3b5   :  { %5294 = vmatpush1.bf16.msra.mxu0 %v7065_v16 }
 0x3b6   :  { %5296 = vmatprep.subr.bf16.mxu0 %v7069_v21 }
 0x3b9   :  { %5298 = vmatpush1.bf16.msra.mxu0 %v7071_v37 }
 0x3ba   :  { %5300 = vmatprep.subr.bf16.mxu0 %v7073_v40 }
 0x3bd   :  { %5302 = vmatpush1.bf16.msra.mxu0 %v7077_v60 }
 0x3be   :  { %5304 = vmatprep.subr.bf16.mxu0 %v7080_v13 }
 0x3c1   :  { %5306 = vmatpush1.bf16.msra.mxu0 %v7083_v30 }
 0x3c2   :  { %5340 = vmatprep.subr.bf16.mxu0 %v7039_v8  ;;  %v1436_v8 = vld [vmem:[#allocation8 + $0x98] sm:$0xff] }
 0x3c3   :  { %v7177_v11 = vpack.c.bf16 %v1440_v22, %v1436_v8  ;;  %v7199_v8 = vpack.c.bf16 %v1472_v62, %v1468_v48  ;;  %v1467_v22 = vld [vmem:[#allocation8 + $0x190] sm:$0xff] }
 0x3c4   :  { %v7203_v18 = vpack.c.bf16 %v1471_v26, %v1467_v22 }
 0x3c5   :  { %5316 = vmatprep.subr.bf16.mxu1 %v7177_v11 }
 0x3c6   :  { %5318 = vmatpush1.bf16.msra.mxu1 %v7179_v44 }
 0x3c7   :  { %5320 = vmatprep.subr.bf16.mxu1 %v7183_v54 }
 0x3ca   :  { %5322 = vmatpush1.bf16.msra.mxu1 %v7185_v47 }
 0x3cb   :  { %5324 = vmatprep.subr.bf16.mxu1 %v7189_v27 }
 0x3ce   :  { %5326 = vmatpush1.bf16.msra.mxu1 %v7191_v49 }
 0x3cf   :  { %5328 = vmatprep.subr.bf16.mxu1 %v7195_v45 }
 0x3d2   :  { %5330 = vmatpush1.bf16.msra.mxu1 %v7197_v9 }
 0x3d3   :  { %5332 = vmatprep.subr.bf16.mxu1 %v7199_v8 }
 0x3d6   :  { %5334 = vmatpush1.bf16.msra.mxu1 %v7203_v18 }
 0x3d7   :  { %5336 = vmatprep.subr.bf16.mxu1 %v7206_v15 }
 0x3da   :  { %5338 = vmatpush1.bf16.msra.mxu1 %v7132_v29 }
 0x3db   :  { %5372 = vmatprep.subr.bf16.mxu1 %v7165_v23 }
 0x477   :  { %v1304_v12 = vpop.f32.mrb[6].mxu0  ;;  %v1375_v19 = vpop.f32.mrb[22].mxu1 }
 0x478   :  { %v1380_v6 = vadd.f32 %v1304_v12, %v6982_v50  ;;  %v1306_v42 = vpop.f32.mrb[7].mxu0  ;;  %v1377_v36 = vpop.f32.mrb[23].mxu1  ;;  %v6177_v62 = vadd.f32 %v1375_v19, %v7006_v57 }
 0x479   :  { %v1381_v43 = vadd.f32 %v1306_v42, %v6984_v53  ;;  %v6178_v41 = vadd.f32 %v1377_v36, %v7010_v28 }
 0x47a   :  { %v4847_v38 = vmul.f32 -1.442695, %v1380_v6 }
 0x47b   :  { %v4848_v20 = vmul.f32 -1.442695, %v1381_v43  ;;  %v4849_v48 = vmul.f32 -1.442695, %v6178_v41 }
 0x47c   :  { %6324 = vpow2.f32 %v4847_v38 }
 0x47d   :  { %6326 = vpow2.f32 %v4848_v20 }
 0x47e   :  { %6328 = vpow2.f32 %v4849_v48 }
 0x47f   :  { %6330 = vtanh.f32 %v6177_v62 }
 0x486   :  { %v6325_v22 = vpop.eup %6324 }
 0x487   :  { %v6327_v26 = vpop.eup %6326  ;;  %v1387_v17 = vadd.f32 1.0, %v6325_v22 }
 0x488   :  { %v1393_v25 = vadd.f32 1.0, %v6327_v26  ;;  %v6329_v50 = vpop.eup %6328 }
 0x489   :  { %6332 = vrcp.f32 %v1387_v17  ;;  %v6331_v12 = vpop.eup %6330  ;;  %v1400_v43 = vadd.f32 1.0, %v6329_v50 }
 0x48a   :  { %6334 = vrcp.f32 %v1393_v25 }
 0x48b   :  { %6336 = vrcp.f32 %v1400_v43  ;;  %v1903_v43 = vld [vmem:[#allocation8] sm:$0xff] }
 0x493   :  { %v6333_v53 = vpop.eup %6332 }
 0x494   :  { %v6335_v6 = vpop.eup %6334  ;;  %v1405_v42 = vmul.f32 %v6333_v53, %v6331_v12  ;;  %v1904_v53 = vld [vmem:[#allocation8 + $0x8] sm:$0xff] }
 0x495   :  { %v1404_v38 = vmul.f32 %v6335_v6, %v7140_v32  ;;  %v6337_v19 = vpop.eup %6336  ;;  %v1908_v6 = vld [vmem:[#allocation8 + $0x28] sm:$0xff] }
 0x497   :  { %v7217_v36 = vadd.f32 %v1405_v42, %v1404_v38  ;;  %v5403_v42 = vpack.c.bf16 %v1908_v6, %v1904_v53  ;;  %v1907_v38 = vld [vmem:[#allocation8 + $0x20] sm:$0xff]  ;;  %v1952_v6 = vld [vmem:[#allocation8 + $0x188] sm:$0xff] }
 0x498   :  { %v1947_v53 = vld [vmem:[#allocation8 + $0x160] sm:$0xff] }
 0x499   :  { %6338 = vtanh.f32 %v7217_v36 }
 0x4a3   :  { %v6339_v20 = vpop.eup %6338 }
 0x4a4   :  { %v7220_v41 = vmul.f32 %v6339_v20, %v6337_v19  ;;  %v1912_v19 = vld [vmem:[#allocation8 + $0x48] sm:$0xff] }
 0x4a5   :  { %v1916_v20 = vld [vmem:[#allocation8 + $0x68] sm:$0xff] }
 0x4a6   :  { %1546 = vmatmul.mubr.f32.vlgmr.msra.gmra.mrb[8].mxu0 %v7220_v41  ;;  %1617 = vmatmul.mubr.f32.vlgmr.msra.gmra.mrb[24].mxu1 %v7220_v41 }
 0x4a7   :  { %5342 = vmatpush1.bf16.msra.mxu0 %v7041_v35  ;;  %5374 = vmatpush1.bf16.msra.mxu1 %v7167_v34 }
 0x4a8   :  { %5344 = vmatprep.subr.bf16.mxu0 %v7045_v52  ;;  %5376 = vmatprep.subr.bf16.mxu1 %v7171_v56 }
 0x4a9   :  { %1788 = vmatprep.mubr.f32.mxu0 %v7994_v0  ;;  %1859 = vmatprep.mubr.f32.mxu1 %v7994_v0 }
 0x4ab   :  { %5346 = vmatpush1.bf16.msra.mxu0 %v7047_v31  ;;  %5378 = vmatpush1.bf16.msra.mxu1 %v7173_v5 }
 0x4ac   :  { %5348 = vmatprep.subr.bf16.mxu0 %v7051_v33  ;;  %5380 = vmatprep.subr.bf16.mxu1 %v7177_v11 }
 0x4af   :  { %5350 = vmatpush1.bf16.msra.mxu0 %v7053_v1  ;;  %5382 = vmatpush1.bf16.msra.mxu1 %v7179_v44 }
 0x4b0   :  { %5352 = vmatprep.subr.bf16.mxu0 %v7057_v46  ;;  %5384 = vmatprep.subr.bf16.mxu1 %v7183_v54 }
 0x4b3   :  { %5354 = vmatpush1.bf16.msra.mxu0 %v7059_v24  ;;  %5386 = vmatpush1.bf16.msra.mxu1 %v7185_v47 }
 0x4b4   :  { %5356 = vmatprep.subr.bf16.mxu0 %v7063_v3  ;;  %5388 = vmatprep.subr.bf16.mxu1 %v7189_v27 }
 0x4b7   :  { %5358 = vmatpush1.bf16.msra.mxu0 %v7065_v16  ;;  %5390 = vmatpush1.bf16.msra.mxu1 %v7191_v49 }
 0x4b8   :  { %5360 = vmatprep.subr.bf16.mxu0 %v7069_v21  ;;  %5392 = vmatprep.subr.bf16.mxu1 %v7195_v45 }
 0x4bb   :  { %5362 = vmatpush1.bf16.msra.mxu0 %v7071_v37  ;;  %5394 = vmatpush1.bf16.msra.mxu1 %v7197_v9 }
 0x4bc   :  { %5364 = vmatprep.subr.bf16.mxu0 %v7073_v40  ;;  %5396 = vmatprep.subr.bf16.mxu1 %v7199_v8 }
 0x4bf   :  { %5366 = vmatpush1.bf16.msra.mxu0 %v7077_v60  ;;  %5398 = vmatpush1.bf16.msra.mxu1 %v7203_v18 }
 0x4c0   :  { %5368 = vmatprep.subr.bf16.mxu0 %v7080_v13  ;;  %5400 = vmatprep.subr.bf16.mxu1 %v7206_v15 }
 0x4c3   :  { %5370 = vmatpush1.bf16.msra.mxu0 %v7083_v30  ;;  %5402 = vmatpush1.bf16.msra.mxu1 %v7132_v29 }
 0x4c4   :  { %5436 = vmatprep.subr.bf16.mxu1 %v7165_v23  ;;  %5404 = vmatprep.subr.bf16.mxu0 %v5403_v42 }
 0x579   :  { %v1547_v35 = vpop.f32.mrb[8].mxu0  ;;  %v1618_v52 = vpop.f32.mrb[24].mxu1 }
 0x57a   :  { %v1623_v31 = vadd.f32 %v1547_v35, %v6986_v55  ;;  %v1549_v33 = vpop.f32.mrb[9].mxu0  ;;  %v1620_v1 = vpop.f32.mrb[25].mxu1  ;;  %v6179_v37 = vadd.f32 %v1618_v52, %v7006_v57  ;;  %v7290_v35 = vpack.c.bf16 %v1916_v20, %v1912_v19  ;;  %v1911_v52 = vld [vmem:[#allocation8 + $0x40] sm:$0xff] }
 0x57b   :  { %v1624_v46 = vadd.f32 %v1549_v33, %v6988_v59  ;;  %v6180_v16 = vadd.f32 %v1620_v1, %v7010_v28  ;;  %v1951_v20 = vld [vmem:[#allocation8 + $0x180] sm:$0xff] }
 0x57c   :  { %v4850_v24 = vmul.f32 -1.442695, %v1623_v31  ;;  %v1915_v31 = vld [vmem:[#allocation8 + $0x60] sm:$0xff] }
 0x57d   :  { %v4851_v3 = vmul.f32 -1.442695, %v1624_v46  ;;  %v4852_v21 = vmul.f32 -1.442695, %v6180_v16  ;;  %v7292_v33 = vpack.c.bf16 %v1915_v31, %v1911_v52  ;;  %v1919_v46 = vld [vmem:[#allocation8 + $0x80] sm:$0xff]  ;;  %v1928_v16 = vld [vmem:[#allocation8 + $0xc8] sm:$0xff] }
 0x57e   :  { %6340 = vpow2.f32 %v4850_v24  ;;  %v1923_v24 = vld [vmem:[#allocation8 + $0xa0] sm:$0xff]  ;;  %v1960_v31 = vld [vmem:[#allocation8 + $0x1c8] sm:$0xff] }
 0x57f   :  { %6342 = vpow2.f32 %v4851_v3  ;;  %v7298_v3 = vpack.c.bf16 %v1923_v24, %v1919_v46  ;;  %v1955_v52 = vld [vmem:[#allocation8 + $0x1a0] sm:$0xff] }
 0x580   :  { %6344 = vpow2.f32 %v4852_v21  ;;  %v1932_v21 = vld [vmem:[#allocation8 + $0xe8] sm:$0xff]  ;;  %v1959_v24 = vld [vmem:[#allocation8 + $0x1c0] sm:$0xff] }
 0x581   :  { %6346 = vtanh.f32 %v6179_v37  ;;  %v7302_v37 = vpack.c.bf16 %v1932_v21, %v1928_v16  ;;  %v1963_v16 = vld [vmem:[#allocation8 + $0x1e0] sm:$0xff] }
 0x582   :  { %v7328_v21 = vpack.c.bf16 %v1963_v16, %v1959_v24 }
 0x588   :  { %v6341_v40 = vpop.eup %6340 }
 0x589   :  { %v6343_v60 = vpop.eup %6342  ;;  %v1630_v13 = vadd.f32 1.0, %v6341_v40  ;;  %v1927_v40 = vld [vmem:[#allocation8 + $0xc0] sm:$0xff] }
 0x58a   :  { %v1636_v30 = vadd.f32 1.0, %v6343_v60  ;;  %v6345_v55 = vpop.eup %6344  ;;  %v1931_v60 = vld [vmem:[#allocation8 + $0xe0] sm:$0xff] }
 0x58b   :  { %6348 = vrcp.f32 %v1630_v13  ;;  %v6347_v32 = vpop.eup %6346  ;;  %v1643_v22 = vadd.f32 1.0, %v6345_v55  ;;  %v7304_v13 = vpack.c.bf16 %v1931_v60, %v1927_v40  ;;  %v1940_v55 = vld [vmem:[#allocation8 + $0x128] sm:$0xff] }
 0x58c   :  { %6350 = vrcp.f32 %v1636_v30  ;;  %v1936_v30 = vld [vmem:[#allocation8 + $0x108] sm:$0xff] }
 0x58d   :  { %6352 = vrcp.f32 %v1643_v22  ;;  %v1944_v22 = vld [vmem:[#allocation8 + $0x148] sm:$0xff] }
 0x595   :  { %v6349_v59 = vpop.eup %6348 }
 0x596   :  { %v6351_v48 = vpop.eup %6350  ;;  %v1648_v62 = vmul.f32 %v6349_v59, %v6347_v32  ;;  %v7308_v32 = vpack.c.bf16 %v1940_v55, %v1936_v30  ;;  %v1935_v59 = vld [vmem:[#allocation8 + $0x100] sm:$0xff] }
 0x597   :  { %v1647_v26 = vmul.f32 %v6351_v48, %v7217_v36  ;;  %v6353_v25 = vpop.eup %6352  ;;  %v7287_v36 = vpack.c.bf16 %v1907_v38, %v1903_v43  ;;  %v1939_v48 = vld [vmem:[#allocation8 + $0x120] sm:$0xff]  ;;  %v1956_v43 = vld [vmem:[#allocation8 + $0x1a8] sm:$0xff] }
 0x598   :  { %v7318_v19 = vpack.c.bf16 %v1956_v43, %v1952_v6 }
 0x599   :  { %v7262_v17 = vadd.f32 %v1648_v62, %v1647_v26  ;;  %v7310_v62 = vpack.c.bf16 %v1939_v48, %v1935_v59  ;;  %v1948_v26 = vld [vmem:[#allocation8 + $0x168] sm:$0xff] }
 0x59b   :  { %6354 = vtanh.f32 %v7262_v17 }
 0x5a5   :  { %v6355_v50 = vpop.eup %6354 }
 0x5a6   :  { %v7265_v12 = vmul.f32 %v6355_v50, %v6353_v25  ;;  %v1943_v25 = vld [vmem:[#allocation8 + $0x140] sm:$0xff]  ;;  %v7314_v50 = vpack.c.bf16 %v1948_v26, %v1944_v22 }
 0x5a7   :  { %v7316_v38 = vpack.c.bf16 %v1947_v53, %v1943_v25 }
 0x5a8   :  { %1789 = vmatmul.mubr.f32.vlgmr.msra.gmra.mrb[10].mxu0 %v7265_v12  ;;  %1860 = vmatmul.mubr.f32.vlgmr.msra.gmra.mrb[26].mxu1 %v7265_v12 }
 0x5a9   :  { %5438 = vmatpush1.bf16.msra.mxu1 %v7167_v34  ;;  %2031 = vmatprep.mubr.f32.mxu0 %v7994_v0 }
 0x5aa   :  { %5440 = vmatprep.subr.bf16.mxu1 %v7171_v56  ;;  %2102 = vmatprep.mubr.f32.mxu1 %v7994_v0 }
 0x5ab   :  { %5406 = vmatpush1.bf16.msra.mxu0 %v7287_v36 }
 0x5ac   :  { %5408 = vmatprep.subr.bf16.mxu0 %v7290_v35 }
 0x5ad   :  { %5442 = vmatpush1.bf16.msra.mxu1 %v7173_v5 }
 0x5ae   :  { %5444 = vmatprep.subr.bf16.mxu1 %v7177_v11 }
 0x5af   :  { %5410 = vmatpush1.bf16.msra.mxu0 %v7292_v33 }
 0x5b1   :  { %5446 = vmatpush1.bf16.msra.mxu1 %v7179_v44 }
 0x5b2   :  { %5448 = vmatprep.subr.bf16.mxu1 %v7183_v54 }
 0x5b5   :  { %5450 = vmatpush1.bf16.msra.mxu1 %v7185_v47 }
 0x5b6   :  { %5452 = vmatprep.subr.bf16.mxu1 %v7189_v27 }
 0x5b9   :  { %5454 = vmatpush1.bf16.msra.mxu1 %v7191_v49 }
 0x5ba   :  { %5456 = vmatprep.subr.bf16.mxu1 %v7195_v45 }
 0x5bd   :  { %5458 = vmatpush1.bf16.msra.mxu1 %v7197_v9 }
 0x5be   :  { %5460 = vmatprep.subr.bf16.mxu1 %v7199_v8 }
 0x5c1   :  { %5462 = vmatpush1.bf16.msra.mxu1 %v7203_v18 }
 0x5c2   :  { %5464 = vmatprep.subr.bf16.mxu1 %v7206_v15 }
 0x5c5   :  { %5466 = vmatpush1.bf16.msra.mxu1 %v7132_v29  ;;  %v1920_v29 = vld [vmem:[#allocation8 + $0x88] sm:$0xff] }
 0x5c6   :  { %5500 = vmatprep.subr.bf16.mxu1 %v7165_v23  ;;  %v1924_v23 = vld [vmem:[#allocation8 + $0xa8] sm:$0xff] }
 0x5c7   :  { %v7296_v1 = vpack.c.bf16 %v1924_v23, %v1920_v29  ;;  %v1964_v29 = vld [vmem:[#allocation8 + $0x1e8] sm:$0xff]  ;;  %v7322_v23 = vpack.c.bf16 %v1955_v52, %v1951_v20 }
 0x5c8   :  { %v7325_v46 = vpack.c.bf16 %v1964_v29, %v1960_v31 }
 0x5c9   :  { %5412 = vmatprep.subr.bf16.mxu0 %v7296_v1 }
 0x5ca   :  { %5414 = vmatpush1.bf16.msra.mxu0 %v7298_v3 }
 0x5cb   :  { %5416 = vmatprep.subr.bf16.mxu0 %v7302_v37 }
 0x5ce   :  { %5418 = vmatpush1.bf16.msra.mxu0 %v7304_v13 }
 0x5cf   :  { %5420 = vmatprep.subr.bf16.mxu0 %v7308_v32 }
 0x5d2   :  { %5422 = vmatpush1.bf16.msra.mxu0 %v7310_v62 }
 0x5d3   :  { %5424 = vmatprep.subr.bf16.mxu0 %v7314_v50 }
 0x5d6   :  { %5426 = vmatpush1.bf16.msra.mxu0 %v7316_v38 }
 0x5d7   :  { %5428 = vmatprep.subr.bf16.mxu0 %v7318_v19 }
 0x5da   :  { %5430 = vmatpush1.bf16.msra.mxu0 %v7322_v23 }
 0x5db   :  { %5432 = vmatprep.subr.bf16.mxu0 %v7325_v46 }
 0x5de   :  { %5434 = vmatpush1.bf16.msra.mxu0 %v7328_v21 }
 0x5df   :  { %5468 = vmatprep.subr.bf16.mxu0 %v5403_v42 }
 0x67b   :  { %v1790_v40 = vpop.f32.mrb[10].mxu0  ;;  %v1861_v60 = vpop.f32.mrb[26].mxu1 }
 0x67c   :  { %v1866_v30 = vadd.f32 %v1790_v40, %v6990_v61  ;;  %v1792_v55 = vpop.f32.mrb[11].mxu0  ;;  %v1863_v59 = vpop.f32.mrb[27].mxu1  ;;  %v6181_v6 = vadd.f32 %v1861_v60, %v7006_v57 }
 0x67d   :  { %v1867_v48 = vadd.f32 %v1792_v55, %v6992_v2  ;;  %v6182_v25 = vadd.f32 %v1863_v59, %v7010_v28 }
 0x67e   :  { %v4853_v22 = vmul.f32 -1.442695, %v1866_v30 }
 0x67f   :  { %v4854_v26 = vmul.f32 -1.442695, %v1867_v48  ;;  %v4855_v53 = vmul.f32 -1.442695, %v6182_v25  ;;  %v2392_v48 = vld [vmem:[#allocation10] sm:$0xff]  ;;  %v2398_v25 = vld [vmem:[#allocation10 + $0x30] sm:$0xff] }
 0x680   :  { %6356 = vpow2.f32 %v4853_v22  ;;  %v2396_v22 = vld [vmem:[#allocation10 + $0x20] sm:$0xff] }
 0x681   :  { %6358 = vpow2.f32 %v4854_v26  ;;  %v2394_v26 = vld [vmem:[#allocation10 + $0x10] sm:$0xff] }
 0x682   :  { %6360 = vpow2.f32 %v4855_v53  ;;  %v2401_v53 = vld [vmem:[#allocation10 + $0x48] sm:$0xff] }
 0x683   :  { %6362 = vtanh.f32 %v6181_v6  ;;  %v2405_v6 = vld [vmem:[#allocation10 + $0x68] sm:$0xff] }
 0x68a   :  { %v6357_v43 = vpop.eup %6356 }
 0x68b   :  { %v6359_v20 = vpop.eup %6358  ;;  %v1873_v42 = vadd.f32 1.0, %v6357_v43  ;;  %v2403_v43 = vld [vmem:[#allocation10 + $0x58] sm:$0xff] }
 0x68c   :  { %v1879_v52 = vadd.f32 1.0, %v6359_v20  ;;  %v6361_v61 = vpop.eup %6360  ;;  %v2407_v20 = vld [vmem:[#allocation10 + $0x78] sm:$0xff] }
 0x68d   :  { %6364 = vrcp.f32 %v1873_v42  ;;  %v6363_v31 = vpop.eup %6362  ;;  %v1886_v16 = vadd.f32 1.0, %v6361_v61  ;;  %v5533_v61 = vpack.c.bf16 %v2396_v22, %v2392_v48 }
 0x68e   :  { %6366 = vrcp.f32 %v1879_v52 }
 0x68f   :  { %6368 = vrcp.f32 %v1886_v16  ;;  %v5535_v16 = vpack.c.bf16 %v2405_v6, %v2401_v53  ;;  %v2433_v53 = vld [vmem:[#allocation10 + $0x148] sm:$0xff] }
 0x690   :  { %v2437_v6 = vld [vmem:[#allocation10 + $0x168] sm:$0xff] }
 0x697   :  { %v6365_v2 = vpop.eup %6364 }
 0x698   :  { %v6367_v29 = vpop.eup %6366  ;;  %v1891_v24 = vmul.f32 %v6365_v2, %v6363_v31  ;;  %v5565_v31 = vpack.c.bf16 %v2398_v25, %v2394_v26  ;;  %v2400_v2 = vld [vmem:[#allocation10 + $0x40] sm:$0xff]  ;;  %v2426_v26 = vld [vmem:[#allocation10 + $0x110] sm:$0xff] }
 0x699   :  { %v1890_v40 = vmul.f32 %v6367_v29, %v7262_v17  ;;  %v6369_v60 = vpop.eup %6368  ;;  %v2404_v29 = vld [vmem:[#allocation10 + $0x60] sm:$0xff]  ;;  %v2430_v25 = vld [vmem:[#allocation10 + $0x130] sm:$0xff] }
 0x69b   :  { %v7337_v30 = vadd.f32 %v1891_v24, %v1890_v40  ;;  %v5567_v40 = vpack.c.bf16 %v2407_v20, %v2403_v43  ;;  %v2435_v43 = vld [vmem:[#allocation10 + $0x158] sm:$0xff] }
 0x69c   :  { %v2439_v20 = vld [vmem:[#allocation10 + $0x178] sm:$0xff] }
 0x69d   :  { %6370 = vtanh.f32 %v7337_v30 }
 0x6a7   :  { %v6371_v55 = vpop.eup %6370 }
 0x6a8   :  { %v7340_v59 = vmul.f32 %v6371_v55, %v6369_v60  ;;  %v2406_v60 = vld [vmem:[#allocation10 + $0x70] sm:$0xff]  ;;  %v2409_v55 = vld [vmem:[#allocation10 + $0x88] sm:$0xff] }
 0x6aa   :  { %2032 = vmatmul.mubr.f32.vlgmr.msra.gmra.mrb[12].mxu0 %v7340_v59  ;;  %2103 = vmatmul.mubr.f32.vlgmr.msra.gmra.mrb[28].mxu1 %v7340_v59 }
 0x6ab   :  { %5470 = vmatpush1.bf16.msra.mxu0 %v7287_v36  ;;  %5502 = vmatpush1.bf16.msra.mxu1 %v7167_v34  ;;  %v2204_v34 = vld [vmem:[#allocation8 + $0x1d0] sm:$0xff] }
 0x6ac   :  { %5472 = vmatprep.subr.bf16.mxu0 %v7290_v35  ;;  %5504 = vmatprep.subr.bf16.mxu1 %v7171_v56  ;;  %v2208_v56 = vld [vmem:[#allocation8 + $0x1f0] sm:$0xff] }
 0x6ad   :  { %2274 = vmatprep.mubr.f32.mxu0 %v7994_v0  ;;  %2345 = vmatprep.mubr.f32.mxu1 %v7994_v0 }
 0x6af   :  { %5474 = vmatpush1.bf16.msra.mxu0 %v7292_v33  ;;  %5506 = vmatpush1.bf16.msra.mxu1 %v7173_v5  ;;  %v2393_v5 = vld [vmem:[#allocation10 + $0x8] sm:$0xff] }
 0x6b0   :  { %5476 = vmatprep.subr.bf16.mxu0 %v7296_v1  ;;  %5508 = vmatprep.subr.bf16.mxu1 %v7177_v11  ;;  %v5529_v11 = vpack.c.bf16 %v2208_v56, %v2204_v34  ;;  %v2413_v34 = vld [vmem:[#allocation10 + $0xa8] sm:$0xff]  ;;  %v2411_v56 = vld [vmem:[#allocation10 + $0x98] sm:$0xff] }
 0x6b3   :  { %5478 = vmatpush1.bf16.msra.mxu0 %v7298_v3  ;;  %5510 = vmatpush1.bf16.msra.mxu1 %v7179_v44  ;;  %v2397_v44 = vld [vmem:[#allocation10 + $0x28] sm:$0xff] }
 0x6b4   :  { %5480 = vmatprep.subr.bf16.mxu0 %v7302_v37  ;;  %5512 = vmatprep.subr.bf16.mxu1 %v7183_v54  ;;  %v2395_v54 = vld [vmem:[#allocation10 + $0x18] sm:$0xff] }
 0x6b7   :  { %5482 = vmatpush1.bf16.msra.mxu0 %v7304_v13  ;;  %5514 = vmatpush1.bf16.msra.mxu1 %v7185_v47  ;;  %v2399_v47 = vld [vmem:[#allocation10 + $0x38] sm:$0xff] }
 0x6b8   :  { %5484 = vmatprep.subr.bf16.mxu0 %v7308_v32  ;;  %5516 = vmatprep.subr.bf16.mxu1 %v7189_v27  ;;  %v5531_v27 = vpack.c.bf16 %v2397_v44, %v2393_v5  ;;  %v2415_v5 = vld [vmem:[#allocation10 + $0xb8] sm:$0xff] }
 0x6bb   :  { %5486 = vmatpush1.bf16.msra.mxu0 %v7310_v62  ;;  %5518 = vmatpush1.bf16.msra.mxu1 %v7191_v49  ;;  %v5563_v49 = vpack.c.bf16 %v2399_v47, %v2395_v54  ;;  %v2408_v54 = vld [vmem:[#allocation10 + $0x80] sm:$0xff] }
 0x6bc   :  { %5488 = vmatprep.subr.bf16.mxu0 %v7314_v50  ;;  %5520 = vmatprep.subr.bf16.mxu1 %v7195_v45  ;;  %v2412_v47 = vld [vmem:[#allocation10 + $0xa0] sm:$0xff] }
 0x6bf   :  { %5490 = vmatpush1.bf16.msra.mxu0 %v7316_v38  ;;  %5522 = vmatpush1.bf16.msra.mxu1 %v7197_v9 }
 0x6c0   :  { %5492 = vmatprep.subr.bf16.mxu0 %v7318_v19  ;;  %5524 = vmatprep.subr.bf16.mxu1 %v7199_v8 }
 0x6c3   :  { %5494 = vmatpush1.bf16.msra.mxu0 %v7322_v23  ;;  %5526 = vmatpush1.bf16.msra.mxu1 %v7203_v18 }
 0x6c4   :  { %5496 = vmatprep.subr.bf16.mxu0 %v7325_v46  ;;  %5528 = vmatprep.subr.bf16.mxu1 %v7206_v15 }
 0x6c7   :  { %5498 = vmatpush1.bf16.msra.mxu0 %v7328_v21  ;;  %5530 = vmatpush1.bf16.msra.mxu1 %v5529_v11  ;;  %v5537_v11 = vpack.c.bf16 %v2404_v29, %v2400_v2  ;;  %v5551_v2 = vpack.c.bf16 %v2437_v6, %v2433_v53  ;;  %v5583_v29 = vpack.c.bf16 %v2439_v20, %v2435_v43  ;;  %v2754_v43 = vld [vmem:[#allocation8 + $0x250] sm:$0xff] }
 0x6c8   :  { %5532 = vmatprep.subr.bf16.mxu0 %v5531_v27  ;;  %5564 = vmatprep.subr.bf16.mxu1 %v5563_v49  ;;  %v5539_v27 = vpack.c.bf16 %v2413_v34, %v2409_v55  ;;  %v5571_v49 = vpack.c.bf16 %v2415_v5, %v2411_v56  ;;  %v2443_v55 = vld [vmem:[#allocation10 + $0x198] sm:$0xff]  ;;  %v2758_v20 = vld [vmem:[#allocation8 + $0x270] sm:$0xff] }
 0x6c9   :  { %v2447_v34 = vld [vmem:[#allocation10 + $0x1b8] sm:$0xff] }
 0x77d   :  { %v2033_v45 = vpop.f32.mrb[12].mxu0  ;;  %v2104_v9 = vpop.f32.mrb[28].mxu1 }
 0x77e   :  { %v2109_v8 = vadd.f32 %v2033_v45, %v6994_v4  ;;  %v2035_v18 = vpop.f32.mrb[13].mxu0  ;;  %v2106_v15 = vpop.f32.mrb[29].mxu1  ;;  %v6183_v3 = vadd.f32 %v2104_v9, %v7006_v57  ;;  %v2410_v45 = vld [vmem:[#allocation10 + $0x90] sm:$0xff] }
 0x77f   :  { %v2110_v17 = vadd.f32 %v2035_v18, %v6996_v7  ;;  %v6184_v33 = vadd.f32 %v2106_v15, %v7010_v28  ;;  %v2414_v9 = vld [vmem:[#allocation10 + $0xb0] sm:$0xff]  ;;  %v2421_v18 = vld [vmem:[#allocation10 + $0xe8] sm:$0xff]  ;;  %v2419_v15 = vld [vmem:[#allocation10 + $0xd8] sm:$0xff] }
 0x780   :  { %v4856_v36 = vmul.f32 -1.442695, %v2109_v8  ;;  %v2417_v8 = vld [vmem:[#allocation10 + $0xc8] sm:$0xff] }
 0x781   :  { %v4857_v35 = vmul.f32 -1.442695, %v2110_v17  ;;  %v4858_v1 = vmul.f32 -1.442695, %v6184_v33  ;;  %v2423_v17 = vld [vmem:[#allocation10 + $0xf8] sm:$0xff]  ;;  %v2416_v33 = vld [vmem:[#allocation10 + $0xc0] sm:$0xff] }
 0x782   :  { %6372 = vpow2.f32 %v4856_v36  ;;  %v5541_v36 = vpack.c.bf16 %v2412_v47, %v2408_v54  ;;  %v5587_v47 = vpack.c.bf16 %v2447_v34, %v2443_v55  ;;  %v2762_v55 = vld [vmem:[#allocation8 + $0x290] sm:$0xff] }
 0x783   :  { %6374 = vpow2.f32 %v4857_v35  ;;  %v5573_v35 = vpack.c.bf16 %v2414_v9, %v2410_v45  ;;  %v2449_v45 = vld [vmem:[#allocation10 + $0x1c8] sm:$0xff]  ;;  %v2766_v34 = vld [vmem:[#allocation8 + $0x2b0] sm:$0xff] }
 0x784   :  { %6376 = vpow2.f32 %v4858_v1  ;;  %v2420_v1 = vld [vmem:[#allocation10 + $0xe0] sm:$0xff]  ;;  %v2453_v9 = vld [vmem:[#allocation10 + $0x1e8] sm:$0xff] }
 0x785   :  { %6378 = vtanh.f32 %v6183_v3  ;;  %v5543_v3 = vpack.c.bf16 %v2421_v18, %v2417_v8  ;;  %v2451_v8 = vld [vmem:[#allocation10 + $0x1d8] sm:$0xff] }
 0x786   :  { %v2455_v18 = vld [vmem:[#allocation10 + $0x1f8] sm:$0xff] }
 0x78c   :  { %v6373_v37 = vpop.eup %6372 }
 0x78d   :  { %v6375_v13 = vpop.eup %6374  ;;  %v2116_v32 = vadd.f32 1.0, %v6373_v37  ;;  %v5575_v37 = vpack.c.bf16 %v2423_v17, %v2419_v15 }
 0x78e   :  { %v2122_v62 = vadd.f32 1.0, %v6375_v13  ;;  %v6377_v4 = vpop.eup %6376  ;;  %v2418_v13 = vld [vmem:[#allocation10 + $0xd0] sm:$0xff] }
 0x78f   :  { %6380 = vrcp.f32 %v2116_v32  ;;  %v6379_v50 = vpop.eup %6378  ;;  %v2129_v23 = vadd.f32 1.0, %v6377_v4  ;;  %v2422_v32 = vld [vmem:[#allocation10 + $0xf0] sm:$0xff]  ;;  %v2429_v4 = vld [vmem:[#allocation10 + $0x128] sm:$0xff] }
 0x790   :  { %6382 = vrcp.f32 %v2122_v62  ;;  %v2425_v62 = vld [vmem:[#allocation10 + $0x108] sm:$0xff] }
 0x791   :  { %6384 = vrcp.f32 %v2129_v23  ;;  %v2424_v23 = vld [vmem:[#allocation10 + $0x100] sm:$0xff]  ;;  %v5547_v48 = vpack.c.bf16 %v2429_v4, %v2425_v62 }
 0x792   :  { %v2744_v62 = vld [vmem:[#allocation8 + $0x200] sm:$0xff] }
 0x799   :  { %v6381_v7 = vpop.eup %6380 }
 0x79a   :  { %v6383_v38 = vpop.eup %6382  ;;  %v2134_v19 = vmul.f32 %v6381_v7, %v6379_v50  ;;  %v2427_v50 = vld [vmem:[#allocation10 + $0x118] sm:$0xff] }
 0x79b   :  { %v2133_v46 = vmul.f32 %v6383_v38, %v7337_v30  ;;  %v6385_v42 = vpop.eup %6384  ;;  %v2402_v30 = vld [vmem:[#allocation10 + $0x50] sm:$0xff]  ;;  %v2431_v7 = vld [vmem:[#allocation10 + $0x138] sm:$0xff]  ;;  %v5545_v38 = vpack.c.bf16 %v2420_v1, %v2416_v33  ;;  %v5591_v33 = vpack.c.bf16 %v2455_v18, %v2451_v8  ;;  %v2452_v1 = vld [vmem:[#allocation10 + $0x1e0] sm:$0xff] }
 0x79c   :  { %v5569_v44 = vpack.c.bf16 %v2406_v60, %v2402_v30  ;;  %v5579_v22 = vpack.c.bf16 %v2431_v7, %v2427_v50  ;;  %v2441_v30 = vld [vmem:[#allocation10 + $0x188] sm:$0xff]  ;;  %v2746_v7 = vld [vmem:[#allocation8 + $0x210] sm:$0xff] }
 0x79d   :  { %v7380_v21 = vadd.f32 %v2134_v19, %v2133_v46  ;;  %v5577_v19 = vpack.c.bf16 %v2422_v32, %v2418_v13  ;;  %v2428_v46 = vld [vmem:[#allocation10 + $0x120] sm:$0xff]  ;;  %v2445_v60 = vld [vmem:[#allocation10 + $0x1a8] sm:$0xff]  ;;  %v2770_v8 = vld [vmem:[#allocation8 + $0x2d0] sm:$0xff] }
 0x79e   :  { %v5555_v54 = vpack.c.bf16 %v2445_v60, %v2441_v30  ;;  %v2774_v18 = vld [vmem:[#allocation8 + $0x2f0] sm:$0xff] }
 0x79f   :  { %6386 = vtanh.f32 %v7380_v21 }
 0x7a9   :  { %v6387_v52 = vpop.eup %6386 }
 0x7aa   :  { %v7383_v24 = vmul.f32 %v6387_v52, %v6385_v42  ;;  %v5549_v42 = vpack.c.bf16 %v2428_v46, %v2424_v23  ;;  %v5581_v52 = vpack.c.bf16 %v2430_v25, %v2426_v26  ;;  %v2757_v23 = vld [vmem:[#allocation8 + $0x268] sm:$0xff]  ;;  %v2755_v46 = vld [vmem:[#allocation8 + $0x258] sm:$0xff]  ;;  %v2752_v26 = vld [vmem:[#allocation8 + $0x240] sm:$0xff] }
 0x7ab   :  { %v2756_v25 = vld [vmem:[#allocation8 + $0x260] sm:$0xff] }
 0x7ac   :  { %2275 = vmatmul.mubr.f32.vlgmr.msra.gmra.mrb[14].mxu0 %v7383_v24  ;;  %2346 = vmatmul.mubr.f32.vlgmr.msra.gmra.mrb[30].mxu1 %v7383_v24  ;;  %v7433_v6 = vpack.c.bf16 %v2756_v25, %v2752_v26  ;;  %v2790_v26 = vld [vmem:[#allocation8 + $0x370] sm:$0xff] }
 0x7ad   :  { %5534 = vmatpush1.bf16.msra.mxu0 %v5533_v61  ;;  %5566 = vmatpush1.bf16.msra.mxu1 %v5565_v31  ;;  %v2432_v61 = vld [vmem:[#allocation10 + $0x140] sm:$0xff] }
 0x7ae   :  { %5536 = vmatprep.subr.bf16.mxu0 %v5535_v16  ;;  %5568 = vmatprep.subr.bf16.mxu1 %v5567_v40  ;;  %v2436_v31 = vld [vmem:[#allocation10 + $0x160] sm:$0xff]  ;;  %v2434_v16 = vld [vmem:[#allocation10 + $0x150] sm:$0xff] }
 0x7af   :  { %2542 = vmatprep.mubr.f32.mxu0 %v7994_v0  ;;  %2655 = vmatprep.mubr.f32.mxu1 %v7994_v0  ;;  %v2438_v40 = vld [vmem:[#allocation10 + $0x170] sm:$0xff]  ;;  %v5553_v56 = vpack.c.bf16 %v2436_v31, %v2432_v61  ;;  %v2765_v61 = vld [vmem:[#allocation8 + $0x2a8] sm:$0xff]  ;;  %v2763_v31 = vld [vmem:[#allocation8 + $0x298] sm:$0xff] }
 0x7b0   :  { %v5585_v5 = vpack.c.bf16 %v2438_v40, %v2434_v16  ;;  %v2760_v16 = vld [vmem:[#allocation8 + $0x280] sm:$0xff] }
 0x7b1   :  { %5538 = vmatpush1.bf16.msra.mxu0 %v5537_v11  ;;  %5570 = vmatpush1.bf16.msra.mxu1 %v5569_v44  ;;  %v2440_v11 = vld [vmem:[#allocation10 + $0x180] sm:$0xff] }
 0x7b2   :  { %5540 = vmatprep.subr.bf16.mxu0 %v5539_v27  ;;  %5572 = vmatprep.subr.bf16.mxu1 %v5571_v49  ;;  %v2444_v44 = vld [vmem:[#allocation10 + $0x1a0] sm:$0xff]  ;;  %v2442_v27 = vld [vmem:[#allocation10 + $0x190] sm:$0xff] }
 0x7b3   :  { %v2446_v49 = vld [vmem:[#allocation10 + $0x1b0] sm:$0xff]  ;;  %v5557_v15 = vpack.c.bf16 %v2444_v44, %v2440_v11  ;;  %v2764_v40 = vld [vmem:[#allocation8 + $0x2a0] sm:$0xff]  ;;  %v2773_v11 = vld [vmem:[#allocation8 + $0x2e8] sm:$0xff] }
 0x7b4   :  { %v5589_v17 = vpack.c.bf16 %v2446_v49, %v2442_v27  ;;  %v7445_v60 = vpack.c.bf16 %v2764_v40, %v2760_v16  ;;  %v2771_v44 = vld [vmem:[#allocation8 + $0x2d8] sm:$0xff]  ;;  %v2768_v27 = vld [vmem:[#allocation8 + $0x2c0] sm:$0xff] }
 0x7b5   :  { %5542 = vmatpush1.bf16.msra.mxu0 %v5541_v36  ;;  %5574 = vmatpush1.bf16.msra.mxu1 %v5573_v35  ;;  %v2448_v36 = vld [vmem:[#allocation10 + $0x1c0] sm:$0xff]  ;;  %v5559_v35 = vpack.c.bf16 %v2453_v9, %v2449_v45 }
 0x7b6   :  { %5544 = vmatprep.subr.bf16.mxu0 %v5543_v3  ;;  %5576 = vmatprep.subr.bf16.mxu1 %v5575_v37  ;;  %v2450_v3 = vld [vmem:[#allocation10 + $0x1d0] sm:$0xff]  ;;  %v5561_v13 = vpack.c.bf16 %v2452_v1, %v2448_v36  ;;  %v2772_v49 = vld [vmem:[#allocation8 + $0x2e0] sm:$0xff]  ;;  %v2781_v36 = vld [vmem:[#allocation8 + $0x328] sm:$0xff] }
 0x7b7   :  { %v2454_v37 = vld [vmem:[#allocation10 + $0x1f0] sm:$0xff]  ;;  %v7457_v9 = vpack.c.bf16 %v2772_v49, %v2768_v27  ;;  %v2792_v16 = vld [vmem:[#allocation8 + $0x380] sm:$0xff]  ;;  %v2805_v27 = vld [vmem:[#allocation8 + $0x3e8] sm:$0xff] }
 0x7b8   :  { %v5593_v32 = vpack.c.bf16 %v2454_v37, %v2450_v3  ;;  %v2776_v37 = vld [vmem:[#allocation8 + $0x300] sm:$0xff]  ;;  %v2803_v49 = vld [vmem:[#allocation8 + $0x3d8] sm:$0xff] }
 0x7b9   :  { %5546 = vmatpush1.bf16.msra.mxu0 %v5545_v38  ;;  %5578 = vmatpush1.bf16.msra.mxu1 %v5577_v19  ;;  %v2750_v38 = vld [vmem:[#allocation8 + $0x230] sm:$0xff]  ;;  %v2753_v19 = vld [vmem:[#allocation8 + $0x248] sm:$0xff]  ;;  %v2796_v40 = vld [vmem:[#allocation8 + $0x3a0] sm:$0xff] }
 0x7ba   :  { %5548 = vmatprep.subr.bf16.mxu0 %v5547_v48  ;;  %5580 = vmatprep.subr.bf16.mxu1 %v5579_v22  ;;  %v7429_v48 = vpack.c.bf16 %v2757_v23, %v2753_v19  ;;  %v2759_v22 = vld [vmem:[#allocation8 + $0x278] sm:$0xff]  ;;  %v2784_v19 = vld [vmem:[#allocation8 + $0x340] sm:$0xff] }
 0x7bb   :  { %v7431_v53 = vpack.c.bf16 %v2759_v22, %v2755_v46  ;;  %v2788_v46 = vld [vmem:[#allocation8 + $0x360] sm:$0xff]  ;;  %v2786_v22 = vld [vmem:[#allocation8 + $0x350] sm:$0xff] }
 0x7bc   :  { %v7480_v25 = vpack.c.bf16 %v2788_v46, %v2784_v19 }
 0x7bd   :  { %5550 = vmatpush1.bf16.msra.mxu0 %v5549_v42  ;;  %5582 = vmatpush1.bf16.msra.mxu1 %v5581_v52  ;;  %v7436_v42 = vpack.c.bf16 %v2758_v20, %v2754_v43  ;;  %v2761_v52 = vld [vmem:[#allocation8 + $0x288] sm:$0xff] }
 0x7be   :  { %5552 = vmatprep.subr.bf16.mxu0 %v5551_v2  ;;  %5584 = vmatprep.subr.bf16.mxu1 %v5583_v29  ;;  %v7441_v2 = vpack.c.bf16 %v2765_v61, %v2761_v52  ;;  %v2767_v29 = vld [vmem:[#allocation8 + $0x2b8] sm:$0xff]  ;;  %v2793_v43 = vld [vmem:[#allocation8 + $0x388] sm:$0xff]  ;;  %v7484_v61 = vpack.c.bf16 %v2790_v26, %v2786_v22 }
 0x7bf   :  { %v7443_v30 = vpack.c.bf16 %v2767_v29, %v2763_v31  ;;  %v2797_v20 = vld [vmem:[#allocation8 + $0x3a8] sm:$0xff]  ;;  %v2795_v52 = vld [vmem:[#allocation8 + $0x398] sm:$0xff] }
 0x7c0   :  { %v7486_v31 = vpack.c.bf16 %v2797_v20, %v2793_v43  ;;  %v2799_v29 = vld [vmem:[#allocation8 + $0x3b8] sm:$0xff] }
 0x7c1   :  { %5554 = vmatpush1.bf16.msra.mxu0 %v5553_v56  ;;  %5586 = vmatpush1.bf16.msra.mxu1 %v5585_v5  ;;  %v7448_v56 = vpack.c.bf16 %v2766_v34, %v2762_v55  ;;  %v2769_v5 = vld [vmem:[#allocation8 + $0x2c8] sm:$0xff]  ;;  %v7489_v55 = vpack.c.bf16 %v2799_v29, %v2795_v52  ;;  %v2794_v34 = vld [vmem:[#allocation8 + $0x390] sm:$0xff] }
 0x7c2   :  { %5556 = vmatprep.subr.bf16.mxu0 %v5555_v54  ;;  %5588 = vmatprep.subr.bf16.mxu1 %v5587_v47  ;;  %v7453_v54 = vpack.c.bf16 %v2773_v11, %v2769_v5  ;;  %v2775_v47 = vld [vmem:[#allocation8 + $0x2f8] sm:$0xff]  ;;  %v2798_v5 = vld [vmem:[#allocation8 + $0x3b0] sm:$0xff]  ;;  %v7492_v11 = vpack.c.bf16 %v2796_v40, %v2792_v16 }
 0x7c3   :  { %v7455_v45 = vpack.c.bf16 %v2775_v47, %v2771_v44  ;;  %v7496_v44 = vpack.c.bf16 %v2798_v5, %v2794_v34  ;;  %v2801_v47 = vld [vmem:[#allocation8 + $0x3c8] sm:$0xff] }
 0x7c5   :  { %5558 = vmatpush1.bf16.msra.mxu0 %v5557_v15  ;;  %5590 = vmatpush1.bf16.msra.mxu1 %v5589_v17  ;;  %v2777_v15 = vld [vmem:[#allocation8 + $0x308] sm:$0xff]  ;;  %v7460_v17 = vpack.c.bf16 %v2774_v18, %v2770_v8  ;;  %v7501_v8 = vpack.c.bf16 %v2805_v27, %v2801_v47  ;;  %v2807_v18 = vld [vmem:[#allocation8 + $0x3f8] sm:$0xff] }
 0x7c6   :  { %5560 = vmatprep.subr.bf16.mxu0 %v5559_v35  ;;  %5592 = vmatprep.subr.bf16.mxu1 %v5591_v33  ;;  %v2779_v35 = vld [vmem:[#allocation8 + $0x318] sm:$0xff]  ;;  %v7464_v1 = vpack.c.bf16 %v2781_v36, %v2777_v15  ;;  %v2800_v15 = vld [vmem:[#allocation8 + $0x3c0] sm:$0xff] }
 0x7c7   :  { %v2783_v33 = vld [vmem:[#allocation8 + $0x338] sm:$0xff]  ;;  %v2804_v36 = vld [vmem:[#allocation8 + $0x3e0] sm:$0xff] }
 0x7c8   :  { %v7466_v3 = vpack.c.bf16 %v2783_v33, %v2779_v35  ;;  %v7503_v35 = vpack.c.bf16 %v2807_v18, %v2803_v49  ;;  %v7505_v33 = vpack.c.bf16 %v2804_v36, %v2800_v15  ;;  %v7995_v36 = vsub.s32 0, %v6963_v39 }
 0x7c9   :  { %5562 = vmatpush1.bf16.msra.mxu0 %v5561_v13  ;;  %5594 = vmatpush1.bf16.msra.mxu1 %v5593_v32  ;;  %v2780_v13 = vld [vmem:[#allocation8 + $0x320] sm:$0xff]  ;;  %v2778_v32 = vld [vmem:[#allocation8 + $0x310] sm:$0xff] }
 0x7cc   :  { %2543 = vmatmul.mubr.f32.vlgmr.msra.gmra.mrb[16].mxu0 %v7017_v63  ;;  %2656 = vmatmul.mubr.f32.vlgmr.msra.gmra.mrb[32].mxu1 %v7017_v63  ;;  %v2745_v63 = vld [vmem:[#allocation8 + $0x208] sm:$0xff] }
 0x7cd   :  { %2548 = vmatprep.mubr.f32.mxu0 %v7994_v0  ;;  %2661 = vmatprep.mubr.f32.mxu1 %v7994_v0 }
 0x7d0   :  { %2549 = vmatmul.mubr.f32.gmra.mrb[18].mxu0 %v7096_v58  ;;  %2662 = vmatmul.mubr.f32.gmra.mrb[34].mxu1 %v7096_v58  ;;  %v2749_v58 = vld [vmem:[#allocation8 + $0x228] sm:$0xff] }
 0x7d1   :  { %2554 = vmatprep.mubr.f32.mxu0 %v7994_v0  ;;  %2667 = vmatprep.mubr.f32.mxu1 %v7994_v0 }
 0x7d4   :  { %2555 = vmatmul.mubr.f32.gmra.mrb[20].mxu0 %v7143_v51  ;;  %2668 = vmatmul.mubr.f32.gmra.mrb[36].mxu1 %v7143_v51  ;;  %v2747_v51 = vld [vmem:[#allocation8 + $0x218] sm:$0xff] }
 0x7d5   :  { %2560 = vmatprep.mubr.f32.mxu0 %v7994_v0  ;;  %2673 = vmatprep.mubr.f32.mxu1 %v7994_v0 }
 0x7d8   :  { %2561 = vmatmul.mubr.f32.gmra.mrb[22].mxu0 %v7220_v41  ;;  %2674 = vmatmul.mubr.f32.gmra.mrb[38].mxu1 %v7220_v41  ;;  %v7417_v41 = vpack.c.bf16 %v2749_v58, %v2745_v63  ;;  %v7469_v63 = vpack.c.bf16 %v2780_v13, %v2776_v37  ;;  %v2782_v58 = vld [vmem:[#allocation8 + $0x330] sm:$0xff] }
 0x7d9   :  { %2566 = vmatprep.mubr.f32.mxu0 %v7994_v0  ;;  %2679 = vmatprep.mubr.f32.mxu1 %v7994_v0  ;;  %v2802_v37 = vld [vmem:[#allocation8 + $0x3d0] sm:$0xff] }
 0x7da   :  { %5596 = vmatprep.subr.bf16.mxu0 %v7417_v41  ;;  %v2806_v13 = vld [vmem:[#allocation8 + $0x3f0] sm:$0xff] }
 0x7dc   :  { %2567 = vmatmul.mubr.f32.gmra.mrb[24].mxu0 %v7265_v12  ;;  %2680 = vmatmul.mubr.f32.gmra.mrb[40].mxu1 %v7265_v12  ;;  %v2751_v12 = vld [vmem:[#allocation8 + $0x238] sm:$0xff] }
 0x7dd   :  { %2572 = vmatprep.mubr.f32.mxu0 %v7994_v0  ;;  %2685 = vmatprep.mubr.f32.mxu1 %v7994_v0  ;;  %v7419_v4 = vpack.c.bf16 %v2751_v12, %v2747_v51  ;;  %v2785_v51 = vld [vmem:[#allocation8 + $0x348] sm:$0xff] }
 0x7de   :  { %v2789_v12 = vld [vmem:[#allocation8 + $0x368] sm:$0xff] }
 0x7df   :  { %5628 = vmatprep.subr.bf16.mxu1 %v7419_v4 }
 0x7e0   :  { %2573 = vmatmul.mubr.f32.gmra.mrb[26].mxu0 %v7340_v59  ;;  %2686 = vmatmul.mubr.f32.gmra.mrb[42].mxu1 %v7340_v59  ;;  %v2748_v59 = vld [vmem:[#allocation8 + $0x220] sm:$0xff] }
 0x7e1   :  { %2578 = vmatprep.mubr.f32.mxu0 %v7994_v0  ;;  %2691 = vmatprep.mubr.f32.mxu1 %v7994_v0  ;;  %v7421_v50 = vpack.c.bf16 %v2748_v59, %v2744_v62  ;;  %v7473_v62 = vpack.c.bf16 %v2782_v58, %v2778_v32  ;;  %v7475_v59 = vpack.c.bf16 %v2789_v12, %v2785_v51 }
 0x7e2   :  { %v7508_v32 = vpack.c.bf16 %v2806_v13, %v2802_v37  ;;  %v7996_v13 = vsub.s32 1, %v6963_v39 }
 0x7e3   :  { %5598 = vmatpush1.bf16.msra.mxu0 %v7421_v50 }
 0x7e4   :  { %2579 = vmatmul.mubr.f32.gmra.mrb[28].mxu0 %v7383_v24  ;;  %2692 = vmatmul.mubr.f32.gmra.mrb[44].mxu1 %v7383_v24  ;;  %v7424_v24 = vpack.c.bf16 %v2750_v38, %v2746_v7  ;;  %v2787_v7 = vld [vmem:[#allocation8 + $0x358] sm:$0xff] }
 0x7e5   :  { %2584 = vmatprep.mubr.f32.mxu0 %v7994_v0  ;;  %2697 = vmatprep.mubr.f32.mxu1 %v7994_v0  ;;  %v2791_v38 = vld [vmem:[#allocation8 + $0x378] sm:$0xff] }
 0x7e6   :  { %5630 = vmatpush1.bf16.msra.mxu1 %v7424_v24  ;;  %5600 = vmatprep.subr.bf16.mxu0 %v7429_v48  ;;  %v7477_v23 = vpack.c.bf16 %v2791_v38, %v2787_v7 }
 0x7e7   :  { %5632 = vmatprep.subr.bf16.mxu1 %v7431_v53  ;;  %5602 = vmatpush1.bf16.msra.mxu0 %v7433_v6 }
 0x7e8   :  { %5604 = vmatprep.subr.bf16.mxu0 %v7441_v2 }
 0x7ea   :  { %5634 = vmatpush1.bf16.msra.mxu1 %v7436_v42 }
 0x7eb   :  { %5636 = vmatprep.subr.bf16.mxu1 %v7443_v30  ;;  %5606 = vmatpush1.bf16.msra.mxu0 %v7445_v60 }
 0x7ec   :  { %5608 = vmatprep.subr.bf16.mxu0 %v7453_v54 }
 0x7ee   :  { %5638 = vmatpush1.bf16.msra.mxu1 %v7448_v56 }
 0x7ef   :  { %5640 = vmatprep.subr.bf16.mxu1 %v7455_v45  ;;  %5610 = vmatpush1.bf16.msra.mxu0 %v7457_v9 }
 0x7f0   :  { %5612 = vmatprep.subr.bf16.mxu0 %v7464_v1 }
 0x7f2   :  { %5642 = vmatpush1.bf16.msra.mxu1 %v7460_v17 }
 0x7f3   :  { %5644 = vmatprep.subr.bf16.mxu1 %v7466_v3  ;;  %5614 = vmatpush1.bf16.msra.mxu0 %v7469_v63 }
 0x7f4   :  { %5616 = vmatprep.subr.bf16.mxu0 %v7475_v59 }
 0x7f6   :  { %5646 = vmatpush1.bf16.msra.mxu1 %v7473_v62 }
 0x7f7   :  { %5648 = vmatprep.subr.bf16.mxu1 %v7477_v23  ;;  %5618 = vmatpush1.bf16.msra.mxu0 %v7480_v25 }
 0x7f8   :  { %5620 = vmatprep.subr.bf16.mxu0 %v7486_v31 }
 0x7fa   :  { %5650 = vmatpush1.bf16.msra.mxu1 %v7484_v61 }
 0x7fb   :  { %5652 = vmatprep.subr.bf16.mxu1 %v7489_v55  ;;  %5622 = vmatpush1.bf16.msra.mxu0 %v7492_v11 }
 0x7fc   :  { %5624 = vmatprep.subr.bf16.mxu0 %v7501_v8 }
 0x7fe   :  { %5654 = vmatpush1.bf16.msra.mxu1 %v7496_v44 }
 0x7ff   :  { %5656 = vmatprep.subr.bf16.mxu1 %v7503_v35  ;;  %5626 = vmatpush1.bf16.msra.mxu0 %v7505_v33 }
 0x800   :  { %5660 = vmatprep.subr.bf16.mxu0 %v7417_v41 }
 0x802   :  { %5658 = vmatpush1.bf16.msra.mxu1 %v7508_v32 }
 0x803   :  { %5692 = vmatprep.subr.bf16.mxu1 %v7419_v4 }
 0x87f   :  { %v2276_v58 = vpop.f32.mrb[14].mxu0  ;;  %v2347_v51 = vpop.f32.mrb[30].mxu1 }
 0x880   :  { %v2352_v12 = vadd.f32 %v2276_v58, %v6998_v10  ;;  %v2278_v7 = vpop.f32.mrb[15].mxu0  ;;  %v2349_v38 = vpop.f32.mrb[31].mxu1  ;;  %v6185_v20 = vadd.f32 %v2347_v51, %v7006_v57 }
 0x881   :  { %v2353_v19 = vadd.f32 %v2278_v7, %v7000_v14  ;;  %v6186_v26 = vadd.f32 %v2349_v38, %v7010_v28 }
 0x882   :  { %v4859_v46 = vmul.f32 -1.442695, %v2352_v12 }
 0x883   :  { %v4860_v22 = vmul.f32 -1.442695, %v2353_v19  ;;  %v4861_v43 = vmul.f32 -1.442695, %v6186_v26 }
 0x884   :  { %6388 = vpow2.f32 %v4859_v46 }
 0x885   :  { %6390 = vpow2.f32 %v4860_v22 }
 0x886   :  { %6392 = vpow2.f32 %v4861_v43  ;;  %v7997_v43 = vsub.s32 3, %v6963_v39 }
 0x887   :  { %6394 = vtanh.f32 %v6185_v20 }
 0x88e   :  { %v6389_v52 = vpop.eup %6388 }
 0x88f   :  { %v6391_v29 = vpop.eup %6390  ;;  %v2359_v16 = vadd.f32 1.0, %v6389_v52 }
 0x890   :  { %v2365_v40 = vadd.f32 1.0, %v6391_v29  ;;  %v6393_v10 = vpop.eup %6392  ;;  %v7998_v29 = vsub.s32 2, %v6963_v39 }
 0x891   :  { %6396 = vrcp.f32 %v2359_v16  ;;  %v6395_v34 = vpop.eup %6394  ;;  %v2372_v27 = vadd.f32 1.0, %v6393_v10 }
 0x892   :  { %6398 = vrcp.f32 %v2365_v40 }
 0x893   :  { %6400 = vrcp.f32 %v2372_v27 }
 0x89b   :  { %v6397_v14 = vpop.eup %6396 }
 0x89c   :  { %v6399_v5 = vpop.eup %6398  ;;  %v2377_v47 = vmul.f32 %v6397_v14, %v6395_v34 }
 0x89d   :  { %v2376_v49 = vmul.f32 %v6399_v5, %v7380_v21  ;;  %v6401_v57 = vpop.eup %6400  ;;  %v2456_v21 = vld [vmem:[%s7983_s5] sm:$0xf] }
 0x89e   :  { %v7563_v37 = vrot.slane %v2456_v21, %v7995_v36  ;;  %v7567_v58 = vrot.slane %v2456_v21, %v7996_v13  ;;  %v7573_v20 = vrot.slane %v2456_v21, %v7997_v43  ;;  %v7578_v16 = vrot.slane %v2456_v21, %v7998_v29 }
 0x89f   :  { %v2378_v28 = vadd.f32 %v2377_v47, %v2376_v49 }
 0x8a1   :  { %6402 = vtanh.f32 %v2378_v28 }
 0x8ab   :  { %v6403_v18 = vpop.eup %6402 }
 0x8ac   :  { %v2380_v15 = vmul.f32 %v6403_v18, %v6401_v57 }
 0x8ae   :  { %2585 = vmatmul.mubr.f32.gmra.mrb[30].mxu0 %v2380_v15  ;;  %2698 = vmatmul.mubr.f32.gmra.mrb[46].mxu1 %v2380_v15 }
 0x8af   :  { %2872 = vmatprep.mubr.f32.mxu0 %v7994_v0  ;;  %2943 = vmatprep.mubr.f32.mxu1 %v7994_v0 }
 0x8b2   :  { %2873 = vmatmul.mubr.f32.vlgmr.msra.gmra.mrb[16].mxu0 %v7994_v0  ;;  %2944 = vmatmul.mubr.f32.vlgmr.msra.gmra.mrb[32].mxu1 %v7994_v0 }
 0x8b3   :  { %5662 = vmatpush1.bf16.msra.mxu0 %v7421_v50  ;;  %5694 = vmatpush1.bf16.msra.mxu1 %v7424_v24 }
 0x8b4   :  { %5664 = vmatprep.subr.bf16.mxu0 %v7429_v48  ;;  %5696 = vmatprep.subr.bf16.mxu1 %v7431_v53 }
 0x8b5   :  { %3115 = vmatprep.mubr.f32.mxu0 %v7994_v0  ;;  %3186 = vmatprep.mubr.f32.mxu1 %v7994_v0 }
 0x8b7   :  { %5666 = vmatpush1.bf16.msra.mxu0 %v7433_v6  ;;  %5698 = vmatpush1.bf16.msra.mxu1 %v7436_v42 }
 0x8b8   :  { %5668 = vmatprep.subr.bf16.mxu0 %v7441_v2  ;;  %5700 = vmatprep.subr.bf16.mxu1 %v7443_v30 }
 0x8bb   :  { %5670 = vmatpush1.bf16.msra.mxu0 %v7445_v60  ;;  %5702 = vmatpush1.bf16.msra.mxu1 %v7448_v56 }
 0x8bc   :  { %5672 = vmatprep.subr.bf16.mxu0 %v7453_v54  ;;  %5704 = vmatprep.subr.bf16.mxu1 %v7455_v45 }
 0x8bf   :  { %5674 = vmatpush1.bf16.msra.mxu0 %v7457_v9  ;;  %5706 = vmatpush1.bf16.msra.mxu1 %v7460_v17 }
 0x8c0   :  { %5676 = vmatprep.subr.bf16.mxu0 %v7464_v1  ;;  %5708 = vmatprep.subr.bf16.mxu1 %v7466_v3 }
 0x8c3   :  { %5678 = vmatpush1.bf16.msra.mxu0 %v7469_v63  ;;  %5710 = vmatpush1.bf16.msra.mxu1 %v7473_v62 }
 0x8c4   :  { %5680 = vmatprep.subr.bf16.mxu0 %v7475_v59  ;;  %5712 = vmatprep.subr.bf16.mxu1 %v7477_v23 }
 0x8c7   :  { %5682 = vmatpush1.bf16.msra.mxu0 %v7480_v25  ;;  %5714 = vmatpush1.bf16.msra.mxu1 %v7484_v61 }
 0x8c8   :  { %5684 = vmatprep.subr.bf16.mxu0 %v7486_v31  ;;  %5716 = vmatprep.subr.bf16.mxu1 %v7489_v55 }
 0x8cb   :  { %5686 = vmatpush1.bf16.msra.mxu0 %v7492_v11  ;;  %5718 = vmatpush1.bf16.msra.mxu1 %v7496_v44 }
 0x8cc   :  { %5688 = vmatprep.subr.bf16.mxu0 %v7501_v8  ;;  %5720 = vmatprep.subr.bf16.mxu1 %v7503_v35 }
 0x8cf   :  { %5690 = vmatpush1.bf16.msra.mxu0 %v7505_v33  ;;  %5722 = vmatpush1.bf16.msra.mxu1 %v7508_v32 }
 0x8d0   :  { %5724 = vmatprep.subr.bf16.mxu0 %v7417_v41  ;;  %5756 = vmatprep.subr.bf16.mxu1 %v7419_v4 }
 0x985   :  { %v2874_v51 = vpop.f32.mrb[16].mxu0  ;;  %v2945_v12 = vpop.f32.mrb[32].mxu1 }
 0x986   :  { %v6187_v7 = vadd.f32 %v2874_v51, %v7563_v37  ;;  %v2876_v38 = vpop.f32.mrb[17].mxu0  ;;  %v2947_v19 = vpop.f32.mrb[33].mxu1  ;;  %v6203_v10 = vadd.f32 %v2945_v12, %v7578_v16 }
 0x987   :  { %v6188_v46 = vadd.f32 %v2876_v38, %v7567_v58  ;;  %v6204_v52 = vadd.f32 %v2947_v19, %v7573_v20 }
 0x988   :  { %v4862_v22 = vmul.f32 -1.442695, %v6187_v7 }
 0x989   :  { %v4863_v26 = vmul.f32 -1.442695, %v6188_v46  ;;  %v4864_v40 = vmul.f32 -1.442695, %v6204_v52 }
 0x98a   :  { %6404 = vpow2.f32 %v4862_v22 }
 0x98b   :  { %6406 = vpow2.f32 %v4863_v26 }
 0x98c   :  { %6408 = vpow2.f32 %v4864_v40 }
 0x98d   :  { %6410 = vtanh.f32 %v6203_v10 }
 0x994   :  { %v6405_v34 = vpop.eup %6404 }
 0x995   :  { %v6407_v14 = vpop.eup %6406  ;;  %v2957_v5 = vadd.f32 1.0, %v6405_v34 }
 0x996   :  { %v2963_v47 = vadd.f32 1.0, %v6407_v14  ;;  %v6409_v27 = vpop.eup %6408 }
 0x997   :  { %6412 = vrcp.f32 %v2957_v5  ;;  %v6411_v49 = vpop.eup %6410  ;;  %v2970_v15 = vadd.f32 1.0, %v6409_v27 }
 0x998   :  { %6414 = vrcp.f32 %v2963_v47 }
 0x999   :  { %6416 = vrcp.f32 %v2970_v15 }
 0x9a1   :  { %v6413_v28 = vpop.eup %6412 }
 0x9a2   :  { %v6415_v57 = vpop.eup %6414  ;;  %v2975_v18 = vmul.f32 %v6413_v28, %v6411_v49 }
 0x9a3   :  { %v2974_v39 = vmul.f32 0.0, %v6415_v57  ;;  %v6417_v36 = vpop.eup %6416 }
 0x9a5   :  { %v7581_v21 = vadd.f32 %v2975_v18, %v2974_v39 }
 0x9a7   :  { %6418 = vtanh.f32 %v7581_v21 }
 0x9b1   :  { %v6419_v13 = vpop.eup %6418 }
 0x9b2   :  { %v2978_v51 = vmul.f32 %v6419_v13, %v6417_v36  ;;  %v3716_v13 = vld [vmem:[#allocation8 + $0x200] sm:$0xff] }
 0x9b4   :  { %2981 = vst [vmem:[%s7986_s8] sm:$0xff] %v2978_v51  ;;  %3116 = vmatmul.mubr.f32.vlgmr.msra.gmra.mrb[18].mxu0 %v2978_v51  ;;  %3187 = vmatmul.mubr.f32.vlgmr.msra.gmra.mrb[34].mxu1 %v2978_v51  ;;  %v3720_v51 = vld [vmem:[#allocation8 + $0x220] sm:$0xff] }
 0x9b5   :  { %5726 = vmatpush1.bf16.msra.mxu0 %v7421_v50  ;;  %5758 = vmatpush1.bf16.msra.mxu1 %v7424_v24 }
 0x9b6   :  { %5728 = vmatprep.subr.bf16.mxu0 %v7429_v48  ;;  %5760 = vmatprep.subr.bf16.mxu1 %v7431_v53 }
 0x9b7   :  { %3358 = vmatprep.mubr.f32.mxu0 %v7994_v0  ;;  %3429 = vmatprep.mubr.f32.mxu1 %v7994_v0 }
 0x9b9   :  { %5730 = vmatpush1.bf16.msra.mxu0 %v7433_v6  ;;  %5762 = vmatpush1.bf16.msra.mxu1 %v7436_v42 }
 0x9ba   :  { %5732 = vmatprep.subr.bf16.mxu0 %v7441_v2  ;;  %5764 = vmatprep.subr.bf16.mxu1 %v7443_v30 }
 0x9bd   :  { %5734 = vmatpush1.bf16.msra.mxu0 %v7445_v60  ;;  %5766 = vmatpush1.bf16.msra.mxu1 %v7448_v56 }
 0x9be   :  { %5736 = vmatprep.subr.bf16.mxu0 %v7453_v54  ;;  %5768 = vmatprep.subr.bf16.mxu1 %v7455_v45 }
 0x9c1   :  { %5738 = vmatpush1.bf16.msra.mxu0 %v7457_v9  ;;  %5770 = vmatpush1.bf16.msra.mxu1 %v7460_v17 }
 0x9c2   :  { %5740 = vmatprep.subr.bf16.mxu0 %v7464_v1  ;;  %5772 = vmatprep.subr.bf16.mxu1 %v7466_v3 }
 0x9c5   :  { %5742 = vmatpush1.bf16.msra.mxu0 %v7469_v63  ;;  %5774 = vmatpush1.bf16.msra.mxu1 %v7473_v62 }
 0x9c6   :  { %5744 = vmatprep.subr.bf16.mxu0 %v7475_v59  ;;  %5776 = vmatprep.subr.bf16.mxu1 %v7477_v23 }
 0x9c9   :  { %5746 = vmatpush1.bf16.msra.mxu0 %v7480_v25  ;;  %5778 = vmatpush1.bf16.msra.mxu1 %v7484_v61 }
 0x9ca   :  { %5748 = vmatprep.subr.bf16.mxu0 %v7486_v31  ;;  %5780 = vmatprep.subr.bf16.mxu1 %v7489_v55 }
 0x9cd   :  { %5750 = vmatpush1.bf16.msra.mxu0 %v7492_v11  ;;  %5782 = vmatpush1.bf16.msra.mxu1 %v7496_v44 }
 0x9ce   :  { %5752 = vmatprep.subr.bf16.mxu0 %v7501_v8  ;;  %5784 = vmatprep.subr.bf16.mxu1 %v7503_v35 }
 0x9d1   :  { %5754 = vmatpush1.bf16.msra.mxu0 %v7505_v33  ;;  %5786 = vmatpush1.bf16.msra.mxu1 %v7508_v32 }
 0x9d2   :  { %5788 = vmatprep.subr.bf16.mxu0 %v7417_v41  ;;  %5820 = vmatprep.subr.bf16.mxu1 %v7419_v4 }
 0xa87   :  { %v3117_v12 = vpop.f32.mrb[18].mxu0  ;;  %v3188_v7 = vpop.f32.mrb[34].mxu1 }
 0xa88   :  { %v6189_v38 = vadd.f32 %v3117_v12, %v7563_v37  ;;  %v3119_v19 = vpop.f32.mrb[19].mxu0  ;;  %v3190_v46 = vpop.f32.mrb[35].mxu1  ;;  %v6205_v40 = vadd.f32 %v3188_v7, %v7578_v16  ;;  %v7681_v7 = vpack.c.bf16 %v3720_v51, %v3716_v13  ;;  %v3759_v13 = vld [vmem:[#allocation8 + $0x358] sm:$0xff] }
 0xa89   :  { %v6190_v22 = vadd.f32 %v3119_v19, %v7567_v58  ;;  %v6206_v52 = vadd.f32 %v3190_v46, %v7573_v20  ;;  %v3722_v19 = vld [vmem:[#allocation8 + $0x230] sm:$0xff] }
 0xa8a   :  { %v4865_v26 = vmul.f32 -1.442695, %v6189_v38  ;;  %v3718_v38 = vld [vmem:[#allocation8 + $0x210] sm:$0xff] }
 0xa8b   :  { %v4866_v43 = vmul.f32 -1.442695, %v6190_v22  ;;  %v4867_v29 = vmul.f32 -1.442695, %v6206_v52  ;;  %v7684_v46 = vpack.c.bf16 %v3722_v19, %v3718_v38  ;;  %v3725_v22 = vld [vmem:[#allocation8 + $0x248] sm:$0xff]  ;;  %v3763_v38 = vld [vmem:[#allocation8 + $0x378] sm:$0xff] }
 0xa8c   :  { %6420 = vpow2.f32 %v4865_v26  ;;  %v3729_v26 = vld [vmem:[#allocation8 + $0x268] sm:$0xff]  ;;  %v3756_v19 = vld [vmem:[#allocation8 + $0x340] sm:$0xff] }
 0xa8d   :  { %6422 = vpow2.f32 %v4866_v43  ;;  %v3727_v43 = vld [vmem:[#allocation8 + $0x258] sm:$0xff]  ;;  %v7689_v52 = vpack.c.bf16 %v3729_v26, %v3725_v22  ;;  %v3760_v22 = vld [vmem:[#allocation8 + $0x360] sm:$0xff]  ;;  %v7739_v26 = vpack.c.bf16 %v3763_v38, %v3759_v13 }
 0xa8e   :  { %6424 = vpow2.f32 %v4867_v29  ;;  %v3731_v29 = vld [vmem:[#allocation8 + $0x278] sm:$0xff] }
 0xa8f   :  { %6426 = vtanh.f32 %v6205_v40  ;;  %v3724_v40 = vld [vmem:[#allocation8 + $0x240] sm:$0xff] }
 0xa96   :  { %v6421_v41 = vpop.eup %6420 }
 0xa97   :  { %v6423_v10 = vpop.eup %6422  ;;  %v3200_v4 = vadd.f32 1.0, %v6421_v41  ;;  %v3728_v41 = vld [vmem:[#allocation8 + $0x260] sm:$0xff] }
 0xa98   :  { %v3206_v34 = vadd.f32 1.0, %v6423_v10  ;;  %v6425_v14 = vpop.eup %6424  ;;  %v7691_v10 = vpack.c.bf16 %v3731_v29, %v3727_v43  ;;  %v7741_v43 = vpack.c.bf16 %v3760_v22, %v3756_v19  ;;  %v3758_v29 = vld [vmem:[#allocation8 + $0x350] sm:$0xff] }
 0xa99   :  { %6428 = vrcp.f32 %v3200_v4  ;;  %v6427_v5 = vpop.eup %6426  ;;  %v3213_v28 = vadd.f32 1.0, %v6425_v14  ;;  %v7693_v4 = vpack.c.bf16 %v3728_v41, %v3724_v40  ;;  %v3730_v14 = vld [vmem:[#allocation8 + $0x270] sm:$0xff]  ;;  %v3765_v41 = vld [vmem:[#allocation8 + $0x388] sm:$0xff] }
 0xa9a   :  { %6430 = vrcp.f32 %v3206_v34  ;;  %v3726_v34 = vld [vmem:[#allocation8 + $0x250] sm:$0xff] }
 0xa9b   :  { %6432 = vrcp.f32 %v3213_v28  ;;  %v3762_v40 = vld [vmem:[#allocation8 + $0x370] sm:$0xff] }
 0xaa3   :  { %v6429_v47 = vpop.eup %6428 }
 0xaa4   :  { %v6431_v27 = vpop.eup %6430  ;;  %v3218_v49 = vmul.f32 %v6429_v47, %v6427_v5  ;;  %v7696_v5 = vpack.c.bf16 %v3730_v14, %v3726_v34  ;;  %v3733_v47 = vld [vmem:[#allocation8 + $0x288] sm:$0xff]  ;;  %v7744_v34 = vpack.c.bf16 %v3762_v40, %v3758_v29 }
 0xaa5   :  { %v3217_v57 = vmul.f32 %v6431_v27, %v7581_v21  ;;  %v6433_v15 = vpop.eup %6432  ;;  %v3723_v21 = vld [vmem:[#allocation8 + $0x238] sm:$0xff]  ;;  %v3737_v27 = vld [vmem:[#allocation8 + $0x2a8] sm:$0xff] }
 0xaa6   :  { %v7701_v28 = vpack.c.bf16 %v3737_v27, %v3733_v47  ;;  %v3769_v14 = vld [vmem:[#allocation8 + $0x3a8] sm:$0xff]  ;;  %v3767_v47 = vld [vmem:[#allocation8 + $0x398] sm:$0xff] }
 0xaa7   :  { %v7626_v18 = vadd.f32 %v3218_v49, %v3217_v57  ;;  %v3735_v49 = vld [vmem:[#allocation8 + $0x298] sm:$0xff] }
 0xaa8   :  { %v3739_v57 = vld [vmem:[#allocation8 + $0x2b8] sm:$0xff] }
 0xaa9   :  { %6434 = vtanh.f32 %v7626_v18  ;;  %v3771_v27 = vld [vmem:[#allocation8 + $0x3b8] sm:$0xff] }
 0xab3   :  { %v6435_v39 = vpop.eup %6434 }
 0xab4   :  { %v3221_v36 = vmul.f32 %v6435_v39, %v6433_v15  ;;  %v3736_v15 = vld [vmem:[#allocation8 + $0x2a0] sm:$0xff]  ;;  %v7703_v39 = vpack.c.bf16 %v3739_v57, %v3735_v49  ;;  %v7747_v49 = vpack.c.bf16 %v3769_v14, %v3765_v41  ;;  %v7749_v57 = vpack.c.bf16 %v3771_v27, %v3767_v47 }
 0xab6   :  { %3224 = vst [vmem:[%s7986_s8 + $0x8] sm:$0xff] %v3221_v36  ;;  %3359 = vmatmul.mubr.f32.vlgmr.msra.gmra.mrb[20].mxu0 %v3221_v36  ;;  %3430 = vmatmul.mubr.f32.vlgmr.msra.gmra.mrb[36].mxu1 %v3221_v36 }
 0xab7   :  { %5790 = vmatpush1.bf16.msra.mxu0 %v7421_v50  ;;  %5822 = vmatpush1.bf16.msra.mxu1 %v7424_v24 }
 0xab8   :  { %5792 = vmatprep.subr.bf16.mxu0 %v7429_v48  ;;  %5824 = vmatprep.subr.bf16.mxu1 %v7431_v53 }
 0xab9   :  { %3601 = vmatprep.mubr.f32.mxu0 %v7994_v0  ;;  %3672 = vmatprep.mubr.f32.mxu1 %v7994_v0 }
 0xabb   :  { %5794 = vmatpush1.bf16.msra.mxu0 %v7433_v6  ;;  %5826 = vmatpush1.bf16.msra.mxu1 %v7436_v42 }
 0xabc   :  { %5796 = vmatprep.subr.bf16.mxu0 %v7441_v2  ;;  %5828 = vmatprep.subr.bf16.mxu1 %v7443_v30 }
 0xabf   :  { %5798 = vmatpush1.bf16.msra.mxu0 %v7445_v60  ;;  %5830 = vmatpush1.bf16.msra.mxu1 %v7448_v56 }
 0xac0   :  { %5800 = vmatprep.subr.bf16.mxu0 %v7453_v54  ;;  %5832 = vmatprep.subr.bf16.mxu1 %v7455_v45 }
 0xac3   :  { %5802 = vmatpush1.bf16.msra.mxu0 %v7457_v9  ;;  %5834 = vmatpush1.bf16.msra.mxu1 %v7460_v17 }
 0xac4   :  { %5804 = vmatprep.subr.bf16.mxu0 %v7464_v1  ;;  %5836 = vmatprep.subr.bf16.mxu1 %v7466_v3 }
 0xac7   :  { %5806 = vmatpush1.bf16.msra.mxu0 %v7469_v63  ;;  %5838 = vmatpush1.bf16.msra.mxu1 %v7473_v62 }
 0xac8   :  { %5808 = vmatprep.subr.bf16.mxu0 %v7475_v59  ;;  %5840 = vmatprep.subr.bf16.mxu1 %v7477_v23 }
 0xacb   :  { %5810 = vmatpush1.bf16.msra.mxu0 %v7480_v25  ;;  %5842 = vmatpush1.bf16.msra.mxu1 %v7484_v61 }
 0xacc   :  { %5812 = vmatprep.subr.bf16.mxu0 %v7486_v31  ;;  %5844 = vmatprep.subr.bf16.mxu1 %v7489_v55 }
 0xacf   :  { %5814 = vmatpush1.bf16.msra.mxu0 %v7492_v11  ;;  %5846 = vmatpush1.bf16.msra.mxu1 %v7496_v44 }
 0xad0   :  { %5816 = vmatprep.subr.bf16.mxu0 %v7501_v8  ;;  %5848 = vmatprep.subr.bf16.mxu1 %v7503_v35  ;;  %v3717_v8 = vld [vmem:[#allocation8 + $0x208] sm:$0xff] }
 0xad1   :  { %v3721_v35 = vld [vmem:[#allocation8 + $0x228] sm:$0xff] }
 0xad3   :  { %5818 = vmatpush1.bf16.msra.mxu0 %v7505_v33  ;;  %5850 = vmatpush1.bf16.msra.mxu1 %v7508_v32  ;;  %v3719_v33 = vld [vmem:[#allocation8 + $0x218] sm:$0xff]  ;;  %v7677_v32 = vpack.c.bf16 %v3721_v35, %v3717_v8  ;;  %v3754_v8 = vld [vmem:[#allocation8 + $0x330] sm:$0xff] }
 0xad4   :  { %v7679_v12 = vpack.c.bf16 %v3723_v21, %v3719_v33  ;;  %v3757_v33 = vld [vmem:[#allocation8 + $0x348] sm:$0xff] }
 0xad5   :  { %5852 = vmatprep.subr.bf16.mxu0 %v7677_v32  ;;  %v3761_v21 = vld [vmem:[#allocation8 + $0x368] sm:$0xff] }
 0xad6   :  { %5884 = vmatprep.subr.bf16.mxu1 %v7679_v12  ;;  %v7736_v51 = vpack.c.bf16 %v3761_v21, %v3757_v33 }
 0xb89   :  { %v3360_v50 = vpop.f32.mrb[20].mxu0  ;;  %v3431_v24 = vpop.f32.mrb[36].mxu1 }
 0xb8a   :  { %v6191_v48 = vadd.f32 %v3360_v50, %v7563_v37  ;;  %v3362_v53 = vpop.f32.mrb[21].mxu0  ;;  %v3433_v6 = vpop.f32.mrb[37].mxu1  ;;  %v6207_v54 = vadd.f32 %v3431_v24, %v7578_v16  ;;  %v3734_v50 = vld [vmem:[#allocation8 + $0x290] sm:$0xff] }
 0xb8b   :  { %v6192_v42 = vadd.f32 %v3362_v53, %v7567_v58  ;;  %v6208_v60 = vadd.f32 %v3433_v6, %v7573_v20  ;;  %v3738_v24 = vld [vmem:[#allocation8 + $0x2b0] sm:$0xff]  ;;  %v3741_v53 = vld [vmem:[#allocation8 + $0x2c8] sm:$0xff] }
 0xb8c   :  { %v4868_v2 = vmul.f32 -1.442695, %v6191_v48  ;;  %v7708_v48 = vpack.c.bf16 %v3738_v24, %v3734_v50  ;;  %v3745_v6 = vld [vmem:[#allocation8 + $0x2e8] sm:$0xff]  ;;  %v3766_v50 = vld [vmem:[#allocation8 + $0x390] sm:$0xff] }
 0xb8d   :  { %v4869_v30 = vmul.f32 -1.442695, %v6192_v42  ;;  %v4870_v56 = vmul.f32 -1.442695, %v6208_v60  ;;  %v3743_v42 = vld [vmem:[#allocation8 + $0x2d8] sm:$0xff]  ;;  %v3740_v60 = vld [vmem:[#allocation8 + $0x2c0] sm:$0xff] }
 0xb8e   :  { %6436 = vpow2.f32 %v4868_v2  ;;  %v7713_v2 = vpack.c.bf16 %v3745_v6, %v3741_v53  ;;  %v3770_v53 = vld [vmem:[#allocation8 + $0x3b0] sm:$0xff]  ;;  %v3773_v6 = vld [vmem:[#allocation8 + $0x3c8] sm:$0xff] }
 0xb8f   :  { %6438 = vpow2.f32 %v4869_v30  ;;  %v3747_v30 = vld [vmem:[#allocation8 + $0x2f8] sm:$0xff] }
 0xb90   :  { %6440 = vpow2.f32 %v4870_v56  ;;  %v3744_v56 = vld [vmem:[#allocation8 + $0x2e0] sm:$0xff] }
 0xb91   :  { %6442 = vtanh.f32 %v6207_v54  ;;  %v7715_v54 = vpack.c.bf16 %v3747_v30, %v3743_v42  ;;  %v3777_v42 = vld [vmem:[#allocation8 + $0x3e8] sm:$0xff]  ;;  %v7756_v30 = vpack.c.bf16 %v3770_v53, %v3766_v50 }
 0xb98   :  { %v6437_v45 = vpop.eup %6436 }
 0xb99   :  { %v6439_v9 = vpop.eup %6438  ;;  %v3443_v17 = vadd.f32 1.0, %v6437_v45  ;;  %v7717_v45 = vpack.c.bf16 %v3744_v56, %v3740_v60  ;;  %v7758_v60 = vpack.c.bf16 %v3777_v42, %v3773_v6  ;;  %v3775_v56 = vld [vmem:[#allocation8 + $0x3d8] sm:$0xff] }
 0xb9a   :  { %v3449_v1 = vadd.f32 1.0, %v6439_v9  ;;  %v6441_v3 = vpop.eup %6440  ;;  %v3742_v9 = vld [vmem:[#allocation8 + $0x2d0] sm:$0xff] }
 0xb9b   :  { %6444 = vrcp.f32 %v3443_v17  ;;  %v6443_v63 = vpop.eup %6442  ;;  %v3456_v25 = vadd.f32 1.0, %v6441_v3  ;;  %v3746_v17 = vld [vmem:[#allocation8 + $0x2f0] sm:$0xff]  ;;  %v3749_v3 = vld [vmem:[#allocation8 + $0x308] sm:$0xff] }
 0xb9c   :  { %6446 = vrcp.f32 %v3449_v1  ;;  %v7720_v1 = vpack.c.bf16 %v3746_v17, %v3742_v9  ;;  %v3779_v9 = vld [vmem:[#allocation8 + $0x3f8] sm:$0xff]  ;;  %v3772_v17 = vld [vmem:[#allocation8 + $0x3c0] sm:$0xff] }
 0xb9d   :  { %6448 = vrcp.f32 %v3456_v25  ;;  %v3748_v25 = vld [vmem:[#allocation8 + $0x300] sm:$0xff] }
 0xba5   :  { %v6445_v62 = vpop.eup %6444 }
 0xba6   :  { %v6447_v59 = vpop.eup %6446  ;;  %v3461_v23 = vmul.f32 %v6445_v62, %v6443_v63  ;;  %v3753_v63 = vld [vmem:[#allocation8 + $0x328] sm:$0xff]  ;;  %v3751_v62 = vld [vmem:[#allocation8 + $0x318] sm:$0xff] }
 0xba7   :  { %v3460_v61 = vmul.f32 %v6447_v59, %v7626_v18  ;;  %v6449_v55 = vpop.eup %6448  ;;  %v3732_v18 = vld [vmem:[#allocation8 + $0x280] sm:$0xff]  ;;  %v7725_v59 = vpack.c.bf16 %v3753_v63, %v3749_v3  ;;  %v7761_v3 = vpack.c.bf16 %v3779_v9, %v3775_v56 }
 0xba8   :  { %v7705_v36 = vpack.c.bf16 %v3736_v15, %v3732_v18  ;;  %v3764_v18 = vld [vmem:[#allocation8 + $0x380] sm:$0xff] }
 0xba9   :  { %v7669_v31 = vadd.f32 %v3461_v23, %v3460_v61  ;;  %v3755_v23 = vld [vmem:[#allocation8 + $0x338] sm:$0xff]  ;;  %v3752_v61 = vld [vmem:[#allocation8 + $0x320] sm:$0xff] }
 0xbaa   :  { %v3768_v15 = vld [vmem:[#allocation8 + $0x3a0] sm:$0xff] }
 0xbab   :  { %6450 = vtanh.f32 %v7669_v31  ;;  %v7752_v24 = vpack.c.bf16 %v3768_v15, %v3764_v18  ;;  %v3776_v63 = vld [vmem:[#allocation8 + $0x3e0] sm:$0xff] }
 0xbb5   :  { %v6451_v11 = vpop.eup %6450 }
 0xbb6   :  { %v3464_v44 = vmul.f32 %v6451_v11, %v6449_v55  ;;  %v7727_v55 = vpack.c.bf16 %v3755_v23, %v3751_v62  ;;  %v7729_v11 = vpack.c.bf16 %v3752_v61, %v3748_v25  ;;  %v3774_v62 = vld [vmem:[#allocation8 + $0x3d0] sm:$0xff]  ;;  %v7764_v25 = vpack.c.bf16 %v3776_v63, %v3772_v17 }
 0xbb7   :  { %v3778_v23 = vld [vmem:[#allocation8 + $0x3f0] sm:$0xff] }
 0xbb8   :  { %3467 = vst [vmem:[%s7986_s8 + $0x10] sm:$0xff] %v3464_v44  ;;  %3602 = vmatmul.mubr.f32.vlgmr.msra.gmra.mrb[22].mxu0 %v3464_v44  ;;  %3673 = vmatmul.mubr.f32.vlgmr.msra.gmra.mrb[38].mxu1 %v3464_v44  ;;  %v3750_v44 = vld [vmem:[#allocation8 + $0x310] sm:$0xff]  ;;  %v7768_v61 = vpack.c.bf16 %v3778_v23, %v3774_v62 }
 0xbb9   :  { %3844 = vmatprep.mubr.f32.mxu0 %v7994_v0  ;;  %3915 = vmatprep.mubr.f32.mxu1 %v7994_v0  ;;  %v7732_v35 = vpack.c.bf16 %v3754_v8, %v3750_v44 }
 0xbba   :  { %5854 = vmatpush1.bf16.msra.mxu0 %v7681_v7  ;;  %5886 = vmatpush1.bf16.msra.mxu1 %v7684_v46 }
 0xbbb   :  { %5856 = vmatprep.subr.bf16.mxu0 %v7689_v52  ;;  %5888 = vmatprep.subr.bf16.mxu1 %v7691_v10 }
 0xbbe   :  { %5858 = vmatpush1.bf16.msra.mxu0 %v7693_v4  ;;  %5890 = vmatpush1.bf16.msra.mxu1 %v7696_v5 }
 0xbbf   :  { %5860 = vmatprep.subr.bf16.mxu0 %v7701_v28  ;;  %5892 = vmatprep.subr.bf16.mxu1 %v7703_v39 }
 0xbc2   :  { %5862 = vmatpush1.bf16.msra.mxu0 %v7705_v36  ;;  %5894 = vmatpush1.bf16.msra.mxu1 %v7708_v48 }
 0xbc3   :  { %5864 = vmatprep.subr.bf16.mxu0 %v7713_v2  ;;  %5896 = vmatprep.subr.bf16.mxu1 %v7715_v54 }
 0xbc6   :  { %5866 = vmatpush1.bf16.msra.mxu0 %v7717_v45  ;;  %5898 = vmatpush1.bf16.msra.mxu1 %v7720_v1 }
 0xbc7   :  { %5868 = vmatprep.subr.bf16.mxu0 %v7725_v59  ;;  %5900 = vmatprep.subr.bf16.mxu1 %v7727_v55 }
 0xbca   :  { %5870 = vmatpush1.bf16.msra.mxu0 %v7729_v11  ;;  %5902 = vmatpush1.bf16.msra.mxu1 %v7732_v35 }
 0xbcb   :  { %5872 = vmatprep.subr.bf16.mxu0 %v7736_v51  ;;  %5904 = vmatprep.subr.bf16.mxu1 %v7739_v26 }
 0xbce   :  { %5874 = vmatpush1.bf16.msra.mxu0 %v7741_v43  ;;  %5906 = vmatpush1.bf16.msra.mxu1 %v7744_v34 }
 0xbcf   :  { %5876 = vmatprep.subr.bf16.mxu0 %v7747_v49  ;;  %5908 = vmatprep.subr.bf16.mxu1 %v7749_v57 }
 0xbd2   :  { %5878 = vmatpush1.bf16.msra.mxu0 %v7752_v24  ;;  %5910 = vmatpush1.bf16.msra.mxu1 %v7756_v30 }
 0xbd3   :  { %5880 = vmatprep.subr.bf16.mxu0 %v7758_v60  ;;  %5912 = vmatprep.subr.bf16.mxu1 %v7761_v3 }
 0xbd6   :  { %5882 = vmatpush1.bf16.msra.mxu0 %v7764_v25  ;;  %5914 = vmatpush1.bf16.msra.mxu1 %v7768_v61 }
 0xbd7   :  { %5916 = vmatprep.subr.bf16.mxu0 %v7677_v32  ;;  %5948 = vmatprep.subr.bf16.mxu1 %v7679_v12 }
 0xc8b   :  { %v3603_v44 = vpop.f32.mrb[22].mxu0  ;;  %v3674_v8 = vpop.f32.mrb[38].mxu1 }
 0xc8c   :  { %v6193_v33 = vadd.f32 %v3603_v44, %v7563_v37  ;;  %v3605_v21 = vpop.f32.mrb[23].mxu0  ;;  %v3676_v13 = vpop.f32.mrb[39].mxu1  ;;  %v6209_v41 = vadd.f32 %v3674_v8, %v7578_v16 }
 0xc8d   :  { %v6194_v38 = vadd.f32 %v3605_v21, %v7567_v58  ;;  %v6210_v29 = vadd.f32 %v3676_v13, %v7573_v20 }
 0xc8e   :  { %v4871_v19 = vmul.f32 -1.442695, %v6193_v33 }
 0xc8f   :  { %v4872_v22 = vmul.f32 -1.442695, %v6194_v38  ;;  %v4873_v40 = vmul.f32 -1.442695, %v6210_v29 }
 0xc90   :  { %6452 = vpow2.f32 %v4871_v19 }
 0xc91   :  { %6454 = vpow2.f32 %v4872_v22 }
 0xc92   :  { %6456 = vpow2.f32 %v4873_v40 }
 0xc93   :  { %6458 = vtanh.f32 %v6209_v41 }
 0xc9a   :  { %v6453_v14 = vpop.eup %6452 }
 0xc9b   :  { %v6455_v47 = vpop.eup %6454  ;;  %v3686_v27 = vadd.f32 1.0, %v6453_v14 }
 0xc9c   :  { %v3692_v18 = vadd.f32 1.0, %v6455_v47  ;;  %v6457_v15 = vpop.eup %6456 }
 0xc9d   :  { %6460 = vrcp.f32 %v3686_v27  ;;  %v6459_v50 = vpop.eup %6458  ;;  %v3699_v56 = vadd.f32 1.0, %v6457_v15 }
 0xc9e   :  { %6462 = vrcp.f32 %v3692_v18 }
 0xc9f   :  { %6464 = vrcp.f32 %v3699_v56 }
 0xca7   :  { %v6461_v53 = vpop.eup %6460 }
 0xca8   :  { %v6463_v6 = vpop.eup %6462  ;;  %v3704_v42 = vmul.f32 %v6461_v53, %v6459_v50 }
 0xca9   :  { %v3703_v9 = vmul.f32 %v6463_v6, %v7669_v31  ;;  %v6465_v63 = vpop.eup %6464 }
 0xcab   :  { %v7780_v17 = vadd.f32 %v3704_v42, %v3703_v9 }
 0xcad   :  { %6466 = vtanh.f32 %v7780_v17 }
 0xcb7   :  { %v6467_v62 = vpop.eup %6466 }
 0xcb8   :  { %v3707_v23 = vmul.f32 %v6467_v62, %v6465_v63 }
 0xcba   :  { %3710 = vst [vmem:[%s7986_s8 + $0x18] sm:$0xff] %v3707_v23  ;;  %3845 = vmatmul.mubr.f32.vlgmr.msra.gmra.mrb[24].mxu0 %v3707_v23  ;;  %3916 = vmatmul.mubr.f32.vlgmr.msra.gmra.mrb[40].mxu1 %v3707_v23 }
 0xcbb   :  { %5918 = vmatpush1.bf16.msra.mxu0 %v7681_v7  ;;  %5950 = vmatpush1.bf16.msra.mxu1 %v7684_v46 }
 0xcbc   :  { %5920 = vmatprep.subr.bf16.mxu0 %v7689_v52  ;;  %5952 = vmatprep.subr.bf16.mxu1 %v7691_v10 }
 0xcbd   :  { %4087 = vmatprep.mubr.f32.mxu0 %v7994_v0  ;;  %4158 = vmatprep.mubr.f32.mxu1 %v7994_v0 }
 0xcbf   :  { %5922 = vmatpush1.bf16.msra.mxu0 %v7693_v4  ;;  %5954 = vmatpush1.bf16.msra.mxu1 %v7696_v5 }
 0xcc0   :  { %5924 = vmatprep.subr.bf16.mxu0 %v7701_v28  ;;  %5956 = vmatprep.subr.bf16.mxu1 %v7703_v39 }
 0xcc3   :  { %5926 = vmatpush1.bf16.msra.mxu0 %v7705_v36  ;;  %5958 = vmatpush1.bf16.msra.mxu1 %v7708_v48 }
 0xcc4   :  { %5928 = vmatprep.subr.bf16.mxu0 %v7713_v2  ;;  %5960 = vmatprep.subr.bf16.mxu1 %v7715_v54 }
 0xcc7   :  { %5930 = vmatpush1.bf16.msra.mxu0 %v7717_v45  ;;  %5962 = vmatpush1.bf16.msra.mxu1 %v7720_v1 }
 0xcc8   :  { %5932 = vmatprep.subr.bf16.mxu0 %v7725_v59  ;;  %5964 = vmatprep.subr.bf16.mxu1 %v7727_v55 }
 0xccb   :  { %5934 = vmatpush1.bf16.msra.mxu0 %v7729_v11  ;;  %5966 = vmatpush1.bf16.msra.mxu1 %v7732_v35 }
 0xccc   :  { %5936 = vmatprep.subr.bf16.mxu0 %v7736_v51  ;;  %5968 = vmatprep.subr.bf16.mxu1 %v7739_v26 }
 0xccf   :  { %5938 = vmatpush1.bf16.msra.mxu0 %v7741_v43  ;;  %5970 = vmatpush1.bf16.msra.mxu1 %v7744_v34 }
 0xcd0   :  { %5940 = vmatprep.subr.bf16.mxu0 %v7747_v49  ;;  %5972 = vmatprep.subr.bf16.mxu1 %v7749_v57 }
 0xcd3   :  { %5942 = vmatpush1.bf16.msra.mxu0 %v7752_v24  ;;  %5974 = vmatpush1.bf16.msra.mxu1 %v7756_v30 }
 0xcd4   :  { %5944 = vmatprep.subr.bf16.mxu0 %v7758_v60  ;;  %5976 = vmatprep.subr.bf16.mxu1 %v7761_v3 }
 0xcd7   :  { %5946 = vmatpush1.bf16.msra.mxu0 %v7764_v25  ;;  %5978 = vmatpush1.bf16.msra.mxu1 %v7768_v61 }
 0xcd8   :  { %5980 = vmatprep.subr.bf16.mxu0 %v7677_v32  ;;  %6012 = vmatprep.subr.bf16.mxu1 %v7679_v12 }
 0xd8d   :  { %v3846_v31 = vpop.f32.mrb[24].mxu0  ;;  %v3917_v44 = vpop.f32.mrb[40].mxu1 }
 0xd8e   :  { %v6195_v8 = vadd.f32 %v3846_v31, %v7563_v37  ;;  %v3848_v33 = vpop.f32.mrb[25].mxu0  ;;  %v3919_v21 = vpop.f32.mrb[41].mxu1  ;;  %v6211_v40 = vadd.f32 %v3917_v44, %v7578_v16 }
 0xd8f   :  { %v6196_v13 = vadd.f32 %v3848_v33, %v7567_v58  ;;  %v6212_v22 = vadd.f32 %v3919_v21, %v7573_v20 }
 0xd90   :  { %v4874_v38 = vmul.f32 -1.442695, %v6195_v8 }
 0xd91   :  { %v4875_v19 = vmul.f32 -1.442695, %v6196_v13  ;;  %v4876_v29 = vmul.f32 -1.442695, %v6212_v22 }
 0xd92   :  { %6468 = vpow2.f32 %v4874_v38 }
 0xd93   :  { %6470 = vpow2.f32 %v4875_v19 }
 0xd94   :  { %6472 = vpow2.f32 %v4876_v29 }
 0xd95   :  { %6474 = vtanh.f32 %v6211_v40 }
 0xd9c   :  { %v6469_v41 = vpop.eup %6468 }
 0xd9d   :  { %v6471_v14 = vpop.eup %6470  ;;  %v3929_v47 = vadd.f32 1.0, %v6469_v41 }
 0xd9e   :  { %v3935_v27 = vadd.f32 1.0, %v6471_v14  ;;  %v6473_v18 = vpop.eup %6472 }
 0xd9f   :  { %6476 = vrcp.f32 %v3929_v47  ;;  %v6475_v15 = vpop.eup %6474  ;;  %v3942_v42 = vadd.f32 1.0, %v6473_v18 }
 0xda0   :  { %6478 = vrcp.f32 %v3935_v27 }
 0xda1   :  { %6480 = vrcp.f32 %v3942_v42 }
 0xda9   :  { %v6477_v50 = vpop.eup %6476 }
 0xdaa   :  { %v6479_v53 = vpop.eup %6478  ;;  %v3947_v6 = vmul.f32 %v6477_v50, %v6475_v15 }
 0xdab   :  { %v3946_v56 = vmul.f32 %v6479_v53, %v7780_v17  ;;  %v6481_v63 = vpop.eup %6480 }
 0xdad   :  { %v7825_v9 = vadd.f32 %v3947_v6, %v3946_v56 }
 0xdaf   :  { %6482 = vtanh.f32 %v7825_v9 }
 0xdb9   :  { %v6483_v62 = vpop.eup %6482 }
 0xdba   :  { %v7828_v23 = vmul.f32 %v6483_v62, %v6481_v63  ;;  %v4695_v62 = vld [vmem:[#allocation11 + $0x20] sm:$0xff] }
 0xdbc   :  { %3953 = vst [vmem:[%s7986_s8 + $0x20] sm:$0xff] %v7828_v23  ;;  %4088 = vmatmul.mubr.f32.vlgmr.msra.gmra.mrb[26].mxu0 %v7828_v23  ;;  %4159 = vmatmul.mubr.f32.vlgmr.msra.gmra.mrb[42].mxu1 %v7828_v23 }
 0xdbd   :  { %5982 = vmatpush1.bf16.msra.mxu0 %v7681_v7  ;;  %6014 = vmatpush1.bf16.msra.mxu1 %v7684_v46 }
 0xdbe   :  { %5984 = vmatprep.subr.bf16.mxu0 %v7689_v52  ;;  %6016 = vmatprep.subr.bf16.mxu1 %v7691_v10 }
 0xdbf   :  { %4330 = vmatprep.mubr.f32.mxu0 %v7994_v0  ;;  %4401 = vmatprep.mubr.f32.mxu1 %v7994_v0 }
 0xdc1   :  { %5986 = vmatpush1.bf16.msra.mxu0 %v7693_v4  ;;  %6018 = vmatpush1.bf16.msra.mxu1 %v7696_v5 }
 0xdc2   :  { %5988 = vmatprep.subr.bf16.mxu0 %v7701_v28  ;;  %6020 = vmatprep.subr.bf16.mxu1 %v7703_v39 }
 0xdc5   :  { %5990 = vmatpush1.bf16.msra.mxu0 %v7705_v36  ;;  %6022 = vmatpush1.bf16.msra.mxu1 %v7708_v48 }
 0xdc6   :  { %5992 = vmatprep.subr.bf16.mxu0 %v7713_v2  ;;  %6024 = vmatprep.subr.bf16.mxu1 %v7715_v54 }
 0xdc9   :  { %5994 = vmatpush1.bf16.msra.mxu0 %v7717_v45  ;;  %6026 = vmatpush1.bf16.msra.mxu1 %v7720_v1 }
 0xdca   :  { %5996 = vmatprep.subr.bf16.mxu0 %v7725_v59  ;;  %6028 = vmatprep.subr.bf16.mxu1 %v7727_v55 }
 0xdcd   :  { %5998 = vmatpush1.bf16.msra.mxu0 %v7729_v11  ;;  %6030 = vmatpush1.bf16.msra.mxu1 %v7732_v35 }
 0xdce   :  { %6000 = vmatprep.subr.bf16.mxu0 %v7736_v51  ;;  %6032 = vmatprep.subr.bf16.mxu1 %v7739_v26 }
 0xdd1   :  { %6002 = vmatpush1.bf16.msra.mxu0 %v7741_v43  ;;  %6034 = vmatpush1.bf16.msra.mxu1 %v7744_v34 }
 0xdd2   :  { %6004 = vmatprep.subr.bf16.mxu0 %v7747_v49  ;;  %6036 = vmatprep.subr.bf16.mxu1 %v7749_v57 }
 0xdd5   :  { %6006 = vmatpush1.bf16.msra.mxu0 %v7752_v24  ;;  %6038 = vmatpush1.bf16.msra.mxu1 %v7756_v30 }
 0xdd6   :  { %6008 = vmatprep.subr.bf16.mxu0 %v7758_v60  ;;  %6040 = vmatprep.subr.bf16.mxu1 %v7761_v3 }
 0xdd9   :  { %6010 = vmatpush1.bf16.msra.mxu0 %v7764_v25  ;;  %6042 = vmatpush1.bf16.msra.mxu1 %v7768_v61 }
 0xdda   :  { %6044 = vmatprep.subr.bf16.mxu0 %v7677_v32  ;;  %6076 = vmatprep.subr.bf16.mxu1 %v7679_v12 }
 0xe8f   :  { %v4089_v17 = vpop.f32.mrb[26].mxu0  ;;  %v4160_v31 = vpop.f32.mrb[42].mxu1 }
 0xe90   :  { %v6197_v44 = vadd.f32 %v4089_v17, %v7563_v37  ;;  %v4091_v8 = vpop.f32.mrb[27].mxu0  ;;  %v4162_v33 = vpop.f32.mrb[43].mxu1  ;;  %v6213_v29 = vadd.f32 %v4160_v31, %v7578_v16  ;;  %v4696_v17 = vld [vmem:[#allocation11 + $0x28] sm:$0xff]  ;;  %v4683_v31 = vld [vmem:[%s7986_s8] sm:$0xff] }
 0xe91   :  { %v6198_v21 = vadd.f32 %v4091_v8, %v7567_v58  ;;  %v6214_v19 = vadd.f32 %v4162_v33, %v7573_v20  ;;  %v4697_v8 = vld [vmem:[#allocation11 + $0x30] sm:$0xff]  ;;  %v4698_v33 = vld [vmem:[#allocation11 + $0x38] sm:$0xff] }
 0xe92   :  { %v4877_v13 = vmul.f32 -1.442695, %v6197_v44  ;;  %v6115_v44 = vpack.c.bf16 %v4696_v17, %v4695_v62 }
 0xe93   :  { %v4878_v38 = vmul.f32 -1.442695, %v6198_v21  ;;  %v4879_v22 = vmul.f32 -1.442695, %v6214_v19  ;;  %v6119_v21 = vpack.c.bf16 %v4698_v33, %v4697_v8 }
 0xe94   :  { %6484 = vpow2.f32 %v4877_v13  ;;  %v4699_v13 = vld [vmem:[#allocation11 + $0x40] sm:$0xff] }
 0xe95   :  { %6486 = vpow2.f32 %v4878_v38  ;;  %v4700_v38 = vld [vmem:[#allocation11 + $0x48] sm:$0xff] }
 0xe96   :  { %6488 = vpow2.f32 %v4879_v22  ;;  %v6123_v19 = vpack.c.bf16 %v4700_v38, %v4699_v13  ;;  %v4701_v22 = vld [vmem:[#allocation11 + $0x50] sm:$0xff] }
 0xe97   :  { %6490 = vtanh.f32 %v6213_v29  ;;  %v4702_v29 = vld [vmem:[#allocation11 + $0x58] sm:$0xff] }
 0xe9e   :  { %v6485_v32 = vpop.eup %6484 }
 0xe9f   :  { %v6487_v40 = vpop.eup %6486  ;;  %v4172_v12 = vadd.f32 1.0, %v6485_v32  ;;  %v6127_v32 = vpack.c.bf16 %v4702_v29, %v4701_v22 }
 0xea0   :  { %v4178_v41 = vadd.f32 1.0, %v6487_v40  ;;  %v6489_v14 = vpop.eup %6488  ;;  %v4703_v40 = vld [vmem:[#allocation11 + $0x60] sm:$0xff] }
 0xea1   :  { %6492 = vrcp.f32 %v4172_v12  ;;  %v6491_v47 = vpop.eup %6490  ;;  %v4185_v50 = vadd.f32 1.0, %v6489_v14  ;;  %v4704_v12 = vld [vmem:[#allocation11 + $0x68] sm:$0xff]  ;;  %v4705_v14 = vld [vmem:[#allocation11 + $0x70] sm:$0xff] }
 0xea2   :  { %6494 = vrcp.f32 %v4178_v41  ;;  %v6131_v41 = vpack.c.bf16 %v4704_v12, %v4703_v40 }
 0xea3   :  { %6496 = vrcp.f32 %v4185_v50  ;;  %v4686_v50 = vld [vmem:[%s7986_s8 + $0x18] sm:$0xff] }
 0xeab   :  { %v6493_v27 = vpop.eup %6492 }
 0xeac   :  { %v6495_v18 = vpop.eup %6494  ;;  %v4190_v15 = vmul.f32 %v6493_v27, %v6491_v47  ;;  %v4706_v47 = vld [vmem:[#allocation11 + $0x78] sm:$0xff] }
 0xead   :  { %v4189_v53 = vmul.f32 %v6495_v18, %v7825_v9  ;;  %v6497_v42 = vpop.eup %6496  ;;  %v6135_v27 = vpack.c.bf16 %v4706_v47, %v4705_v14  ;;  %v4684_v18 = vld [vmem:[%s7986_s8 + $0x8] sm:$0xff] }
 0xeaf   :  { %v7875_v6 = vadd.f32 %v4190_v15, %v4189_v53  ;;  %v4685_v15 = vld [vmem:[%s7986_s8 + $0x10] sm:$0xff] }
 0xeb1   :  { %6498 = vtanh.f32 %v7875_v6 }
 0xebb   :  { %v6499_v56 = vpop.eup %6498 }
 0xebc   :  { %v7878_v63 = vmul.f32 %v6499_v56, %v6497_v42 }
 0xebe   :  { %4196 = vst [vmem:[%s7986_s8 + $0x28] sm:$0xff] %v7878_v63  ;;  %4331 = vmatmul.mubr.f32.vlgmr.msra.gmra.mrb[28].mxu0 %v7878_v63  ;;  %4402 = vmatmul.mubr.f32.vlgmr.msra.gmra.mrb[44].mxu1 %v7878_v63 }
 0xebf   :  { %6046 = vmatpush1.bf16.msra.mxu0 %v7681_v7  ;;  %6078 = vmatpush1.bf16.msra.mxu1 %v7684_v46  ;;  %v4692_v7 = vld [vmem:[#allocation11 + $0x8] sm:$0xff] }
 0xec0   :  { %6048 = vmatprep.subr.bf16.mxu0 %v7689_v52  ;;  %6080 = vmatprep.subr.bf16.mxu1 %v7691_v10 }
 0xec1   :  { %4573 = vmatprep.mubr.f32.mxu0 %v7994_v0  ;;  %4644 = vmatprep.mubr.f32.mxu1 %v7994_v0  ;;  %v4691_v0 = vld [vmem:[#allocation11] sm:$0xff] }
 0xec2   :  { %v6107_v46 = vpack.c.bf16 %v4692_v7, %v4691_v0 }
 0xec3   :  { %6050 = vmatpush1.bf16.msra.mxu0 %v7693_v4  ;;  %6082 = vmatpush1.bf16.msra.mxu1 %v7696_v5 }
 0xec4   :  { %6052 = vmatprep.subr.bf16.mxu0 %v7701_v28  ;;  %6084 = vmatprep.subr.bf16.mxu1 %v7703_v39 }
 0xec7   :  { %6054 = vmatpush1.bf16.msra.mxu0 %v7705_v36  ;;  %6086 = vmatpush1.bf16.msra.mxu1 %v7708_v48 }
 0xec8   :  { %6056 = vmatprep.subr.bf16.mxu0 %v7713_v2  ;;  %6088 = vmatprep.subr.bf16.mxu1 %v7715_v54 }
 0xecb   :  { %6058 = vmatpush1.bf16.msra.mxu0 %v7717_v45  ;;  %6090 = vmatpush1.bf16.msra.mxu1 %v7720_v1 }
 0xecc   :  { %6060 = vmatprep.subr.bf16.mxu0 %v7725_v59  ;;  %6092 = vmatprep.subr.bf16.mxu1 %v7727_v55 }
 0xecf   :  { %6062 = vmatpush1.bf16.msra.mxu0 %v7729_v11  ;;  %6094 = vmatpush1.bf16.msra.mxu1 %v7732_v35 }
 0xed0   :  { %6064 = vmatprep.subr.bf16.mxu0 %v7736_v51  ;;  %6096 = vmatprep.subr.bf16.mxu1 %v7739_v26 }
 0xed3   :  { %6066 = vmatpush1.bf16.msra.mxu0 %v7741_v43  ;;  %6098 = vmatpush1.bf16.msra.mxu1 %v7744_v34 }
 0xed4   :  { %6068 = vmatprep.subr.bf16.mxu0 %v7747_v49  ;;  %6100 = vmatprep.subr.bf16.mxu1 %v7749_v57 }
 0xed7   :  { %6070 = vmatpush1.bf16.msra.mxu0 %v7752_v24  ;;  %6102 = vmatpush1.bf16.msra.mxu1 %v7756_v30  ;;  %v4693_v30 = vld [vmem:[#allocation11 + $0x10] sm:$0xff] }
 0xed8   :  { %6072 = vmatprep.subr.bf16.mxu0 %v7758_v60  ;;  %6104 = vmatprep.subr.bf16.mxu1 %v7761_v3  ;;  %v4694_v60 = vld [vmem:[#allocation11 + $0x18] sm:$0xff] }
 0xed9   :  { %v6111_v9 = vpack.c.bf16 %v4694_v60, %v4693_v30 }
 0xedb   :  { %6074 = vmatpush1.bf16.msra.mxu0 %v7764_v25  ;;  %6106 = vmatpush1.bf16.msra.mxu1 %v7768_v61 }
 0xedc   :  { %6108 = vmatprep.subr.bf16.mxu0 %v6107_v46 }
 0xf91   :  { %v4332_v52 = vpop.f32.mrb[28].mxu0  ;;  %v4403_v10 = vpop.f32.mrb[44].mxu1 }
 0xf92   :  { %v6199_v4 = vadd.f32 %v4332_v52, %v7563_v37  ;;  %v4334_v5 = vpop.f32.mrb[29].mxu0  ;;  %v4405_v28 = vpop.f32.mrb[45].mxu1  ;;  %v6215_v45 = vadd.f32 %v4403_v10, %v7578_v16 }
 0xf93   :  { %v6200_v39 = vadd.f32 %v4334_v5, %v7567_v58  ;;  %v6216_v2 = vadd.f32 %v4405_v28, %v7573_v20 }
 0xf94   :  { %v4880_v36 = vmul.f32 -1.442695, %v6199_v4 }
 0xf95   :  { %v4881_v48 = vmul.f32 -1.442695, %v6200_v39  ;;  %v4882_v54 = vmul.f32 -1.442695, %v6216_v2 }
 0xf96   :  { %6500 = vpow2.f32 %v4880_v36 }
 0xf97   :  { %6502 = vpow2.f32 %v4881_v48 }
 0xf98   :  { %6504 = vpow2.f32 %v4882_v54 }
 0xf99   :  { %6506 = vtanh.f32 %v6215_v45 }
 0xfa0   :  { %v6501_v1 = vpop.eup %6500 }
 0xfa1   :  { %v6503_v59 = vpop.eup %6502  ;;  %v4415_v55 = vadd.f32 1.0, %v6501_v1 }
 0xfa2   :  { %v4421_v11 = vadd.f32 1.0, %v6503_v59  ;;  %v6505_v35 = vpop.eup %6504 }
 0xfa3   :  { %6508 = vrcp.f32 %v4415_v55  ;;  %v6507_v51 = vpop.eup %6506  ;;  %v4428_v49 = vadd.f32 1.0, %v6505_v35 }
 0xfa4   :  { %6510 = vrcp.f32 %v4421_v11 }
 0xfa5   :  { %6512 = vrcp.f32 %v4428_v49 }
 0xfad   :  { %v6509_v26 = vpop.eup %6508 }
 0xfae   :  { %v6511_v43 = vpop.eup %6510  ;;  %v4433_v34 = vmul.f32 %v6509_v26, %v6507_v51 }
 0xfaf   :  { %v4432_v57 = vmul.f32 %v6511_v43, %v7875_v6  ;;  %v6513_v3 = vpop.eup %6512 }
 0xfb1   :  { %v7923_v24 = vadd.f32 %v4433_v34, %v4432_v57 }
 0xfb3   :  { %6514 = vtanh.f32 %v7923_v24 }
 0xfbd   :  { %v6515_v25 = vpop.eup %6514 }
 0xfbe   :  { %v4436_v61 = vmul.f32 %v6515_v25, %v6513_v3 }
 0xfc0   :  { %4439 = vst [vmem:[%s7986_s8 + $0x30] sm:$0xff] %v4436_v61  ;;  %4574 = vmatmul.mubr.f32.vlgmr.msra.gmra.mrb[30].mxu0 %v4436_v61  ;;  %4645 = vmatmul.mubr.f32.vlgmr.msra.gmra.mrb[46].mxu1 %v4436_v61 }
 0xfc1   :  { %6110 = vmatpush3.bf16.msra.mxu0 %v6107_v46  ;;  %4943 = vmatprep.mubr.f32.mxu0 %v4683_v31 }
 0xfc2   :  { %6112 = vmatprep.subr.bf16.mxu0 %v6111_v9 }
 0xfc5   :  { %6114 = vmatpush3.bf16.msra.mxu0 %v6111_v9 }
 0xfc6   :  { %6116 = vmatprep.subr.bf16.mxu0 %v6115_v44 }
 0xfc9   :  { %6118 = vmatpush3.bf16.msra.mxu0 %v6115_v44 }
 0xfca   :  { %6120 = vmatprep.subr.bf16.mxu0 %v6119_v21 }
 0xfcd   :  { %6122 = vmatpush3.bf16.msra.mxu0 %v6119_v21 }
 0xfce   :  { %6124 = vmatprep.subr.bf16.mxu0 %v6123_v19 }
 0xfd1   :  { %6126 = vmatpush3.bf16.msra.mxu0 %v6123_v19 }
 0xfd2   :  { %6128 = vmatprep.subr.bf16.mxu0 %v6127_v32 }
 0xfd5   :  { %6130 = vmatpush3.bf16.msra.mxu0 %v6127_v32 }
 0xfd6   :  { %6132 = vmatprep.subr.bf16.mxu0 %v6131_v41 }
 0xfd9   :  { %6134 = vmatpush3.bf16.msra.mxu0 %v6131_v41 }
 0xfda   :  { %6136 = vmatprep.subr.bf16.mxu0 %v6135_v27 }
 0xfdd   :  { %6138 = vmatpush3.bf16.msra.mxu0 %v6135_v27 }
 0xfe0   :  { %4944 = vmatmul.mubr.f32.vlgmr.msra.gmra.mrb[32].mxu0 %v4684_v18 }
 0xfe1   :  { %4946 = vmatprep.mubr.f32.mxu0 %v4685_v15 }
 0xfe4   :  { %4947 = vmatmul.mubr.f32.gmra.mrb[34].mxu0 %v4686_v50 }
 0xfe5   :  { %4949 = vmatprep.mubr.f32.mxu0 %v7828_v23 }
 0xfe8   :  { %4950 = vmatmul.mubr.f32.gmra.mrb[36].mxu0 %v7878_v63 }
 0xfe9   :  { %4952 = vmatprep.mubr.f32.mxu0 %v4436_v61 }
0x1093   :  { %v4575_v53 = vpop.f32.mrb[30].mxu0  ;;  %v4646_v6 = vpop.f32.mrb[46].mxu1 }
0x1094   :  { %v6201_v42 = vadd.f32 %v4575_v53, %v7563_v37  ;;  %v4577_v56 = vpop.f32.mrb[31].mxu0  ;;  %v4648_v0 = vpop.f32.mrb[47].mxu1  ;;  %v6217_v23 = vadd.f32 %v4646_v6, %v7578_v16 }
0x1095   :  { %v6202_v7 = vadd.f32 %v4577_v56, %v7567_v58  ;;  %v6218_v10 = vadd.f32 %v4648_v0, %v7573_v20  ;;  %v4886_v20 = vld [vmem:[%s7985_s7] ss:$0 sm:$0xff] }
0x1096   :  { %v4883_v46 = vmul.f32 -1.442695, %v6201_v42 }
0x1097   :  { %v4884_v52 = vmul.f32 -1.442695, %v6202_v7  ;;  %v4885_v4 = vmul.f32 -1.442695, %v6218_v10 }
0x1098   :  { %6516 = vpow2.f32 %v4883_v46 }
0x1099   :  { %6518 = vpow2.f32 %v4884_v52 }
0x109a   :  { %6520 = vpow2.f32 %v4885_v4 }
0x109b   :  { %6522 = vtanh.f32 %v6217_v23 }
0x10a2   :  { %v6517_v5 = vpop.eup %6516 }
0x10a3   :  { %v6519_v63 = vpop.eup %6518  ;;  %v4658_v28 = vadd.f32 1.0, %v6517_v5 }
0x10a4   :  { %v4664_v39 = vadd.f32 1.0, %v6519_v63  ;;  %v6521_v37 = vpop.eup %6520 }
0x10a5   :  { %6524 = vrcp.f32 %v4658_v28  ;;  %v6523_v36 = vpop.eup %6522  ;;  %v4671_v54 = vadd.f32 1.0, %v6521_v37 }
0x10a6   :  { %6526 = vrcp.f32 %v4664_v39 }
0x10a7   :  { %6528 = vrcp.f32 %v4671_v54 }
0x10af   :  { %v6525_v58 = vpop.eup %6524 }
0x10b0   :  { %v6527_v48 = vpop.eup %6526  ;;  %v4676_v2 = vmul.f32 %v6525_v58, %v6523_v36 }
0x10b1   :  { %v4675_v45 = vmul.f32 %v6527_v48, %v7923_v24  ;;  %v6529_v30 = vpop.eup %6528 }
0x10b3   :  { %v4677_v16 = vadd.f32 %v4676_v2, %v4675_v45  ;;  %v4945_v1 = vpop.f32.mrb[32].mxu0 }
0x10b4   :  { %v4786_v59 = vadd.f32 %v4945_v1, %v4886_v20  ;;  %v4780_v55 = vpop.f32.mrb[33].mxu0 }
0x10b5   :  { %6530 = vtanh.f32 %v4677_v16  ;;  %v4781_v11 = vadd.f32 %v4886_v20, %v4780_v55 }
0x10b6   :  { %4820 = vst [vmem:[%s7987_s9 + $0x8] sm:$0xff] %v4786_v59 }
0x10b7   :  { %4819 = vst [vmem:[%s7987_s9] sm:$0xff] %v4781_v11  ;;  %v4948_v35 = vpop.f32.mrb[34].mxu0 }
0x10b8   :  { %v4796_v51 = vadd.f32 %v4948_v35, %v4886_v20  ;;  %v4790_v26 = vpop.f32.mrb[35].mxu0 }
0x10b9   :  { %v4791_v43 = vadd.f32 %v4886_v20, %v4790_v26 }
0x10ba   :  { %4822 = vst [vmem:[%s7987_s9 + $0x18] sm:$0xff] %v4796_v51 }
0x10bb   :  { %4821 = vst [vmem:[%s7987_s9 + $0x10] sm:$0xff] %v4791_v43  ;;  %v4951_v34 = vpop.f32.mrb[36].mxu0 }
0x10bc   :  { %v4806_v49 = vadd.f32 %v4951_v34, %v4886_v20  ;;  %v4800_v57 = vpop.f32.mrb[37].mxu0 }
0x10bd   :  { %v4801_v24 = vadd.f32 %v4886_v20, %v4800_v57 }
0x10be   :  { %4824 = vst [vmem:[%s7987_s9 + $0x28] sm:$0xff] %v4806_v49 }
0x10bf   :  { %v6531_v60 = vpop.eup %6530  ;;  %4823 = vst [vmem:[%s7987_s9 + $0x20] sm:$0xff] %v4801_v24 }
0x10c0   :  { %v4679_v3 = vmul.f32 %v6531_v60, %v6529_v30 }
0x10c2   :  { %4682 = vst [vmem:[%s7986_s8 + $0x38] sm:$0xff] %v4679_v3  ;;  %4953 = vmatmul.mubr.f32.gmra.mrb[38].mxu0 %v4679_v3 }
0x1195   :  { %v4954_v25 = vpop.f32.mrb[38].mxu0 }
0x1196   :  { %v4816_v61 = vadd.f32 %v4954_v25, %v4886_v20  ;;  %v4810_v9 = vpop.f32.mrb[39].mxu0 }
0x1197   :  { %v4811_v62 = vadd.f32 %v4886_v20, %v4810_v9 }
0x1198   :  { %4826 = vst [vmem:[%s7987_s9 + $0x38] sm:$0xff] %v4816_v61 }
0x1199   :  { %4825 = vst [vmem:[%s7987_s9 + $0x30] sm:$0xff] %v4811_v62 }
0x119a   :  { %4835 = vsyncpa [#allocation7], 1 }
0x119b   :  { %4836 = vsyncpa [#allocation9], 1 }
0x119c   :  { %4837 = vsyncpa [#allocation12], 1 }

</bundles_post_ra>
